<compile_context>
chip_gen: v7x
topology: tpu7x:2x2x1
jax: 0.10.0
libtpu: 0.0.40
codegen_flags: <defaults>
</compile_context>

<pallas_src>
import functools

import jax
import jax.numpy as jnp
from jax import lax
from jax.experimental import pallas as pl
from jax.experimental.pallas import tpu as pltpu


# Geometry (forced by Linear(9216, 10): 16*24*24 == 9216  =>  28x28 input).
_IN_W = 28
_L1 = 25 * _IN_W + 26          # 726: stride-28 flattened span of the 26x26 conv1 output
_L2 = 23 * _IN_W + 24          # 668: stride-28 flattened span of the 24x24 conv2 output
_TAP_OFFS = tuple(di * _IN_W + dj for di in range(3) for dj in range(3))  # t = di*3+dj


# ---------------------------------------------------------------------------
# Fused kernel: conv1 -> ReLU -> conv2 -> ReLU -> Linear, all in VMEM.
# ---------------------------------------------------------------------------
def _fused_mnist_kernel(x_ref, w1_ref, b1_ref, w2_ref, b2_ref, wfc_ref, fcb_ref,
                        out_ref, p2_ref, *, bt):
    w1 = w1_ref[...]            # (8, 9)    conv1 weight  [cout, tap]
    b1 = b1_ref[...]            # (8, 1)
    w2 = w2_ref[...]            # (16, 72)  conv2 weight  [cout, tap*8 + cin]
    b2 = b2_ref[...]            # (16, 1)
    fcb = fcb_ref[...]          # (1, 10)
    w1_cols = [w1[:, t:t + 1] for t in range(9)]       # 9 x (8, 1)

    for b in range(bt):
        x2d = x_ref[b]          # (1, 784) flattened 28x28 image

        # --- Conv1 + ReLU on the VPU: 9 shifted FMAs, lane-dense (726 wide). ---
        acc1 = w1_cols[0] * x2d[:, _TAP_OFFS[0]:_TAP_OFFS[0] + _L1]
        for t in range(1, 9):
            o = _TAP_OFFS[t]
            acc1 = acc1 + w1_cols[t] * x2d[:, o:o + _L1]
        h1 = jnp.maximum(acc1 + b1, 0.0)                # (8, 726)

        # --- Conv2 + ReLU on the MXU: stack the 9 shifted views into a
        #     (72, 668) tap-major patch matrix (VMEM scratch), one K=72 matmul. ---
        for t in range(9):
            o = _TAP_OFFS[t]
            p2_ref[t * 8:(t + 1) * 8, :] = h1[:, o:o + _L2]
        h2 = jnp.dot(w2, p2_ref[...], preferred_element_type=jnp.float32)  # (16, 668)
        h2 = jnp.maximum(h2 + b2, 0.0)

        # --- Linear(9216, 10): the NCHW flatten permutation and the masking of
        #     the stride-28 "garbage" columns are pre-folded into the lane-dense
        #     (16, 10, 668) weight; contract 668 lanes per conv2 channel. ---
        logits = fcb                                     # (1, 10)
        for c in range(16):
            logits = logits + lax.dot_general(
                h2[c:c + 1, :], wfc_ref[c],
                dimension_numbers=(((1,), (1,)), ((), ())),
                preferred_element_type=jnp.float32)
        out_ref[b] = logits


def _mnist_forward(prep, x):
    B = x.shape[0]
    assert x.shape[1:] == (1, 28, 28), x.shape
    bt = min(8, B)                      # images per grid step
    n_blocks = -(-B // bt)
    b_pad = n_blocks * bt
    xf = x.astype(jnp.float32).reshape(B, 1, 28 * 28)
    if b_pad != B:
        xf = jnp.concatenate(
            [xf, jnp.zeros((b_pad - B, 1, 28 * 28), jnp.float32)], axis=0)

    out = pl.pallas_call(
        functools.partial(_fused_mnist_kernel, bt=bt),
        out_shape=jax.ShapeDtypeStruct((b_pad, 1, 10), jnp.float32),
        grid_spec=pltpu.PrefetchScalarGridSpec(
            num_scalar_prefetch=0,
            grid=(n_blocks,),
            in_specs=[
                pl.BlockSpec((bt, 1, 28 * 28), lambda i: (i, 0, 0)),
                pl.BlockSpec((8, 9), lambda i: (0, 0)),
                pl.BlockSpec((8, 1), lambda i: (0, 0)),
                pl.BlockSpec((16, 72), lambda i: (0, 0)),
                pl.BlockSpec((16, 1), lambda i: (0, 0)),
                pl.BlockSpec((16, 10, _L2), lambda i: (0, 0, 0)),
                pl.BlockSpec((1, 10), lambda i: (0, 0)),
            ],
            out_specs=pl.BlockSpec((bt, 1, 10), lambda i: (i, 0, 0)),
            scratch_shapes=[pltpu.VMEM((72, _L2), jnp.float32)],
        ),
        compiler_params=pltpu.CompilerParams(
            dimension_semantics=("parallel",)),
    )(xf, prep["w1"], prep["b1"], prep["w2"], prep["b2"],
      prep["wfc"], prep["fcb"])
    return out.reshape(b_pad, 10)[:B]


mnist_classifier_forward = jax.jit(_mnist_forward)


# ---------------------------------------------------------------------------
# One-time parameter layout preparation (kept out of the per-forward hot path).
# ---------------------------------------------------------------------------
def prepare_params(params):
    w1 = params["conv1_w"].reshape(8, 9).astype(jnp.float32)               # [cout, kh*3+kw]
    b1 = params["conv1_b"].reshape(8, 1).astype(jnp.float32)
    # conv2: rows of the (72, 668) patch matrix are ordered (tap, cin) -> t*8+cin.
    w2 = params["conv2_w"].transpose(0, 2, 3, 1).reshape(16, 72).astype(jnp.float32)
    b2 = params["conv2_b"].reshape(16, 1).astype(jnp.float32)
    # FC weight: fold the NCHW flatten order and the stride-28 layout (with its
    # zeroed garbage columns j in [24, 28)) into a lane-dense (16, 10, 668) tensor.
    wf = params["fc_w"].astype(jnp.float32).reshape(10, 16, 24, 24)        # [o, c, i, j]
    wf = jnp.pad(wf, ((0, 0), (0, 0), (0, 0), (0, _IN_W - 24)))            # [o, c, i, j'] j'<28
    wf = wf.reshape(10, 16, 24 * _IN_W)[:, :, :_L2]                        # [o, c, i*28+j']
    wfc = wf.transpose(1, 0, 2)                                            # (16, 10, 668)
    fcb = params["fc_b"].reshape(1, 10).astype(jnp.float32)
    return {"w1": w1, "b1": b1, "w2": w2, "b2": b2, "wfc": wfc, "fcb": fcb}


# ---------------------------------------------------------------------------
# Deterministic parameter init (PyTorch-style layouts, used by the reference).
# ---------------------------------------------------------------------------
def init_params():
    key = jax.random.PRNGKey(0)
    ks = jax.random.split(key, 6)

    def uniform(k, shape, fan_in):
        bound = 1.0 / jnp.sqrt(fan_in)
        return jax.random.uniform(k, shape, jnp.float32, -bound, bound)

    return {
        "conv1_w": uniform(ks[0], (8, 1, 3, 3), 1 * 3 * 3),
        "conv1_b": uniform(ks[1], (8,), 1 * 3 * 3),
        "conv2_w": uniform(ks[2], (16, 8, 3, 3), 8 * 3 * 3),
        "conv2_b": uniform(ks[3], (16,), 8 * 3 * 3),
        "fc_w": uniform(ks[4], (10, 9216), 9216),
        "fc_b": uniform(ks[5], (10,), 9216),
    }


if __name__ == "__main__":
    # Spatial size is forced to 28x28 by the Linear(9216, 10) layer (16*24*24 == 9216).
    key = jax.random.PRNGKey(0)
    x = jax.random.normal(key, (2, 1, 28, 28), dtype=jnp.float32)

    params = init_params()
    prep = prepare_params(params)

    logits = mnist_classifier_forward(prep, x)
    logits = jax.block_until_ready(logits)

    assert logits.shape == (2, 10), logits.shape
    assert logits.dtype == jnp.float32

    # Sanity check against a pure-JAX reference built from the raw PyTorch-layout params.
    def ref_forward(params, x):
        h = lax.conv_general_dilated(
            x, params["conv1_w"], (1, 1), "VALID",
            dimension_numbers=("NCHW", "OIHW", "NCHW"))
        h = jnp.maximum(h + params["conv1_b"][None, :, None, None], 0.0)
        h = lax.conv_general_dilated(
            h, params["conv2_w"], (1, 1), "VALID",
            dimension_numbers=("NCHW", "OIHW", "NCHW"))
        h = jnp.maximum(h + params["conv2_b"][None, :, None, None], 0.0)
        flat = h.reshape(h.shape[0], -1)
        return flat @ params["fc_w"].T + params["fc_b"]

    ref = ref_forward(params, x)
    assert jnp.allclose(logits, ref, atol=1e-3, rtol=1e-3), \
        float(jnp.max(jnp.abs(logits - ref)))

    print("KERNEL_OK")
</pallas_src>

<mosaic_0001>
module attributes {stable_mosaic.version = 11 : i64} {
  func.func @_fused_mnist_kernel(%arg0: i32, %arg1: memref<2x1x784xf32, #tpu.memory_space<vmem>>, %arg2: memref<8x9xf32, #tpu.memory_space<vmem>>, %arg3: memref<8x1xf32, #tpu.memory_space<vmem>>, %arg4: memref<16x72xf32, #tpu.memory_space<vmem>>, %arg5: memref<16x1xf32, #tpu.memory_space<vmem>>, %arg6: memref<16x10x668xf32, #tpu.memory_space<vmem>>, %arg7: memref<1x10xf32, #tpu.memory_space<vmem>>, %arg8: memref<2x1x10xf32, #tpu.memory_space<vmem>>, %arg9: memref<72x668xf32, #tpu.memory_space<vmem>>) attributes {dimension_semantics = [#tpu.dimension_semantics<parallel>], iteration_bounds = array<i64: 1>, scalar_prefetch = 0 : i64, scratch_operands = 1 : i64, tpu.core_type = #tpu.core_type<tc>, window_params = [{transform_indices = @transform_0, window_bounds = array<i64: 2, 1, 784>}, {pipeline_mode = #tpu.pipeline_mode<synchronous>, transform_indices = @transform_1, window_bounds = array<i64: 8, 9>}, {pipeline_mode = #tpu.pipeline_mode<synchronous>, transform_indices = @transform_2, window_bounds = array<i64: 8, 1>}, {pipeline_mode = #tpu.pipeline_mode<synchronous>, transform_indices = @transform_3, window_bounds = array<i64: 16, 72>}, {pipeline_mode = #tpu.pipeline_mode<synchronous>, transform_indices = @transform_4, window_bounds = array<i64: 16, 1>}, {pipeline_mode = #tpu.pipeline_mode<synchronous>, transform_indices = @transform_5, window_bounds = array<i64: 16, 10, 668>}, {pipeline_mode = #tpu.pipeline_mode<synchronous>, transform_indices = @transform_6, window_bounds = array<i64: 1, 10>}, {transform_indices = @transform_7, window_bounds = array<i64: 2, 1, 10>}]} {
    %c0 = arith.constant 0 : index
    %c0_0 = arith.constant 0 : index
    %0 = vector.load %arg2[%c0, %c0_0] : memref<8x9xf32, #tpu.memory_space<vmem>>, vector<8x9xf32>
    %c0_1 = arith.constant 0 : index
    %c0_2 = arith.constant 0 : index
    %1 = vector.load %arg3[%c0_1, %c0_2] : memref<8x1xf32, #tpu.memory_space<vmem>>, vector<8x1xf32>
    %c0_3 = arith.constant 0 : index
    %c0_4 = arith.constant 0 : index
    %2 = vector.load %arg4[%c0_3, %c0_4] : memref<16x72xf32, #tpu.memory_space<vmem>>, vector<16x72xf32>
    %c0_5 = arith.constant 0 : index
    %c0_6 = arith.constant 0 : index
    %3 = vector.load %arg5[%c0_5, %c0_6] : memref<16x1xf32, #tpu.memory_space<vmem>>, vector<16x1xf32>
    %c0_7 = arith.constant 0 : index
    %c0_8 = arith.constant 0 : index
    %4 = vector.load %arg7[%c0_7, %c0_8] : memref<1x10xf32, #tpu.memory_space<vmem>>, vector<1x10xf32>
    %5 = vector.extract_strided_slice %0 {offsets = [0, 0], sizes = [8, 1], strides = [1, 1]} : vector<8x9xf32> to vector<8x1xf32>
    %6 = vector.extract_strided_slice %0 {offsets = [0, 1], sizes = [8, 1], strides = [1, 1]} : vector<8x9xf32> to vector<8x1xf32>
    %7 = vector.extract_strided_slice %0 {offsets = [0, 2], sizes = [8, 1], strides = [1, 1]} : vector<8x9xf32> to vector<8x1xf32>
    %8 = vector.extract_strided_slice %0 {offsets = [0, 3], sizes = [8, 1], strides = [1, 1]} : vector<8x9xf32> to vector<8x1xf32>
    %9 = vector.extract_strided_slice %0 {offsets = [0, 4], sizes = [8, 1], strides = [1, 1]} : vector<8x9xf32> to vector<8x1xf32>
    %10 = vector.extract_strided_slice %0 {offsets = [0, 5], sizes = [8, 1], strides = [1, 1]} : vector<8x9xf32> to vector<8x1xf32>
    %11 = vector.extract_strided_slice %0 {offsets = [0, 6], sizes = [8, 1], strides = [1, 1]} : vector<8x9xf32> to vector<8x1xf32>
    %12 = vector.extract_strided_slice %0 {offsets = [0, 7], sizes = [8, 1], strides = [1, 1]} : vector<8x9xf32> to vector<8x1xf32>
    %13 = vector.extract_strided_slice %0 {offsets = [0, 8], sizes = [8, 1], strides = [1, 1]} : vector<8x9xf32> to vector<8x1xf32>
    %c0_9 = arith.constant 0 : index
    %c0_10 = arith.constant 0 : index
    %c0_11 = arith.constant 0 : index
    %14 = vector.load %arg1[%c0_9, %c0_10, %c0_11] : memref<2x1x784xf32, #tpu.memory_space<vmem>>, vector<1x1x784xf32>
    %15 = vector.shape_cast %14 : vector<1x1x784xf32> to vector<1x784xf32>
    %16 = vector.extract_strided_slice %15 {offsets = [0, 0], sizes = [1, 726], strides = [1, 1]} : vector<1x784xf32> to vector<1x726xf32>
    %17 = vector.broadcast %5 : vector<8x1xf32> to vector<8x726xf32>
    %18 = vector.broadcast %16 : vector<1x726xf32> to vector<8x726xf32>
    %19 = arith.mulf %17, %18 : vector<8x726xf32>
    %20 = vector.extract_strided_slice %15 {offsets = [0, 1], sizes = [1, 726], strides = [1, 1]} : vector<1x784xf32> to vector<1x726xf32>
    %21 = vector.broadcast %6 : vector<8x1xf32> to vector<8x726xf32>
    %22 = vector.broadcast %20 : vector<1x726xf32> to vector<8x726xf32>
    %23 = arith.mulf %21, %22 : vector<8x726xf32>
    %24 = arith.addf %19, %23 : vector<8x726xf32>
    %25 = vector.extract_strided_slice %15 {offsets = [0, 2], sizes = [1, 726], strides = [1, 1]} : vector<1x784xf32> to vector<1x726xf32>
    %26 = vector.broadcast %7 : vector<8x1xf32> to vector<8x726xf32>
    %27 = vector.broadcast %25 : vector<1x726xf32> to vector<8x726xf32>
    %28 = arith.mulf %26, %27 : vector<8x726xf32>
    %29 = arith.addf %24, %28 : vector<8x726xf32>
    %30 = vector.extract_strided_slice %15 {offsets = [0, 28], sizes = [1, 726], strides = [1, 1]} : vector<1x784xf32> to vector<1x726xf32>
    %31 = vector.broadcast %8 : vector<8x1xf32> to vector<8x726xf32>
    %32 = vector.broadcast %30 : vector<1x726xf32> to vector<8x726xf32>
    %33 = arith.mulf %31, %32 : vector<8x726xf32>
    %34 = arith.addf %29, %33 : vector<8x726xf32>
    %35 = vector.extract_strided_slice %15 {offsets = [0, 29], sizes = [1, 726], strides = [1, 1]} : vector<1x784xf32> to vector<1x726xf32>
    %36 = vector.broadcast %9 : vector<8x1xf32> to vector<8x726xf32>
    %37 = vector.broadcast %35 : vector<1x726xf32> to vector<8x726xf32>
    %38 = arith.mulf %36, %37 : vector<8x726xf32>
    %39 = arith.addf %34, %38 : vector<8x726xf32>
    %40 = vector.extract_strided_slice %15 {offsets = [0, 30], sizes = [1, 726], strides = [1, 1]} : vector<1x784xf32> to vector<1x726xf32>
    %41 = vector.broadcast %10 : vector<8x1xf32> to vector<8x726xf32>
    %42 = vector.broadcast %40 : vector<1x726xf32> to vector<8x726xf32>
    %43 = arith.mulf %41, %42 : vector<8x726xf32>
    %44 = arith.addf %39, %43 : vector<8x726xf32>
    %45 = vector.extract_strided_slice %15 {offsets = [0, 56], sizes = [1, 726], strides = [1, 1]} : vector<1x784xf32> to vector<1x726xf32>
    %46 = vector.broadcast %11 : vector<8x1xf32> to vector<8x726xf32>
    %47 = vector.broadcast %45 : vector<1x726xf32> to vector<8x726xf32>
    %48 = arith.mulf %46, %47 : vector<8x726xf32>
    %49 = arith.addf %44, %48 : vector<8x726xf32>
    %50 = vector.extract_strided_slice %15 {offsets = [0, 57], sizes = [1, 726], strides = [1, 1]} : vector<1x784xf32> to vector<1x726xf32>
    %51 = vector.broadcast %12 : vector<8x1xf32> to vector<8x726xf32>
    %52 = vector.broadcast %50 : vector<1x726xf32> to vector<8x726xf32>
    %53 = arith.mulf %51, %52 : vector<8x726xf32>
    %54 = arith.addf %49, %53 : vector<8x726xf32>
    %55 = vector.extract_strided_slice %15 {offsets = [0, 58], sizes = [1, 726], strides = [1, 1]} : vector<1x784xf32> to vector<1x726xf32>
    %56 = vector.broadcast %13 : vector<8x1xf32> to vector<8x726xf32>
    %57 = vector.broadcast %55 : vector<1x726xf32> to vector<8x726xf32>
    %58 = arith.mulf %56, %57 : vector<8x726xf32>
    %59 = arith.addf %54, %58 : vector<8x726xf32>
    %60 = vector.broadcast %1 : vector<8x1xf32> to vector<8x726xf32>
    %61 = arith.addf %59, %60 : vector<8x726xf32>
    %cst = arith.constant 0.000000e+00 : f32
    %62 = vector.broadcast %cst : f32 to vector<8x726xf32>
    %63 = arith.maximumf %61, %62 : vector<8x726xf32>
    %64 = vector.extract_strided_slice %63 {offsets = [0, 0], sizes = [8, 668], strides = [1, 1]} : vector<8x726xf32> to vector<8x668xf32>
    %c0_12 = arith.constant 0 : index
    %c0_13 = arith.constant 0 : index
    %65 = vector.load %arg9[%c0_12, %c0_13] : memref<72x668xf32, #tpu.memory_space<vmem>>, vector<8x668xf32>
    tpu.vector_store %arg9[%c0_12, %c0_13], %64 {strides = array<i32>} : memref<72x668xf32, #tpu.memory_space<vmem>>, vector<8x668xf32>,
    %66 = vector.extract_strided_slice %63 {offsets = [0, 1], sizes = [8, 668], strides = [1, 1]} : vector<8x726xf32> to vector<8x668xf32>
    %c8 = arith.constant 8 : index
    %c0_14 = arith.constant 0 : index
    %67 = vector.load %arg9[%c8, %c0_14] : memref<72x668xf32, #tpu.memory_space<vmem>>, vector<8x668xf32>
    tpu.vector_store %arg9[%c8, %c0_14], %66 {strides = array<i32>} : memref<72x668xf32, #tpu.memory_space<vmem>>, vector<8x668xf32>,
    %68 = vector.extract_strided_slice %63 {offsets = [0, 2], sizes = [8, 668], strides = [1, 1]} : vector<8x726xf32> to vector<8x668xf32>
    %c16 = arith.constant 16 : index
    %c0_15 = arith.constant 0 : index
    %69 = vector.load %arg9[%c16, %c0_15] : memref<72x668xf32, #tpu.memory_space<vmem>>, vector<8x668xf32>
    tpu.vector_store %arg9[%c16, %c0_15], %68 {strides = array<i32>} : memref<72x668xf32, #tpu.memory_space<vmem>>, vector<8x668xf32>,
    %70 = vector.extract_strided_slice %63 {offsets = [0, 28], sizes = [8, 668], strides = [1, 1]} : vector<8x726xf32> to vector<8x668xf32>
    %c24 = arith.constant 24 : index
    %c0_16 = arith.constant 0 : index
    %71 = vector.load %arg9[%c24, %c0_16] : memref<72x668xf32, #tpu.memory_space<vmem>>, vector<8x668xf32>
    tpu.vector_store %arg9[%c24, %c0_16], %70 {strides = array<i32>} : memref<72x668xf32, #tpu.memory_space<vmem>>, vector<8x668xf32>,
    %72 = vector.extract_strided_slice %63 {offsets = [0, 29], sizes = [8, 668], strides = [1, 1]} : vector<8x726xf32> to vector<8x668xf32>
    %c32 = arith.constant 32 : index
    %c0_17 = arith.constant 0 : index
    %73 = vector.load %arg9[%c32, %c0_17] : memref<72x668xf32, #tpu.memory_space<vmem>>, vector<8x668xf32>
    tpu.vector_store %arg9[%c32, %c0_17], %72 {strides = array<i32>} : memref<72x668xf32, #tpu.memory_space<vmem>>, vector<8x668xf32>,
    %74 = vector.extract_strided_slice %63 {offsets = [0, 30], sizes = [8, 668], strides = [1, 1]} : vector<8x726xf32> to vector<8x668xf32>
    %c40 = arith.constant 40 : index
    %c0_18 = arith.constant 0 : index
    %75 = vector.load %arg9[%c40, %c0_18] : memref<72x668xf32, #tpu.memory_space<vmem>>, vector<8x668xf32>
    tpu.vector_store %arg9[%c40, %c0_18], %74 {strides = array<i32>} : memref<72x668xf32, #tpu.memory_space<vmem>>, vector<8x668xf32>,
    %76 = vector.extract_strided_slice %63 {offsets = [0, 56], sizes = [8, 668], strides = [1, 1]} : vector<8x726xf32> to vector<8x668xf32>
    %c48 = arith.constant 48 : index
    %c0_19 = arith.constant 0 : index
    %77 = vector.load %arg9[%c48, %c0_19] : memref<72x668xf32, #tpu.memory_space<vmem>>, vector<8x668xf32>
    tpu.vector_store %arg9[%c48, %c0_19], %76 {strides = array<i32>} : memref<72x668xf32, #tpu.memory_space<vmem>>, vector<8x668xf32>,
    %78 = vector.extract_strided_slice %63 {offsets = [0, 57], sizes = [8, 668], strides = [1, 1]} : vector<8x726xf32> to vector<8x668xf32>
    %c56 = arith.constant 56 : index
    %c0_20 = arith.constant 0 : index
    %79 = vector.load %arg9[%c56, %c0_20] : memref<72x668xf32, #tpu.memory_space<vmem>>, vector<8x668xf32>
    tpu.vector_store %arg9[%c56, %c0_20], %78 {strides = array<i32>} : memref<72x668xf32, #tpu.memory_space<vmem>>, vector<8x668xf32>,
    %80 = vector.extract_strided_slice %63 {offsets = [0, 58], sizes = [8, 668], strides = [1, 1]} : vector<8x726xf32> to vector<8x668xf32>
    %c64 = arith.constant 64 : index
    %c0_21 = arith.constant 0 : index
    %81 = vector.load %arg9[%c64, %c0_21] : memref<72x668xf32, #tpu.memory_space<vmem>>, vector<8x668xf32>
    tpu.vector_store %arg9[%c64, %c0_21], %80 {strides = array<i32>} : memref<72x668xf32, #tpu.memory_space<vmem>>, vector<8x668xf32>,
    %c0_22 = arith.constant 0 : index
    %c0_23 = arith.constant 0 : index
    %82 = vector.load %arg9[%c0_22, %c0_23] : memref<72x668xf32, #tpu.memory_space<vmem>>, vector<72x668xf32>
    %cst_24 = arith.constant dense<0.000000e+00> : vector<16x668xf32>
    %83 = tpu.matmul %2, %82, %cst_24 {dimension_numbers = #tpu.dot_dimension_numbers<[1], [0], [0], [1], [0, 0, 1, 1], [], []>} : vector<16x72xf32>, vector<72x668xf32>, vector<16x668xf32> -> vector<16x668xf32>
    %84 = vector.broadcast %3 : vector<16x1xf32> to vector<16x668xf32>
    %85 = arith.addf %83, %84 : vector<16x668xf32>
    %cst_25 = arith.constant 0.000000e+00 : f32
    %86 = vector.broadcast %cst_25 : f32 to vector<16x668xf32>
    %87 = arith.maximumf %85, %86 : vector<16x668xf32>
    %88 = vector.extract_strided_slice %87 {offsets = [0, 0], sizes = [1, 668], strides = [1, 1]} : vector<16x668xf32> to vector<1x668xf32>
    %c0_26 = arith.constant 0 : index
    %c0_27 = arith.constant 0 : index
    %c0_28 = arith.constant 0 : index
    %89 = vector.load %arg6[%c0_26, %c0_27, %c0_28] : memref<16x10x668xf32, #tpu.memory_space<vmem>>, vector<1x10x668xf32>
    %90 = vector.shape_cast %89 : vector<1x10x668xf32> to vector<10x668xf32>
    %cst_29 = arith.constant dense<0.000000e+00> : vector<1x10xf32>
    %91 = tpu.matmul %88, %90, %cst_29 {dimension_numbers = #tpu.dot_dimension_numbers<[1], [1], [0], [0], [0, 0, 1, 0], [], []>} : vector<1x668xf32>, vector<10x668xf32>, vector<1x10xf32> -> vector<1x10xf32>
    %92 = arith.addf %4, %91 : vector<1x10xf32>
    %93 = vector.extract_strided_slice %87 {offsets = [1, 0], sizes = [1, 668], strides = [1, 1]} : vector<16x668xf32> to vector<1x668xf32>
    %c1 = arith.constant 1 : index
    %c0_30 = arith.constant 0 : index
    %c0_31 = arith.constant 0 : index
    %94 = vector.load %arg6[%c1, %c0_30, %c0_31] : memref<16x10x668xf32, #tpu.memory_space<vmem>>, vector<1x10x668xf32>
    %95 = vector.shape_cast %94 : vector<1x10x668xf32> to vector<10x668xf32>
    %cst_32 = arith.constant dense<0.000000e+00> : vector<1x10xf32>
    %96 = tpu.matmul %93, %95, %cst_32 {dimension_numbers = #tpu.dot_dimension_numbers<[1], [1], [0], [0], [0, 0, 1, 0], [], []>} : vector<1x668xf32>, vector<10x668xf32>, vector<1x10xf32> -> vector<1x10xf32>
    %97 = arith.addf %92, %96 : vector<1x10xf32>
    %98 = vector.extract_strided_slice %87 {offsets = [2, 0], sizes = [1, 668], strides = [1, 1]} : vector<16x668xf32> to vector<1x668xf32>
    %c2 = arith.constant 2 : index
    %c0_33 = arith.constant 0 : index
    %c0_34 = arith.constant 0 : index
    %99 = vector.load %arg6[%c2, %c0_33, %c0_34] : memref<16x10x668xf32, #tpu.memory_space<vmem>>, vector<1x10x668xf32>
    %100 = vector.shape_cast %99 : vector<1x10x668xf32> to vector<10x668xf32>
    %cst_35 = arith.constant dense<0.000000e+00> : vector<1x10xf32>
    %101 = tpu.matmul %98, %100, %cst_35 {dimension_numbers = #tpu.dot_dimension_numbers<[1], [1], [0], [0], [0, 0, 1, 0], [], []>} : vector<1x668xf32>, vector<10x668xf32>, vector<1x10xf32> -> vector<1x10xf32>
    %102 = arith.addf %97, %101 : vector<1x10xf32>
    %103 = vector.extract_strided_slice %87 {offsets = [3, 0], sizes = [1, 668], strides = [1, 1]} : vector<16x668xf32> to vector<1x668xf32>
    %c3 = arith.constant 3 : index
    %c0_36 = arith.constant 0 : index
    %c0_37 = arith.constant 0 : index
    %104 = vector.load %arg6[%c3, %c0_36, %c0_37] : memref<16x10x668xf32, #tpu.memory_space<vmem>>, vector<1x10x668xf32>
    %105 = vector.shape_cast %104 : vector<1x10x668xf32> to vector<10x668xf32>
    %cst_38 = arith.constant dense<0.000000e+00> : vector<1x10xf32>
    %106 = tpu.matmul %103, %105, %cst_38 {dimension_numbers = #tpu.dot_dimension_numbers<[1], [1], [0], [0], [0, 0, 1, 0], [], []>} : vector<1x668xf32>, vector<10x668xf32>, vector<1x10xf32> -> vector<1x10xf32>
    %107 = arith.addf %102, %106 : vector<1x10xf32>
    %108 = vector.extract_strided_slice %87 {offsets = [4, 0], sizes = [1, 668], strides = [1, 1]} : vector<16x668xf32> to vector<1x668xf32>
    %c4 = arith.constant 4 : index
    %c0_39 = arith.constant 0 : index
    %c0_40 = arith.constant 0 : index
    %109 = vector.load %arg6[%c4, %c0_39, %c0_40] : memref<16x10x668xf32, #tpu.memory_space<vmem>>, vector<1x10x668xf32>
    %110 = vector.shape_cast %109 : vector<1x10x668xf32> to vector<10x668xf32>
    %cst_41 = arith.constant dense<0.000000e+00> : vector<1x10xf32>
    %111 = tpu.matmul %108, %110, %cst_41 {dimension_numbers = #tpu.dot_dimension_numbers<[1], [1], [0], [0], [0, 0, 1, 0], [], []>} : vector<1x668xf32>, vector<10x668xf32>, vector<1x10xf32> -> vector<1x10xf32>
    %112 = arith.addf %107, %111 : vector<1x10xf32>
    %113 = vector.extract_strided_slice %87 {offsets = [5, 0], sizes = [1, 668], strides = [1, 1]} : vector<16x668xf32> to vector<1x668xf32>
    %c5 = arith.constant 5 : index
    %c0_42 = arith.constant 0 : index
    %c0_43 = arith.constant 0 : index
    %114 = vector.load %arg6[%c5, %c0_42, %c0_43] : memref<16x10x668xf32, #tpu.memory_space<vmem>>, vector<1x10x668xf32>
    %115 = vector.shape_cast %114 : vector<1x10x668xf32> to vector<10x668xf32>
    %cst_44 = arith.constant dense<0.000000e+00> : vector<1x10xf32>
    %116 = tpu.matmul %113, %115, %cst_44 {dimension_numbers = #tpu.dot_dimension_numbers<[1], [1], [0], [0], [0, 0, 1, 0], [], []>} : vector<1x668xf32>, vector<10x668xf32>, vector<1x10xf32> -> vector<1x10xf32>
    %117 = arith.addf %112, %116 : vector<1x10xf32>
    %118 = vector.extract_strided_slice %87 {offsets = [6, 0], sizes = [1, 668], strides = [1, 1]} : vector<16x668xf32> to vector<1x668xf32>
    %c6 = arith.constant 6 : index
    %c0_45 = arith.constant 0 : index
    %c0_46 = arith.constant 0 : index
    %119 = vector.load %arg6[%c6, %c0_45, %c0_46] : memref<16x10x668xf32, #tpu.memory_space<vmem>>, vector<1x10x668xf32>
    %120 = vector.shape_cast %119 : vector<1x10x668xf32> to vector<10x668xf32>
    %cst_47 = arith.constant dense<0.000000e+00> : vector<1x10xf32>
    %121 = tpu.matmul %118, %120, %cst_47 {dimension_numbers = #tpu.dot_dimension_numbers<[1], [1], [0], [0], [0, 0, 1, 0], [], []>} : vector<1x668xf32>, vector<10x668xf32>, vector<1x10xf32> -> vector<1x10xf32>
    %122 = arith.addf %117, %121 : vector<1x10xf32>
    %123 = vector.extract_strided_slice %87 {offsets = [7, 0], sizes = [1, 668], strides = [1, 1]} : vector<16x668xf32> to vector<1x668xf32>
    %c7 = arith.constant 7 : index
    %c0_48 = arith.constant 0 : index
    %c0_49 = arith.constant 0 : index
    %124 = vector.load %arg6[%c7, %c0_48, %c0_49] : memref<16x10x668xf32, #tpu.memory_space<vmem>>, vector<1x10x668xf32>
    %125 = vector.shape_cast %124 : vector<1x10x668xf32> to vector<10x668xf32>
    %cst_50 = arith.constant dense<0.000000e+00> : vector<1x10xf32>
    %126 = tpu.matmul %123, %125, %cst_50 {dimension_numbers = #tpu.dot_dimension_numbers<[1], [1], [0], [0], [0, 0, 1, 0], [], []>} : vector<1x668xf32>, vector<10x668xf32>, vector<1x10xf32> -> vector<1x10xf32>
    %127 = arith.addf %122, %126 : vector<1x10xf32>
    %128 = vector.extract_strided_slice %87 {offsets = [8, 0], sizes = [1, 668], strides = [1, 1]} : vector<16x668xf32> to vector<1x668xf32>
    %c8_51 = arith.constant 8 : index
    %c0_52 = arith.constant 0 : index
    %c0_53 = arith.constant 0 : index
    %129 = vector.load %arg6[%c8_51, %c0_52, %c0_53] : memref<16x10x668xf32, #tpu.memory_space<vmem>>, vector<1x10x668xf32>
    %130 = vector.shape_cast %129 : vector<1x10x668xf32> to vector<10x668xf32>
    %cst_54 = arith.constant dense<0.000000e+00> : vector<1x10xf32>
    %131 = tpu.matmul %128, %130, %cst_54 {dimension_numbers = #tpu.dot_dimension_numbers<[1], [1], [0], [0], [0, 0, 1, 0], [], []>} : vector<1x668xf32>, vector<10x668xf32>, vector<1x10xf32> -> vector<1x10xf32>
    %132 = arith.addf %127, %131 : vector<1x10xf32>
    %133 = vector.extract_strided_slice %87 {offsets = [9, 0], sizes = [1, 668], strides = [1, 1]} : vector<16x668xf32> to vector<1x668xf32>
    %c9 = arith.constant 9 : index
    %c0_55 = arith.constant 0 : index
    %c0_56 = arith.constant 0 : index
    %134 = vector.load %arg6[%c9, %c0_55, %c0_56] : memref<16x10x668xf32, #tpu.memory_space<vmem>>, vector<1x10x668xf32>
    %135 = vector.shape_cast %134 : vector<1x10x668xf32> to vector<10x668xf32>
    %cst_57 = arith.constant dense<0.000000e+00> : vector<1x10xf32>
    %136 = tpu.matmul %133, %135, %cst_57 {dimension_numbers = #tpu.dot_dimension_numbers<[1], [1], [0], [0], [0, 0, 1, 0], [], []>} : vector<1x668xf32>, vector<10x668xf32>, vector<1x10xf32> -> vector<1x10xf32>
    %137 = arith.addf %132, %136 : vector<1x10xf32>
    %138 = vector.extract_strided_slice %87 {offsets = [10, 0], sizes = [1, 668], strides = [1, 1]} : vector<16x668xf32> to vector<1x668xf32>
    %c10 = arith.constant 10 : index
    %c0_58 = arith.constant 0 : index
    %c0_59 = arith.constant 0 : index
    %139 = vector.load %arg6[%c10, %c0_58, %c0_59] : memref<16x10x668xf32, #tpu.memory_space<vmem>>, vector<1x10x668xf32>
    %140 = vector.shape_cast %139 : vector<1x10x668xf32> to vector<10x668xf32>
    %cst_60 = arith.constant dense<0.000000e+00> : vector<1x10xf32>
    %141 = tpu.matmul %138, %140, %cst_60 {dimension_numbers = #tpu.dot_dimension_numbers<[1], [1], [0], [0], [0, 0, 1, 0], [], []>} : vector<1x668xf32>, vector<10x668xf32>, vector<1x10xf32> -> vector<1x10xf32>
    %142 = arith.addf %137, %141 : vector<1x10xf32>
    %143 = vector.extract_strided_slice %87 {offsets = [11, 0], sizes = [1, 668], strides = [1, 1]} : vector<16x668xf32> to vector<1x668xf32>
    %c11 = arith.constant 11 : index
    %c0_61 = arith.constant 0 : index
    %c0_62 = arith.constant 0 : index
    %144 = vector.load %arg6[%c11, %c0_61, %c0_62] : memref<16x10x668xf32, #tpu.memory_space<vmem>>, vector<1x10x668xf32>
    %145 = vector.shape_cast %144 : vector<1x10x668xf32> to vector<10x668xf32>
    %cst_63 = arith.constant dense<0.000000e+00> : vector<1x10xf32>
    %146 = tpu.matmul %143, %145, %cst_63 {dimension_numbers = #tpu.dot_dimension_numbers<[1], [1], [0], [0], [0, 0, 1, 0], [], []>} : vector<1x668xf32>, vector<10x668xf32>, vector<1x10xf32> -> vector<1x10xf32>
    %147 = arith.addf %142, %146 : vector<1x10xf32>
    %148 = vector.extract_strided_slice %87 {offsets = [12, 0], sizes = [1, 668], strides = [1, 1]} : vector<16x668xf32> to vector<1x668xf32>
    %c12 = arith.constant 12 : index
    %c0_64 = arith.constant 0 : index
    %c0_65 = arith.constant 0 : index
    %149 = vector.load %arg6[%c12, %c0_64, %c0_65] : memref<16x10x668xf32, #tpu.memory_space<vmem>>, vector<1x10x668xf32>
    %150 = vector.shape_cast %149 : vector<1x10x668xf32> to vector<10x668xf32>
    %cst_66 = arith.constant dense<0.000000e+00> : vector<1x10xf32>
    %151 = tpu.matmul %148, %150, %cst_66 {dimension_numbers = #tpu.dot_dimension_numbers<[1], [1], [0], [0], [0, 0, 1, 0], [], []>} : vector<1x668xf32>, vector<10x668xf32>, vector<1x10xf32> -> vector<1x10xf32>
    %152 = arith.addf %147, %151 : vector<1x10xf32>
    %153 = vector.extract_strided_slice %87 {offsets = [13, 0], sizes = [1, 668], strides = [1, 1]} : vector<16x668xf32> to vector<1x668xf32>
    %c13 = arith.constant 13 : index
    %c0_67 = arith.constant 0 : index
    %c0_68 = arith.constant 0 : index
    %154 = vector.load %arg6[%c13, %c0_67, %c0_68] : memref<16x10x668xf32, #tpu.memory_space<vmem>>, vector<1x10x668xf32>
    %155 = vector.shape_cast %154 : vector<1x10x668xf32> to vector<10x668xf32>
    %cst_69 = arith.constant dense<0.000000e+00> : vector<1x10xf32>
    %156 = tpu.matmul %153, %155, %cst_69 {dimension_numbers = #tpu.dot_dimension_numbers<[1], [1], [0], [0], [0, 0, 1, 0], [], []>} : vector<1x668xf32>, vector<10x668xf32>, vector<1x10xf32> -> vector<1x10xf32>
    %157 = arith.addf %152, %156 : vector<1x10xf32>
    %158 = vector.extract_strided_slice %87 {offsets = [14, 0], sizes = [1, 668], strides = [1, 1]} : vector<16x668xf32> to vector<1x668xf32>
    %c14 = arith.constant 14 : index
    %c0_70 = arith.constant 0 : index
    %c0_71 = arith.constant 0 : index
    %159 = vector.load %arg6[%c14, %c0_70, %c0_71] : memref<16x10x668xf32, #tpu.memory_space<vmem>>, vector<1x10x668xf32>
    %160 = vector.shape_cast %159 : vector<1x10x668xf32> to vector<10x668xf32>
    %cst_72 = arith.constant dense<0.000000e+00> : vector<1x10xf32>
    %161 = tpu.matmul %158, %160, %cst_72 {dimension_numbers = #tpu.dot_dimension_numbers<[1], [1], [0], [0], [0, 0, 1, 0], [], []>} : vector<1x668xf32>, vector<10x668xf32>, vector<1x10xf32> -> vector<1x10xf32>
    %162 = arith.addf %157, %161 : vector<1x10xf32>
    %163 = vector.extract_strided_slice %87 {offsets = [15, 0], sizes = [1, 668], strides = [1, 1]} : vector<16x668xf32> to vector<1x668xf32>
    %c15 = arith.constant 15 : index
    %c0_73 = arith.constant 0 : index
    %c0_74 = arith.constant 0 : index
    %164 = vector.load %arg6[%c15, %c0_73, %c0_74] : memref<16x10x668xf32, #tpu.memory_space<vmem>>, vector<1x10x668xf32>
    %165 = vector.shape_cast %164 : vector<1x10x668xf32> to vector<10x668xf32>
    %cst_75 = arith.constant dense<0.000000e+00> : vector<1x10xf32>
    %166 = tpu.matmul %163, %165, %cst_75 {dimension_numbers = #tpu.dot_dimension_numbers<[1], [1], [0], [0], [0, 0, 1, 0], [], []>} : vector<1x668xf32>, vector<10x668xf32>, vector<1x10xf32> -> vector<1x10xf32>
    %167 = arith.addf %162, %166 : vector<1x10xf32>
    %c0_76 = arith.constant 0 : index
    %c0_77 = arith.constant 0 : index
    %c0_78 = arith.constant 0 : index
    %168 = vector.load %arg8[%c0_76, %c0_77, %c0_78] : memref<2x1x10xf32, #tpu.memory_space<vmem>>, vector<1x1x10xf32>
    %169 = vector.shape_cast %168 : vector<1x1x10xf32> to vector<1x10xf32>
    %170 = vector.shape_cast %167 : vector<1x10xf32> to vector<1x1x10xf32>
    tpu.vector_store %arg8[%c0_76, %c0_77, %c0_78], %170 {strides = array<i32>} : memref<2x1x10xf32, #tpu.memory_space<vmem>>, vector<1x1x10xf32>,
    %c1_79 = arith.constant 1 : index
    %c0_80 = arith.constant 0 : index
    %c0_81 = arith.constant 0 : index
    %171 = vector.load %arg1[%c1_79, %c0_80, %c0_81] : memref<2x1x784xf32, #tpu.memory_space<vmem>>, vector<1x1x784xf32>
    %172 = vector.shape_cast %171 : vector<1x1x784xf32> to vector<1x784xf32>
    %173 = vector.extract_strided_slice %172 {offsets = [0, 0], sizes = [1, 726], strides = [1, 1]} : vector<1x784xf32> to vector<1x726xf32>
    %174 = vector.broadcast %5 : vector<8x1xf32> to vector<8x726xf32>
    %175 = vector.broadcast %173 : vector<1x726xf32> to vector<8x726xf32>
    %176 = arith.mulf %174, %175 : vector<8x726xf32>
    %177 = vector.extract_strided_slice %172 {offsets = [0, 1], sizes = [1, 726], strides = [1, 1]} : vector<1x784xf32> to vector<1x726xf32>
    %178 = vector.broadcast %6 : vector<8x1xf32> to vector<8x726xf32>
    %179 = vector.broadcast %177 : vector<1x726xf32> to vector<8x726xf32>
    %180 = arith.mulf %178, %179 : vector<8x726xf32>
    %181 = arith.addf %176, %180 : vector<8x726xf32>
    %182 = vector.extract_strided_slice %172 {offsets = [0, 2], sizes = [1, 726], strides = [1, 1]} : vector<1x784xf32> to vector<1x726xf32>
    %183 = vector.broadcast %7 : vector<8x1xf32> to vector<8x726xf32>
    %184 = vector.broadcast %182 : vector<1x726xf32> to vector<8x726xf32>
    %185 = arith.mulf %183, %184 : vector<8x726xf32>
    %186 = arith.addf %181, %185 : vector<8x726xf32>
    %187 = vector.extract_strided_slice %172 {offsets = [0, 28], sizes = [1, 726], strides = [1, 1]} : vector<1x784xf32> to vector<1x726xf32>
    %188 = vector.broadcast %8 : vector<8x1xf32> to vector<8x726xf32>
    %189 = vector.broadcast %187 : vector<1x726xf32> to vector<8x726xf32>
    %190 = arith.mulf %188, %189 : vector<8x726xf32>
    %191 = arith.addf %186, %190 : vector<8x726xf32>
    %192 = vector.extract_strided_slice %172 {offsets = [0, 29], sizes = [1, 726], strides = [1, 1]} : vector<1x784xf32> to vector<1x726xf32>
    %193 = vector.broadcast %9 : vector<8x1xf32> to vector<8x726xf32>
    %194 = vector.broadcast %192 : vector<1x726xf32> to vector<8x726xf32>
    %195 = arith.mulf %193, %194 : vector<8x726xf32>
    %196 = arith.addf %191, %195 : vector<8x726xf32>
    %197 = vector.extract_strided_slice %172 {offsets = [0, 30], sizes = [1, 726], strides = [1, 1]} : vector<1x784xf32> to vector<1x726xf32>
    %198 = vector.broadcast %10 : vector<8x1xf32> to vector<8x726xf32>
    %199 = vector.broadcast %197 : vector<1x726xf32> to vector<8x726xf32>
    %200 = arith.mulf %198, %199 : vector<8x726xf32>
    %201 = arith.addf %196, %200 : vector<8x726xf32>
    %202 = vector.extract_strided_slice %172 {offsets = [0, 56], sizes = [1, 726], strides = [1, 1]} : vector<1x784xf32> to vector<1x726xf32>
    %203 = vector.broadcast %11 : vector<8x1xf32> to vector<8x726xf32>
    %204 = vector.broadcast %202 : vector<1x726xf32> to vector<8x726xf32>
    %205 = arith.mulf %203, %204 : vector<8x726xf32>
    %206 = arith.addf %201, %205 : vector<8x726xf32>
    %207 = vector.extract_strided_slice %172 {offsets = [0, 57], sizes = [1, 726], strides = [1, 1]} : vector<1x784xf32> to vector<1x726xf32>
    %208 = vector.broadcast %12 : vector<8x1xf32> to vector<8x726xf32>
    %209 = vector.broadcast %207 : vector<1x726xf32> to vector<8x726xf32>
    %210 = arith.mulf %208, %209 : vector<8x726xf32>
    %211 = arith.addf %206, %210 : vector<8x726xf32>
    %212 = vector.extract_strided_slice %172 {offsets = [0, 58], sizes = [1, 726], strides = [1, 1]} : vector<1x784xf32> to vector<1x726xf32>
    %213 = vector.broadcast %13 : vector<8x1xf32> to vector<8x726xf32>
    %214 = vector.broadcast %212 : vector<1x726xf32> to vector<8x726xf32>
    %215 = arith.mulf %213, %214 : vector<8x726xf32>
    %216 = arith.addf %211, %215 : vector<8x726xf32>
    %217 = vector.broadcast %1 : vector<8x1xf32> to vector<8x726xf32>
    %218 = arith.addf %216, %217 : vector<8x726xf32>
    %cst_82 = arith.constant 0.000000e+00 : f32
    %219 = vector.broadcast %cst_82 : f32 to vector<8x726xf32>
    %220 = arith.maximumf %218, %219 : vector<8x726xf32>
    %221 = vector.extract_strided_slice %220 {offsets = [0, 0], sizes = [8, 668], strides = [1, 1]} : vector<8x726xf32> to vector<8x668xf32>
    %c0_83 = arith.constant 0 : index
    %c0_84 = arith.constant 0 : index
    %222 = vector.load %arg9[%c0_83, %c0_84] : memref<72x668xf32, #tpu.memory_space<vmem>>, vector<8x668xf32>
    tpu.vector_store %arg9[%c0_83, %c0_84], %221 {strides = array<i32>} : memref<72x668xf32, #tpu.memory_space<vmem>>, vector<8x668xf32>,
    %223 = vector.extract_strided_slice %220 {offsets = [0, 1], sizes = [8, 668], strides = [1, 1]} : vector<8x726xf32> to vector<8x668xf32>
    %c8_85 = arith.constant 8 : index
    %c0_86 = arith.constant 0 : index
    %224 = vector.load %arg9[%c8_85, %c0_86] : memref<72x668xf32, #tpu.memory_space<vmem>>, vector<8x668xf32>
    tpu.vector_store %arg9[%c8_85, %c0_86], %223 {strides = array<i32>} : memref<72x668xf32, #tpu.memory_space<vmem>>, vector<8x668xf32>,
    %225 = vector.extract_strided_slice %220 {offsets = [0, 2], sizes = [8, 668], strides = [1, 1]} : vector<8x726xf32> to vector<8x668xf32>
    %c16_87 = arith.constant 16 : index
    %c0_88 = arith.constant 0 : index
    %226 = vector.load %arg9[%c16_87, %c0_88] : memref<72x668xf32, #tpu.memory_space<vmem>>, vector<8x668xf32>
    tpu.vector_store %arg9[%c16_87, %c0_88], %225 {strides = array<i32>} : memref<72x668xf32, #tpu.memory_space<vmem>>, vector<8x668xf32>,
    %227 = vector.extract_strided_slice %220 {offsets = [0, 28], sizes = [8, 668], strides = [1, 1]} : vector<8x726xf32> to vector<8x668xf32>
    %c24_89 = arith.constant 24 : index
    %c0_90 = arith.constant 0 : index
    %228 = vector.load %arg9[%c24_89, %c0_90] : memref<72x668xf32, #tpu.memory_space<vmem>>, vector<8x668xf32>
    tpu.vector_store %arg9[%c24_89, %c0_90], %227 {strides = array<i32>} : memref<72x668xf32, #tpu.memory_space<vmem>>, vector<8x668xf32>,
    %229 = vector.extract_strided_slice %220 {offsets = [0, 29], sizes = [8, 668], strides = [1, 1]} : vector<8x726xf32> to vector<8x668xf32>
    %c32_91 = arith.constant 32 : index
    %c0_92 = arith.constant 0 : index
    %230 = vector.load %arg9[%c32_91, %c0_92] : memref<72x668xf32, #tpu.memory_space<vmem>>, vector<8x668xf32>
    tpu.vector_store %arg9[%c32_91, %c0_92], %229 {strides = array<i32>} : memref<72x668xf32, #tpu.memory_space<vmem>>, vector<8x668xf32>,
    %231 = vector.extract_strided_slice %220 {offsets = [0, 30], sizes = [8, 668], strides = [1, 1]} : vector<8x726xf32> to vector<8x668xf32>
    %c40_93 = arith.constant 40 : index
    %c0_94 = arith.constant 0 : index
    %232 = vector.load %arg9[%c40_93, %c0_94] : memref<72x668xf32, #tpu.memory_space<vmem>>, vector<8x668xf32>
    tpu.vector_store %arg9[%c40_93, %c0_94], %231 {strides = array<i32>} : memref<72x668xf32, #tpu.memory_space<vmem>>, vector<8x668xf32>,
    %233 = vector.extract_strided_slice %220 {offsets = [0, 56], sizes = [8, 668], strides = [1, 1]} : vector<8x726xf32> to vector<8x668xf32>
    %c48_95 = arith.constant 48 : index
    %c0_96 = arith.constant 0 : index
    %234 = vector.load %arg9[%c48_95, %c0_96] : memref<72x668xf32, #tpu.memory_space<vmem>>, vector<8x668xf32>
    tpu.vector_store %arg9[%c48_95, %c0_96], %233 {strides = array<i32>} : memref<72x668xf32, #tpu.memory_space<vmem>>, vector<8x668xf32>,
    %235 = vector.extract_strided_slice %220 {offsets = [0, 57], sizes = [8, 668], strides = [1, 1]} : vector<8x726xf32> to vector<8x668xf32>
    %c56_97 = arith.constant 56 : index
    %c0_98 = arith.constant 0 : index
    %236 = vector.load %arg9[%c56_97, %c0_98] : memref<72x668xf32, #tpu.memory_space<vmem>>, vector<8x668xf32>
    tpu.vector_store %arg9[%c56_97, %c0_98], %235 {strides = array<i32>} : memref<72x668xf32, #tpu.memory_space<vmem>>, vector<8x668xf32>,
    %237 = vector.extract_strided_slice %220 {offsets = [0, 58], sizes = [8, 668], strides = [1, 1]} : vector<8x726xf32> to vector<8x668xf32>
    %c64_99 = arith.constant 64 : index
    %c0_100 = arith.constant 0 : index
    %238 = vector.load %arg9[%c64_99, %c0_100] : memref<72x668xf32, #tpu.memory_space<vmem>>, vector<8x668xf32>
    tpu.vector_store %arg9[%c64_99, %c0_100], %237 {strides = array<i32>} : memref<72x668xf32, #tpu.memory_space<vmem>>, vector<8x668xf32>,
    %c0_101 = arith.constant 0 : index
    %c0_102 = arith.constant 0 : index
    %239 = vector.load %arg9[%c0_101, %c0_102] : memref<72x668xf32, #tpu.memory_space<vmem>>, vector<72x668xf32>
    %cst_103 = arith.constant dense<0.000000e+00> : vector<16x668xf32>
    %240 = tpu.matmul %2, %239, %cst_103 {dimension_numbers = #tpu.dot_dimension_numbers<[1], [0], [0], [1], [0, 0, 1, 1], [], []>} : vector<16x72xf32>, vector<72x668xf32>, vector<16x668xf32> -> vector<16x668xf32>
    %241 = vector.broadcast %3 : vector<16x1xf32> to vector<16x668xf32>
    %242 = arith.addf %240, %241 : vector<16x668xf32>
    %cst_104 = arith.constant 0.000000e+00 : f32
    %243 = vector.broadcast %cst_104 : f32 to vector<16x668xf32>
    %244 = arith.maximumf %242, %243 : vector<16x668xf32>
    %245 = vector.extract_strided_slice %244 {offsets = [0, 0], sizes = [1, 668], strides = [1, 1]} : vector<16x668xf32> to vector<1x668xf32>
    %c0_105 = arith.constant 0 : index
    %c0_106 = arith.constant 0 : index
    %c0_107 = arith.constant 0 : index
    %246 = vector.load %arg6[%c0_105, %c0_106, %c0_107] : memref<16x10x668xf32, #tpu.memory_space<vmem>>, vector<1x10x668xf32>
    %247 = vector.shape_cast %246 : vector<1x10x668xf32> to vector<10x668xf32>
    %cst_108 = arith.constant dense<0.000000e+00> : vector<1x10xf32>
    %248 = tpu.matmul %245, %247, %cst_108 {dimension_numbers = #tpu.dot_dimension_numbers<[1], [1], [0], [0], [0, 0, 1, 0], [], []>} : vector<1x668xf32>, vector<10x668xf32>, vector<1x10xf32> -> vector<1x10xf32>
    %249 = arith.addf %4, %248 : vector<1x10xf32>
    %250 = vector.extract_strided_slice %244 {offsets = [1, 0], sizes = [1, 668], strides = [1, 1]} : vector<16x668xf32> to vector<1x668xf32>
    %c1_109 = arith.constant 1 : index
    %c0_110 = arith.constant 0 : index
    %c0_111 = arith.constant 0 : index
    %251 = vector.load %arg6[%c1_109, %c0_110, %c0_111] : memref<16x10x668xf32, #tpu.memory_space<vmem>>, vector<1x10x668xf32>
    %252 = vector.shape_cast %251 : vector<1x10x668xf32> to vector<10x668xf32>
    %cst_112 = arith.constant dense<0.000000e+00> : vector<1x10xf32>
    %253 = tpu.matmul %250, %252, %cst_112 {dimension_numbers = #tpu.dot_dimension_numbers<[1], [1], [0], [0], [0, 0, 1, 0], [], []>} : vector<1x668xf32>, vector<10x668xf32>, vector<1x10xf32> -> vector<1x10xf32>
    %254 = arith.addf %249, %253 : vector<1x10xf32>
    %255 = vector.extract_strided_slice %244 {offsets = [2, 0], sizes = [1, 668], strides = [1, 1]} : vector<16x668xf32> to vector<1x668xf32>
    %c2_113 = arith.constant 2 : index
    %c0_114 = arith.constant 0 : index
    %c0_115 = arith.constant 0 : index
    %256 = vector.load %arg6[%c2_113, %c0_114, %c0_115] : memref<16x10x668xf32, #tpu.memory_space<vmem>>, vector<1x10x668xf32>
    %257 = vector.shape_cast %256 : vector<1x10x668xf32> to vector<10x668xf32>
    %cst_116 = arith.constant dense<0.000000e+00> : vector<1x10xf32>
    %258 = tpu.matmul %255, %257, %cst_116 {dimension_numbers = #tpu.dot_dimension_numbers<[1], [1], [0], [0], [0, 0, 1, 0], [], []>} : vector<1x668xf32>, vector<10x668xf32>, vector<1x10xf32> -> vector<1x10xf32>
    %259 = arith.addf %254, %258 : vector<1x10xf32>
    %260 = vector.extract_strided_slice %244 {offsets = [3, 0], sizes = [1, 668], strides = [1, 1]} : vector<16x668xf32> to vector<1x668xf32>
    %c3_117 = arith.constant 3 : index
    %c0_118 = arith.constant 0 : index
    %c0_119 = arith.constant 0 : index
    %261 = vector.load %arg6[%c3_117, %c0_118, %c0_119] : memref<16x10x668xf32, #tpu.memory_space<vmem>>, vector<1x10x668xf32>
    %262 = vector.shape_cast %261 : vector<1x10x668xf32> to vector<10x668xf32>
    %cst_120 = arith.constant dense<0.000000e+00> : vector<1x10xf32>
    %263 = tpu.matmul %260, %262, %cst_120 {dimension_numbers = #tpu.dot_dimension_numbers<[1], [1], [0], [0], [0, 0, 1, 0], [], []>} : vector<1x668xf32>, vector<10x668xf32>, vector<1x10xf32> -> vector<1x10xf32>
    %264 = arith.addf %259, %263 : vector<1x10xf32>
    %265 = vector.extract_strided_slice %244 {offsets = [4, 0], sizes = [1, 668], strides = [1, 1]} : vector<16x668xf32> to vector<1x668xf32>
    %c4_121 = arith.constant 4 : index
    %c0_122 = arith.constant 0 : index
    %c0_123 = arith.constant 0 : index
    %266 = vector.load %arg6[%c4_121, %c0_122, %c0_123] : memref<16x10x668xf32, #tpu.memory_space<vmem>>, vector<1x10x668xf32>
    %267 = vector.shape_cast %266 : vector<1x10x668xf32> to vector<10x668xf32>
    %cst_124 = arith.constant dense<0.000000e+00> : vector<1x10xf32>
    %268 = tpu.matmul %265, %267, %cst_124 {dimension_numbers = #tpu.dot_dimension_numbers<[1], [1], [0], [0], [0, 0, 1, 0], [], []>} : vector<1x668xf32>, vector<10x668xf32>, vector<1x10xf32> -> vector<1x10xf32>
    %269 = arith.addf %264, %268 : vector<1x10xf32>
    %270 = vector.extract_strided_slice %244 {offsets = [5, 0], sizes = [1, 668], strides = [1, 1]} : vector<16x668xf32> to vector<1x668xf32>
    %c5_125 = arith.constant 5 : index
    %c0_126 = arith.constant 0 : index
    %c0_127 = arith.constant 0 : index
    %271 = vector.load %arg6[%c5_125, %c0_126, %c0_127] : memref<16x10x668xf32, #tpu.memory_space<vmem>>, vector<1x10x668xf32>
    %272 = vector.shape_cast %271 : vector<1x10x668xf32> to vector<10x668xf32>
    %cst_128 = arith.constant dense<0.000000e+00> : vector<1x10xf32>
    %273 = tpu.matmul %270, %272, %cst_128 {dimension_numbers = #tpu.dot_dimension_numbers<[1], [1], [0], [0], [0, 0, 1, 0], [], []>} : vector<1x668xf32>, vector<10x668xf32>, vector<1x10xf32> -> vector<1x10xf32>
    %274 = arith.addf %269, %273 : vector<1x10xf32>
    %275 = vector.extract_strided_slice %244 {offsets = [6, 0], sizes = [1, 668], strides = [1, 1]} : vector<16x668xf32> to vector<1x668xf32>
    %c6_129 = arith.constant 6 : index
    %c0_130 = arith.constant 0 : index
    %c0_131 = arith.constant 0 : index
    %276 = vector.load %arg6[%c6_129, %c0_130, %c0_131] : memref<16x10x668xf32, #tpu.memory_space<vmem>>, vector<1x10x668xf32>
    %277 = vector.shape_cast %276 : vector<1x10x668xf32> to vector<10x668xf32>
    %cst_132 = arith.constant dense<0.000000e+00> : vector<1x10xf32>
    %278 = tpu.matmul %275, %277, %cst_132 {dimension_numbers = #tpu.dot_dimension_numbers<[1], [1], [0], [0], [0, 0, 1, 0], [], []>} : vector<1x668xf32>, vector<10x668xf32>, vector<1x10xf32> -> vector<1x10xf32>
    %279 = arith.addf %274, %278 : vector<1x10xf32>
    %280 = vector.extract_strided_slice %244 {offsets = [7, 0], sizes = [1, 668], strides = [1, 1]} : vector<16x668xf32> to vector<1x668xf32>
    %c7_133 = arith.constant 7 : index
    %c0_134 = arith.constant 0 : index
    %c0_135 = arith.constant 0 : index
    %281 = vector.load %arg6[%c7_133, %c0_134, %c0_135] : memref<16x10x668xf32, #tpu.memory_space<vmem>>, vector<1x10x668xf32>
    %282 = vector.shape_cast %281 : vector<1x10x668xf32> to vector<10x668xf32>
    %cst_136 = arith.constant dense<0.000000e+00> : vector<1x10xf32>
    %283 = tpu.matmul %280, %282, %cst_136 {dimension_numbers = #tpu.dot_dimension_numbers<[1], [1], [0], [0], [0, 0, 1, 0], [], []>} : vector<1x668xf32>, vector<10x668xf32>, vector<1x10xf32> -> vector<1x10xf32>
    %284 = arith.addf %279, %283 : vector<1x10xf32>
    %285 = vector.extract_strided_slice %244 {offsets = [8, 0], sizes = [1, 668], strides = [1, 1]} : vector<16x668xf32> to vector<1x668xf32>
    %c8_137 = arith.constant 8 : index
    %c0_138 = arith.constant 0 : index
    %c0_139 = arith.constant 0 : index
    %286 = vector.load %arg6[%c8_137, %c0_138, %c0_139] : memref<16x10x668xf32, #tpu.memory_space<vmem>>, vector<1x10x668xf32>
    %287 = vector.shape_cast %286 : vector<1x10x668xf32> to vector<10x668xf32>
    %cst_140 = arith.constant dense<0.000000e+00> : vector<1x10xf32>
    %288 = tpu.matmul %285, %287, %cst_140 {dimension_numbers = #tpu.dot_dimension_numbers<[1], [1], [0], [0], [0, 0, 1, 0], [], []>} : vector<1x668xf32>, vector<10x668xf32>, vector<1x10xf32> -> vector<1x10xf32>
    %289 = arith.addf %284, %288 : vector<1x10xf32>
    %290 = vector.extract_strided_slice %244 {offsets = [9, 0], sizes = [1, 668], strides = [1, 1]} : vector<16x668xf32> to vector<1x668xf32>
    %c9_141 = arith.constant 9 : index
    %c0_142 = arith.constant 0 : index
    %c0_143 = arith.constant 0 : index
    %291 = vector.load %arg6[%c9_141, %c0_142, %c0_143] : memref<16x10x668xf32, #tpu.memory_space<vmem>>, vector<1x10x668xf32>
    %292 = vector.shape_cast %291 : vector<1x10x668xf32> to vector<10x668xf32>
    %cst_144 = arith.constant dense<0.000000e+00> : vector<1x10xf32>
    %293 = tpu.matmul %290, %292, %cst_144 {dimension_numbers = #tpu.dot_dimension_numbers<[1], [1], [0], [0], [0, 0, 1, 0], [], []>} : vector<1x668xf32>, vector<10x668xf32>, vector<1x10xf32> -> vector<1x10xf32>
    %294 = arith.addf %289, %293 : vector<1x10xf32>
    %295 = vector.extract_strided_slice %244 {offsets = [10, 0], sizes = [1, 668], strides = [1, 1]} : vector<16x668xf32> to vector<1x668xf32>
    %c10_145 = arith.constant 10 : index
    %c0_146 = arith.constant 0 : index
    %c0_147 = arith.constant 0 : index
    %296 = vector.load %arg6[%c10_145, %c0_146, %c0_147] : memref<16x10x668xf32, #tpu.memory_space<vmem>>, vector<1x10x668xf32>
    %297 = vector.shape_cast %296 : vector<1x10x668xf32> to vector<10x668xf32>
    %cst_148 = arith.constant dense<0.000000e+00> : vector<1x10xf32>
    %298 = tpu.matmul %295, %297, %cst_148 {dimension_numbers = #tpu.dot_dimension_numbers<[1], [1], [0], [0], [0, 0, 1, 0], [], []>} : vector<1x668xf32>, vector<10x668xf32>, vector<1x10xf32> -> vector<1x10xf32>
    %299 = arith.addf %294, %298 : vector<1x10xf32>
    %300 = vector.extract_strided_slice %244 {offsets = [11, 0], sizes = [1, 668], strides = [1, 1]} : vector<16x668xf32> to vector<1x668xf32>
    %c11_149 = arith.constant 11 : index
    %c0_150 = arith.constant 0 : index
    %c0_151 = arith.constant 0 : index
    %301 = vector.load %arg6[%c11_149, %c0_150, %c0_151] : memref<16x10x668xf32, #tpu.memory_space<vmem>>, vector<1x10x668xf32>
    %302 = vector.shape_cast %301 : vector<1x10x668xf32> to vector<10x668xf32>
    %cst_152 = arith.constant dense<0.000000e+00> : vector<1x10xf32>
    %303 = tpu.matmul %300, %302, %cst_152 {dimension_numbers = #tpu.dot_dimension_numbers<[1], [1], [0], [0], [0, 0, 1, 0], [], []>} : vector<1x668xf32>, vector<10x668xf32>, vector<1x10xf32> -> vector<1x10xf32>
    %304 = arith.addf %299, %303 : vector<1x10xf32>
    %305 = vector.extract_strided_slice %244 {offsets = [12, 0], sizes = [1, 668], strides = [1, 1]} : vector<16x668xf32> to vector<1x668xf32>
    %c12_153 = arith.constant 12 : index
    %c0_154 = arith.constant 0 : index
    %c0_155 = arith.constant 0 : index
    %306 = vector.load %arg6[%c12_153, %c0_154, %c0_155] : memref<16x10x668xf32, #tpu.memory_space<vmem>>, vector<1x10x668xf32>
    %307 = vector.shape_cast %306 : vector<1x10x668xf32> to vector<10x668xf32>
    %cst_156 = arith.constant dense<0.000000e+00> : vector<1x10xf32>
    %308 = tpu.matmul %305, %307, %cst_156 {dimension_numbers = #tpu.dot_dimension_numbers<[1], [1], [0], [0], [0, 0, 1, 0], [], []>} : vector<1x668xf32>, vector<10x668xf32>, vector<1x10xf32> -> vector<1x10xf32>
    %309 = arith.addf %304, %308 : vector<1x10xf32>
    %310 = vector.extract_strided_slice %244 {offsets = [13, 0], sizes = [1, 668], strides = [1, 1]} : vector<16x668xf32> to vector<1x668xf32>
    %c13_157 = arith.constant 13 : index
    %c0_158 = arith.constant 0 : index
    %c0_159 = arith.constant 0 : index
    %311 = vector.load %arg6[%c13_157, %c0_158, %c0_159] : memref<16x10x668xf32, #tpu.memory_space<vmem>>, vector<1x10x668xf32>
    %312 = vector.shape_cast %311 : vector<1x10x668xf32> to vector<10x668xf32>
    %cst_160 = arith.constant dense<0.000000e+00> : vector<1x10xf32>
    %313 = tpu.matmul %310, %312, %cst_160 {dimension_numbers = #tpu.dot_dimension_numbers<[1], [1], [0], [0], [0, 0, 1, 0], [], []>} : vector<1x668xf32>, vector<10x668xf32>, vector<1x10xf32> -> vector<1x10xf32>
    %314 = arith.addf %309, %313 : vector<1x10xf32>
    %315 = vector.extract_strided_slice %244 {offsets = [14, 0], sizes = [1, 668], strides = [1, 1]} : vector<16x668xf32> to vector<1x668xf32>
    %c14_161 = arith.constant 14 : index
    %c0_162 = arith.constant 0 : index
    %c0_163 = arith.constant 0 : index
    %316 = vector.load %arg6[%c14_161, %c0_162, %c0_163] : memref<16x10x668xf32, #tpu.memory_space<vmem>>, vector<1x10x668xf32>
    %317 = vector.shape_cast %316 : vector<1x10x668xf32> to vector<10x668xf32>
    %cst_164 = arith.constant dense<0.000000e+00> : vector<1x10xf32>
    %318 = tpu.matmul %315, %317, %cst_164 {dimension_numbers = #tpu.dot_dimension_numbers<[1], [1], [0], [0], [0, 0, 1, 0], [], []>} : vector<1x668xf32>, vector<10x668xf32>, vector<1x10xf32> -> vector<1x10xf32>
    %319 = arith.addf %314, %318 : vector<1x10xf32>
    %320 = vector.extract_strided_slice %244 {offsets = [15, 0], sizes = [1, 668], strides = [1, 1]} : vector<16x668xf32> to vector<1x668xf32>
    %c15_165 = arith.constant 15 : index
    %c0_166 = arith.constant 0 : index
    %c0_167 = arith.constant 0 : index
    %321 = vector.load %arg6[%c15_165, %c0_166, %c0_167] : memref<16x10x668xf32, #tpu.memory_space<vmem>>, vector<1x10x668xf32>
    %322 = vector.shape_cast %321 : vector<1x10x668xf32> to vector<10x668xf32>
    %cst_168 = arith.constant dense<0.000000e+00> : vector<1x10xf32>
    %323 = tpu.matmul %320, %322, %cst_168 {dimension_numbers = #tpu.dot_dimension_numbers<[1], [1], [0], [0], [0, 0, 1, 0], [], []>} : vector<1x668xf32>, vector<10x668xf32>, vector<1x10xf32> -> vector<1x10xf32>
    %324 = arith.addf %319, %323 : vector<1x10xf32>
    %c1_169 = arith.constant 1 : index
    %c0_170 = arith.constant 0 : index
    %c0_171 = arith.constant 0 : index
    %325 = vector.load %arg8[%c1_169, %c0_170, %c0_171] : memref<2x1x10xf32, #tpu.memory_space<vmem>>, vector<1x1x10xf32>
    %326 = vector.shape_cast %325 : vector<1x1x10xf32> to vector<1x10xf32>
    %327 = vector.shape_cast %324 : vector<1x10xf32> to vector<1x1x10xf32>
    tpu.vector_store %arg8[%c1_169, %c0_170, %c0_171], %327 {strides = array<i32>} : memref<2x1x10xf32, #tpu.memory_space<vmem>>, vector<1x1x10xf32>,
    return
  }
  func.func @transform_0(%arg0: i32) -> (i32, i32, i32) {
    %c0_i32 = arith.constant 0 : i32
    %c0_i32_0 = arith.constant 0 : i32
    %c0_i32_1 = arith.constant 0 : i32
    return %arg0, %c0_i32, %c0_i32_0 : i32, i32, i32
  }
  func.func @transform_1(%arg0: i32) -> (i32, i32) {
    %c0_i32 = arith.constant 0 : i32
    %c0_i32_0 = arith.constant 0 : i32
    %c0_i32_1 = arith.constant 0 : i32
    return %c0_i32, %c0_i32_0 : i32, i32
  }
  func.func @transform_2(%arg0: i32) -> (i32, i32) {
    %c0_i32 = arith.constant 0 : i32
    %c0_i32_0 = arith.constant 0 : i32
    %c0_i32_1 = arith.constant 0 : i32
    return %c0_i32, %c0_i32_0 : i32, i32
  }
  func.func @transform_3(%arg0: i32) -> (i32, i32) {
    %c0_i32 = arith.constant 0 : i32
    %c0_i32_0 = arith.constant 0 : i32
    %c0_i32_1 = arith.constant 0 : i32
    return %c0_i32, %c0_i32_0 : i32, i32
  }
  func.func @transform_4(%arg0: i32) -> (i32, i32) {
    %c0_i32 = arith.constant 0 : i32
    %c0_i32_0 = arith.constant 0 : i32
    %c0_i32_1 = arith.constant 0 : i32
    return %c0_i32, %c0_i32_0 : i32, i32
  }
  func.func @transform_5(%arg0: i32) -> (i32, i32, i32) {
    %c0_i32 = arith.constant 0 : i32
    %c0_i32_0 = arith.constant 0 : i32
    %c0_i32_1 = arith.constant 0 : i32
    %c0_i32_2 = arith.constant 0 : i32
    return %c0_i32, %c0_i32_0, %c0_i32_1 : i32, i32, i32
  }
  func.func @transform_6(%arg0: i32) -> (i32, i32) {
    %c0_i32 = arith.constant 0 : i32
    %c0_i32_0 = arith.constant 0 : i32
    %c0_i32_1 = arith.constant 0 : i32
    return %c0_i32, %c0_i32_0 : i32, i32
  }
  func.func @transform_7(%arg0: i32) -> (i32, i32, i32) {
    %c0_i32 = arith.constant 0 : i32
    %c0_i32_0 = arith.constant 0 : i32
    %c0_i32_1 = arith.constant 0 : i32
    return %arg0, %c0_i32, %c0_i32_0 : i32, i32, i32
  }
}

</mosaic_0001>

<bundles_post_ra>
// kernel: _mnist_forward.1
= control target key start
LH: loop header
LB: loop body
LE: loop exit
PB: predicated region body
PF: predicated region fallthrough
CT: control target
= control target key end

     0   :  { %v10965_v1 = vmov 1   ;;  %v10966_v2 = vmov 3   ;;  %v41_v3 = vlaneseq  ;;  %s13573_s0 = inlined_call_operand.vmem [shape: f32[2,1,784], index: 0, kind: input, shape index: {}]   ;;  %s13574_s1 = inlined_call_operand.vmem [shape: f32[8,9], index: 1, kind: input, shape index: {}]   ;;  %s13575_s2 = inlined_call_operand.vmem [shape: f32[8,1], index: 2, kind: input, shape index: {}]   ;;  %s13576_s3 = inlined_call_operand.vmem [shape: f32[16,72], index: 3, kind: input, shape index: {}]   ;;  %s13577_s4 = inlined_call_operand.vmem [shape: f32[16,1], index: 4, kind: input, shape index: {}]   ;;  %s13578_s5 = inlined_call_operand.vmem [shape: f32[16,10,668], index: 5, kind: input, shape index: {}]   ;;  %s13579_s6 = inlined_call_operand.vmem [shape: f32[1,10], index: 6, kind: input, shape index: {}]   ;;  %s13580_s7 = inlined_call_operand.hbm [shape: f32[2,1,10], index: 7, kind: output, shape index: {}]  }
   0x1   :  { %v27_v0 = vld [vmem:[%s13574_s1] sm:$0xff]  ;;  %10931 = vset.pattern.permute.xlu0 %v10965_v1  ;;  %10933 = vset.pattern.permute.xlu1 %v10966_v2 }
   0x2   :  { %78 = vperm.xlu0 %10931, %v27_v0   ;;  %170 = vperm.xlu1 %10933, %v27_v0  }
   0x3   :  { %12 = vsyncpa [#allocation4], 0  ;;  %v11029_v4 = vshrl.u32 %v41_v3, 7  ;;  %v10967_v5 = vmov 2   ;;  %v10968_v6 = vmov 4   ;;  %v10969_v14 = vmov 5  }
   0x4   :  { %v34_v7 = vld [vmem:[%s13573_s0] sm:$0x7f]  ;;  %v11037_v8 = vld [vmem:[%s13573_s0 + $0x7] sm:$0x7f]  ;;  %v10970_v15 = vmov 6   ;;  %v10971_v16 = vmov 7  }
   0x5   :  { %v59_v9 = vsub.s32 4, %v11029_v4  ;;  %v63_v10 = vsub.s32 5, %v11029_v4  ;;  %v10972_v17 = vmov 0   ;;  %v10973_v19 = vmov 8   ;;  %v28_v20 = vld [vmem:[%s13575_s2] sm:$0xff]  ;;  %s10974_s2 = smov 127  }
   0x6   :  { %10932 = vset.pattern.permute.xlu0 %v10967_v5  ;;  %10934 = vset.pattern.permute.xlu1 %v10968_v6  ;;  %v313_v21 = vsub.s32 6, %v11029_v4  ;;  %v55_v24 = vsub.s32 3, %v11029_v4  ;;  %v47_v25 = vsub.s32 1, %v11029_v4  ;;  %v51_v28 = vsub.s32 2, %v11029_v4  ;;  %s10975_s30 = smov 126   ;;  %s10976_s8 = smov 100  }
   0x7   :  { %124 = vperm.xlu0 %10932, %v27_v0   ;;  %216 = vperm.xlu1 %10934, %v27_v0   ;;  %v11041_v11 = vrot.slane %v34_v7, %v59_v9  ;;  %v11043_v12 = vrot.slane %v34_v7, %v63_v10  ;;  %v11046_v13 = vrot.slane %v11037_v8, %v59_v9  ;;  %v43_v33 = vsub.s32 0, %v11029_v4  ;;  %s10977_s9 = smov 99   ;;  %s10978_s10 = smov 98  }
   0x8   :  { %v11049_v18 = vrot.slane %v11037_v8, %v63_v10  ;;  %v11055_v22 = vrot.slane %v34_v7, %v313_v21  ;;  %v11058_v23 = vrot.slane %v11037_v8, %v313_v21  ;;  %v11062_v26 = vrot.slane %v34_v7, %v55_v24  ;;  %s10979_s11 = smov 72   ;;  %s10980_s12 = smov 71  }
   0x9   :  { %13583 = vst [vmem:[#allocation6_spill] sm:$0xff] %v11043_v12  ;;  %v11064_v27 = vrot.slane %v34_v7, %v47_v25  ;;  %v11073_v32 = vrot.slane %v34_v7, %v51_v28  ;;  %v11082_v36 = vrot.slane %v34_v7, %v43_v33  ;;  %v11135_v55 = vrot.slane %v11037_v8, %v51_v28  ;;  %s10981_s13 = smov 70  }
   0xa   :  { %v11142_v57 = vrot.slane %v11037_v8, %v47_v25  ;;  %v11153_v61 = vrot.slane %v11037_v8, %v55_v24  ;;  %v11164_v1 = vrot.slane %v11037_v8, %v43_v33  ;;  %vm105_vm0 = vcmask 1039360  }
   0xb   :  { %10935 = vset.pattern.permute.xlu1 %v10969_v14  ;;  %10936 = vset.pattern.permute.xlu0 %v10970_v15  ;;  %vm151_vm1 = vcmask 1031168   ;;  %vm197_vm2 = vcmask 818176   ;;  %vm243_vm3 = vcmask 809984   ;;  %vm289_vm4 = vcmask 801792  }
   0xc   :  { %262 = vperm.xlu1 %10935, %v27_v0   ;;  %308 = vperm.xlu0 %10936, %v27_v0   ;;  %13584 = vst [vmem:[#allocation7_spill] sm:$0xff] %v11153_v61  ;;  %vm344_vm5 = vcmask 588800   ;;  %vm395_vm6 = vcmask 580608   ;;  %vm446_vm7 = vcmask 572416   ;;  %vm487_vm8 = vcmask 228352  }
   0xd   :  { %vm12342_vm9 = vmpackc.low %vm487_vm8, %vm487_vm8  ;;  %vm4917_vm10 = vcmask 73728  }
  0x10   :  { %10937 = vset.pattern.permute.xlu1 %v10971_v16  ;;  %10939 = vset.pattern.permute.xlu0 %v10972_v17 }
  0x11   :  { %364 = vperm.xlu1 %10937, %v27_v0   ;;  %37 = vperm.xlu0 %10939, %v27_v0  }
  0x15   :  { %10938 = vset.pattern.permute.xlu1 %v10973_v19 }
  0x16   :  { %415 = vperm.xlu1 %10938, %v27_v0  }
  0x1a   :  { %10940 = vset.pattern.permute.xlu1 %v10972_v17 }
  0x1b   :  { %467 = vperm.xlu1 %10940, %v28_v20  }
  0x81   :  { %v11067_v29 = vpop.permute.xlu0 %78  ;;  %v11092_v40 = vpop.permute.xlu1 %170 }
  0x82   :  { %v84_v30 = vmul.f32 %v11067_v29, %v11062_v26  ;;  %v82_v31 = vmul.f32 %v11067_v29, %v11064_v27  ;;  %v83_v35 = vmul.f32 %v11067_v29, %v11073_v32  ;;  %v81_v39 = vmul.f32 %v11067_v29, %v11082_v36 }
  0x83   :  { %v174_v41 = vmul.f32 %v11092_v40, %v11064_v27  ;;  %v176_v43 = vmul.f32 %v11092_v40, %v11062_v26  ;;  %v175_v47 = vmul.f32 %v11092_v40, %v11073_v32  ;;  %v173_v49 = vmul.f32 %v11092_v40, %v11082_v36 }
  0x84   :  { %99 = vrot.lane.b32.xlu0 %v84_v30, %s10974_s2  ;;  %95 = vrot.lane.b32.xlu1 %v82_v31, %s10974_s2  ;;  %v4960_v58 = vmul.f32 %v11135_v55, %v11067_v29  ;;  %v4959_v59 = vmul.f32 %v11142_v57, %v11067_v29  ;;  %v4961_v0 = vmul.f32 %v11153_v61, %v11067_v29 }
  0x85   :  { %v4958_v3 = vmul.f32 %v11164_v1, %v11067_v29  ;;  %v5041_v17 = vmul.f32 %v11142_v57, %v11092_v40  ;;  %v5042_v19 = vmul.f32 %v11135_v55, %v11092_v40  ;;  %v5043_v20 = vmul.f32 %v11153_v61, %v11092_v40 }
  0x86   :  { %v11078_v34 = vpop.permute.xlu0 %124  ;;  %v11106_v45 = vpop.permute.xlu1 %216  ;;  %v5040_v25 = vmul.f32 %v11164_v1, %v11092_v40 }
  0x87   :  { %v128_v37 = vmul.f32 %v11078_v34, %v11064_v27  ;;  %v130_v38 = vmul.f32 %v11078_v34, %v11062_v26  ;;  %v129_v42 = vmul.f32 %v11078_v34, %v11073_v32  ;;  %v127_v44 = vmul.f32 %v11078_v34, %v11082_v36 }
  0x88   :  { %97 = vrot.lane.b32.xlu1 %v83_v35, %s10974_s2  ;;  %v220_v46 = vmul.f32 %v11106_v45, %v11064_v27  ;;  %v222_v48 = vmul.f32 %v11106_v45, %v11062_v26  ;;  %v221_v52 = vmul.f32 %v11106_v45, %v11073_v32  ;;  %v219_v54 = vmul.f32 %v11106_v45, %v11082_v36 }
  0x89   :  { %141 = vrot.lane.b32.xlu0 %v128_v37, %s10975_s30  ;;  %v5000_v5 = vmul.f32 %v11142_v57, %v11078_v34  ;;  %v5001_v6 = vmul.f32 %v11135_v55, %v11078_v34  ;;  %v5002_v7 = vmul.f32 %v11153_v61, %v11078_v34  ;;  %v4999_v10 = vmul.f32 %v11164_v1, %v11078_v34 }
  0x8a   :  { %v5082_v33 = vmul.f32 %v11142_v57, %v11106_v45  ;;  %v5083_v35 = vmul.f32 %v11135_v55, %v11106_v45  ;;  %v5084_v37 = vmul.f32 %v11153_v61, %v11106_v45 }
  0x8b   :  { %v11120_v50 = vpop.permute.xlu1 %262  ;;  %v11150_v60 = vpop.permute.xlu0 %308 }
  0x8c   :  { %93 = vrot.lane.b32.xlu1 %v81_v39, %s10974_s2  ;;  %v266_v51 = vmul.f32 %v11120_v50, %v11064_v27  ;;  %v268_v53 = vmul.f32 %v11120_v50, %v11062_v26  ;;  %v267_v56 = vmul.f32 %v11120_v50, %v11073_v32  ;;  %v265_v62 = vmul.f32 %v11120_v50, %v11082_v36 }
  0x8d   :  { %145 = vrot.lane.b32.xlu0 %v130_v38, %s10975_s30  ;;  %v317_v63 = vmul.f32 %v11150_v60, %v11064_v27  ;;  %v319_v2 = vmul.f32 %v11150_v60, %v11062_v26  ;;  %v318_v4 = vmul.f32 %v11150_v60, %v11073_v32  ;;  %v316_v9 = vmul.f32 %v11150_v60, %v11082_v36 }
  0x8e   :  { %v5081_v39 = vmul.f32 %v11164_v1, %v11106_v45 }
  0x90   :  { %143 = vrot.lane.b32.xlu1 %v129_v42, %s10975_s30  ;;  %v11186_v8 = vpop.permute.xlu1 %364  ;;  %v5124_v42 = vmul.f32 %v11135_v55, %v11120_v50 }
  0x91   :  { %187 = vrot.lane.b32.xlu0 %v174_v41, %s10976_s8  ;;  %v368_v14 = vmul.f32 %v11186_v8, %v11064_v27  ;;  %v369_v15 = vmul.f32 %v11186_v8, %v11073_v32  ;;  %v370_v16 = vmul.f32 %v11186_v8, %v11062_v26  ;;  %v367_v24 = vmul.f32 %v11186_v8, %v11082_v36 }
  0x92   :  { %v5123_v41 = vmul.f32 %v11142_v57, %v11120_v50 }
  0x94   :  { %139 = vrot.lane.b32.xlu1 %v127_v44, %s10975_s30  ;;  %v5122_v44 = vmul.f32 %v11164_v1, %v11120_v50 }
  0x95   :  { %191 = vrot.lane.b32.xlu0 %v176_v43, %s10976_s8  ;;  %v11212_v21 = vpop.permute.xlu1 %415  ;;  %v5125_v43 = vmul.f32 %v11153_v61, %v11120_v50 }
  0x96   :  { %v419_v28 = vmul.f32 %v11212_v21, %v11064_v27  ;;  %v420_v30 = vmul.f32 %v11212_v21, %v11073_v32  ;;  %v421_v31 = vmul.f32 %v11212_v21, %v11062_v26  ;;  %v418_v38 = vmul.f32 %v11212_v21, %v11082_v36 }
  0x98   :  { %189 = vrot.lane.b32.xlu1 %v175_v47, %s10976_s8  ;;  %v86_v47 = vmul.f32 %v11067_v29, %v11043_v12 }
  0x99   :  { %233 = vrot.lane.b32.xlu0 %v220_v46, %s10977_s9  ;;  %v85_v46 = vmul.f32 %v11067_v29, %v11041_v11 }
  0x9c   :  { %185 = vrot.lane.b32.xlu1 %v173_v49, %s10976_s8  ;;  %v5170_v49 = vmul.f32 %v11135_v55, %v11150_v60 }
  0x9d   :  { %237 = vrot.lane.b32.xlu0 %v222_v48, %s10977_s9  ;;  %v5169_v48 = vmul.f32 %v11142_v57, %v11150_v60 }
  0xa0   :  { %235 = vrot.lane.b32.xlu1 %v221_v52, %s10977_s9  ;;  %v11269_v52 = vpop.permute.xlu0 %37 }
  0xa1   :  { %279 = vrot.lane.b32.xlu0 %v266_v51, %s10978_s10  ;;  %v11267_v51 = vpop.permute.xlu1 %467 }
  0xa4   :  { %231 = vrot.lane.b32.xlu1 %v219_v54, %s10977_s9  ;;  %v5168_v54 = vmul.f32 %v11164_v1, %v11150_v60 }
  0xa5   :  { %283 = vrot.lane.b32.xlu0 %v268_v53, %s10978_s10  ;;  %v5171_v53 = vmul.f32 %v11153_v61, %v11150_v60 }
  0xa8   :  { %281 = vrot.lane.b32.xlu1 %v267_v56, %s10978_s10 }
  0xa9   :  { %4974 = vrot.lane.b32.xlu0 %v4960_v58, %s10974_s2 }
  0xac   :  { %4972 = vrot.lane.b32.xlu1 %v4959_v59, %s10974_s2  ;;  %v131_v59 = vmul.f32 %v11078_v34, %v11041_v11 }
  0xad   :  { %277 = vrot.lane.b32.xlu0 %v265_v62, %s10978_s10  ;;  %v132_v62 = vmul.f32 %v11078_v34, %v11043_v12 }
  0xb0   :  { %4976 = vrot.lane.b32.xlu1 %v4961_v0, %s10974_s2  ;;  %v5215_v0 = vmul.f32 %v11142_v57, %v11186_v8 }
  0xb1   :  { %332 = vrot.lane.b32.xlu0 %v317_v63, %s10979_s11 }
  0xb4   :  { %4970 = vrot.lane.b32.xlu1 %v4958_v3, %s10974_s2  ;;  %v5216_v3 = vmul.f32 %v11135_v55, %v11186_v8 }
  0xb5   :  { %336 = vrot.lane.b32.xlu0 %v319_v2, %s10979_s11 }
  0xb8   :  { %334 = vrot.lane.b32.xlu1 %v318_v4, %s10979_s11 }
  0xb9   :  { %5013 = vrot.lane.b32.xlu0 %v5000_v5, %s10975_s30  ;;  %v5217_v5 = vmul.f32 %v11153_v61, %v11186_v8 }
  0xbc   :  { %5015 = vrot.lane.b32.xlu1 %v5001_v6, %s10975_s30 }
  0xbd   :  { %5017 = vrot.lane.b32.xlu0 %v5002_v7, %s10975_s30  ;;  %v5214_v7 = vmul.f32 %v11164_v1, %v11186_v8 }
  0xc0   :  { %330 = vrot.lane.b32.xlu1 %v316_v9, %s10979_s11 }
  0xc1   :  { %5011 = vrot.lane.b32.xlu0 %v4999_v10, %s10975_s30  ;;  %v177_v10 = vmul.f32 %v11092_v40, %v11041_v11 }
  0xc4   :  { %383 = vrot.lane.b32.xlu1 %v368_v14, %s10980_s12 }
  0xc5   :  { %385 = vrot.lane.b32.xlu0 %v369_v15, %s10980_s12  ;;  %v178_v15 = vmul.f32 %v11092_v40, %v11043_v12 }
  0xc8   :  { %387 = vrot.lane.b32.xlu1 %v370_v16, %s10980_s12 }
  0xc9   :  { %5054 = vrot.lane.b32.xlu0 %v5041_v17, %s10976_s8  ;;  %v5261_v17 = vmul.f32 %v11142_v57, %v11212_v21 }
  0xcc   :  { %5056 = vrot.lane.b32.xlu1 %v5042_v19, %s10976_s8 }
  0xcd   :  { %5058 = vrot.lane.b32.xlu0 %v5043_v20, %s10976_s8  ;;  %v5262_v20 = vmul.f32 %v11135_v55, %v11212_v21 }
  0xd0   :  { %381 = vrot.lane.b32.xlu1 %v367_v24, %s10980_s12 }
  0xd1   :  { %5052 = vrot.lane.b32.xlu0 %v5040_v25, %s10976_s8  ;;  %v5263_v25 = vmul.f32 %v11153_v61, %v11212_v21 }
  0xd4   :  { %434 = vrot.lane.b32.xlu1 %v419_v28, %s10981_s13 }
  0xd5   :  { %436 = vrot.lane.b32.xlu0 %v420_v30, %s10981_s13  ;;  %v5260_v30 = vmul.f32 %v11164_v1, %v11212_v21 }
  0xd8   :  { %438 = vrot.lane.b32.xlu1 %v421_v31, %s10981_s13 }
  0xd9   :  { %5095 = vrot.lane.b32.xlu0 %v5082_v33, %s10977_s9  ;;  %v223_v33 = vmul.f32 %v11106_v45, %v11041_v11 }
  0xdc   :  { %5097 = vrot.lane.b32.xlu1 %v5083_v35, %s10977_s9 }
  0xdd   :  { %5099 = vrot.lane.b32.xlu0 %v5084_v37, %s10977_s9  ;;  %v224_v37 = vmul.f32 %v11106_v45, %v11043_v12 }
  0xe0   :  { %432 = vrot.lane.b32.xlu1 %v418_v38, %s10981_s13 }
  0xe1   :  { %5093 = vrot.lane.b32.xlu0 %v5081_v39, %s10977_s9  ;;  %v269_v39 = vmul.f32 %v11120_v50, %v11041_v11 }
  0xe4   :  { %5136 = vrot.lane.b32.xlu1 %v5123_v41, %s10978_s10 }
  0xe5   :  { %5138 = vrot.lane.b32.xlu0 %v5124_v42, %s10978_s10  ;;  %v270_v42 = vmul.f32 %v11120_v50, %v11043_v12 }
  0xe8   :  { %5140 = vrot.lane.b32.xlu1 %v5125_v43, %s10978_s10 }
  0xe9   :  { %5134 = vrot.lane.b32.xlu0 %v5122_v44, %s10978_s10  ;;  %v4962_v44 = vmul.f32 %v11046_v13, %v11067_v29 }
  0xec   :  { %101 = vrot.lane.b32.xlu1 %v85_v46, %s10974_s2 }
  0xed   :  { %103 = vrot.lane.b32.xlu0 %v86_v47, %s10974_s2  ;;  %v4963_v47 = vmul.f32 %v11049_v18, %v11067_v29  ;;  %v5003_v29 = vmul.f32 %v11046_v13, %v11078_v34 }
  0xf0   :  { %5184 = vrot.lane.b32.xlu1 %v5169_v48, %s10979_s11 }
  0xf1   :  { %5186 = vrot.lane.b32.xlu0 %v5170_v49, %s10979_s11  ;;  %v320_v49 = vmul.f32 %v11150_v60, %v11041_v11 }
  0xf4   :  { %5188 = vrot.lane.b32.xlu1 %v5171_v53, %s10979_s11 }
  0xf5   :  { %5182 = vrot.lane.b32.xlu0 %v5168_v54, %s10979_s11  ;;  %v321_v54 = vmul.f32 %v11150_v60, %v11043_v12 }
  0xf6   :  { %v11278_v56 = vpop.permute.xlu1 %95  ;;  %v11280_v58 = vpop.permute.xlu0 %99 }
  0xf8   :  { %147 = vrot.lane.b32.xlu1 %v131_v59, %s10975_s30 }
  0xf9   :  { %149 = vrot.lane.b32.xlu0 %v132_v62, %s10975_s30 }
  0xfa   :  { %v11288_v63 = vpop.permute.xlu1 %97 }
  0xfb   :  { %v11292_v2 = vpop.permute.xlu0 %141 }
  0xfc   :  { %5230 = vrot.lane.b32.xlu1 %v5215_v0, %s10980_s12  ;;  %v5004_v0 = vmul.f32 %v11049_v18, %v11078_v34  ;;  %v5044_v34 = vmul.f32 %v11046_v13, %v11092_v40 }
  0xfd   :  { %5232 = vrot.lane.b32.xlu0 %v5216_v3, %s10980_s12 }
  0xfe   :  { %v11298_v4 = vpop.permute.xlu1 %93 }
  0xff   :  { %v11302_v6 = vpop.permute.xlu0 %145 }
 0x100   :  { %5234 = vrot.lane.b32.xlu1 %v5217_v5, %s10980_s12  ;;  %v371_v5 = vmul.f32 %v11186_v8, %v11041_v11 }
 0x101   :  { %5228 = vrot.lane.b32.xlu0 %v5214_v7, %s10980_s12 }
 0x102   :  { %v11308_v9 = vpop.permute.xlu1 %143 }
 0x103   :  { %v11312_v14 = vpop.permute.xlu0 %187 }
 0x104   :  { %193 = vrot.lane.b32.xlu1 %v177_v10, %s10976_s8  ;;  %v372_v10 = vmul.f32 %v11186_v8, %v11043_v12 }
 0x105   :  { %195 = vrot.lane.b32.xlu0 %v178_v15, %s10976_s8 }
 0x106   :  { %v11318_v16 = vpop.permute.xlu1 %139 }
 0x107   :  { %v11322_v19 = vpop.permute.xlu0 %191 }
 0x108   :  { %5276 = vrot.lane.b32.xlu1 %v5261_v17, %s10981_s13 }
 0x109   :  { %5278 = vrot.lane.b32.xlu0 %v5262_v20, %s10981_s13  ;;  %v5045_v20 = vmul.f32 %v11049_v18, %v11092_v40  ;;  %v5085_v40 = vmul.f32 %v11046_v13, %v11106_v45 }
 0x10a   :  { %v11328_v24 = vpop.permute.xlu1 %189 }
 0x10b   :  { %v11332_v28 = vpop.permute.xlu0 %233 }
 0x10c   :  { %5280 = vrot.lane.b32.xlu1 %v5263_v25, %s10981_s13 }
 0x10d   :  { %5274 = vrot.lane.b32.xlu0 %v5260_v30, %s10981_s13  ;;  %v422_v30 = vmul.f32 %v11212_v21, %v11041_v11 }
 0x10e   :  { %v11338_v31 = vpop.permute.xlu1 %185 }
 0x10f   :  { %v11342_v35 = vpop.permute.xlu0 %237 }
 0x110   :  { %239 = vrot.lane.b32.xlu1 %v223_v33, %s10977_s9 }
 0x111   :  { %241 = vrot.lane.b32.xlu0 %v224_v37, %s10977_s9  ;;  %v423_v37 = vmul.f32 %v11212_v21, %v11043_v12  ;;  %v5264_v12 = vmul.f32 %v11046_v13, %v11212_v21 }
 0x112   :  { %v11348_v38 = vpop.permute.xlu1 %235 }
 0x113   :  { %v11352_v41 = vpop.permute.xlu0 %279 }
 0x114   :  { %285 = vrot.lane.b32.xlu1 %v269_v39, %s10978_s10 }
 0x115   :  { %287 = vrot.lane.b32.xlu0 %v270_v42, %s10978_s10 }
 0x116   :  { %v11358_v43 = vpop.permute.xlu1 %231 }
 0x117   :  { %v11362_v46 = vpop.permute.xlu0 %283 }
 0x118   :  { %4978 = vrot.lane.b32.xlu1 %v4962_v44, %s10974_s2  ;;  %v5086_v44 = vmul.f32 %v11049_v18, %v11106_v45 }
 0x119   :  { %4980 = vrot.lane.b32.xlu0 %v4963_v47, %s10974_s2 }
 0x11a   :  { %v11368_v48 = vpop.permute.xlu1 %281 }
 0x11b   :  { %v11372_v53 = vpop.permute.xlu0 %4974 }
 0x11c   :  { %338 = vrot.lane.b32.xlu1 %v320_v49, %s10979_s11  ;;  %v5126_v49 = vmul.f32 %v11046_v13, %v11120_v50 }
 0x11d   :  { %340 = vrot.lane.b32.xlu0 %v321_v54, %s10979_s11 }
 0x11e   :  { %v11378_v59 = vpop.permute.xlu1 %4972 }
 0x11f   :  { %v11382_v62 = vpop.permute.xlu0 %277 }
 0x120   :  { %5019 = vrot.lane.b32.xlu1 %v5003_v29, %s10975_s30  ;;  %v5127_v29 = vmul.f32 %v11049_v18, %v11120_v50  ;;  %v107_v50 = vsel %vm105_vm0, %v11278_v56, %v11288_v63 }
 0x121   :  { %5021 = vrot.lane.b32.xlu0 %v5004_v0, %s10975_s30  ;;  %v5172_v0 = vmul.f32 %v11046_v13, %v11150_v60 }
 0x122   :  { %v11388_v3 = vpop.permute.xlu1 %4976 }
 0x123   :  { %v11392_v7 = vpop.permute.xlu0 %332 }
 0x124   :  { %389 = vrot.lane.b32.xlu1 %v371_v5, %s10980_s12 }
 0x125   :  { %391 = vrot.lane.b32.xlu0 %v372_v10, %s10980_s12  ;;  %v5173_v10 = vmul.f32 %v11049_v18, %v11150_v60 }
 0x126   :  { %v11398_v15 = vpop.permute.xlu1 %4970 }
 0x127   :  { %v11402_v17 = vpop.permute.xlu0 %336 }
 0x128   :  { %5060 = vrot.lane.b32.xlu1 %v5044_v34, %s10976_s8  ;;  %v72_v34 = vmul.f32 %v11064_v27, %v11269_v52  ;;  %v5219_v27 = vmul.f32 %v11049_v18, %v11186_v8 }
 0x129   :  { %5062 = vrot.lane.b32.xlu0 %v5045_v20, %s10976_s8  ;;  %v153_v20 = vsel %vm151_vm1, %v11292_v2, %v11308_v9 }
 0x12a   :  { %v11408_v25 = vpop.permute.xlu1 %334 }
 0x12b   :  { %v11412_v33 = vpop.permute.xlu0 %5013 }
 0x12c   :  { %440 = vrot.lane.b32.xlu1 %v422_v30, %s10981_s13 }
 0x12d   :  { %442 = vrot.lane.b32.xlu0 %v423_v37, %s10981_s13  ;;  %v5218_v37 = vmul.f32 %v11046_v13, %v11186_v8 }
 0x12e   :  { %v11418_v39 = vpop.permute.xlu1 %5015 }
 0x12f   :  { %v11422_v42 = vpop.permute.xlu0 %5017 }
 0x130   :  { %5101 = vrot.lane.b32.xlu1 %v5085_v40, %s10977_s9  ;;  %v108_v40 = vsel %vm105_vm0, %v11288_v63, %v11280_v58  ;;  %v154_v63 = vsel %vm151_vm1, %v11308_v9, %v11302_v6 }
 0x131   :  { %5103 = vrot.lane.b32.xlu0 %v5086_v44, %s10977_s9  ;;  %v118_v44 = vadd.f32 %v107_v50, %v72_v34  ;;  %v245_v34 = vsel %vm243_vm3, %v11332_v28, %v11348_v38 }
 0x132   :  { %v11428_v47 = vpop.permute.xlu1 %330 }
 0x133   :  { %v11432_v54 = vpop.permute.xlu0 %5011 }
 0x134   :  { %5142 = vrot.lane.b32.xlu1 %v5126_v49, %s10978_s10 }
 0x135   :  { %5144 = vrot.lane.b32.xlu0 %v5127_v29, %s10978_s10  ;;  %v73_v29 = vmul.f32 %v11073_v32, %v11269_v52 }
 0x136   :  { %v11438_v45 = vpop.permute.xlu1 %383 }
 0x137   :  { %v11442_v5 = vpop.permute.xlu0 %385  ;;  %v119_v50 = vadd.f32 %v108_v40, %v73_v29 }
 0x138   :  { %5190 = vrot.lane.b32.xlu1 %v5172_v0, %s10979_s11  ;;  %v199_v0 = vsel %vm197_vm2, %v11312_v14, %v11328_v24 }
 0x139   :  { %5192 = vrot.lane.b32.xlu0 %v5173_v10, %s10979_s11  ;;  %v164_v10 = vadd.f32 %v153_v20, %v118_v44  ;;  %v5265_v20 = vmul.f32 %v11049_v18, %v11212_v21  ;;  %v165_v40 = vadd.f32 %v154_v63, %v119_v50  ;;  %v291_v44 = vsel %vm289_vm4, %v11352_v41, %v11368_v48 }
 0x13a   :  { %v11456_v30 = vpop.permute.xlu1 %387 }
 0x13b   :  { %v11463_v49 = vpop.permute.xlu0 %5054  ;;  %v210_v61 = vadd.f32 %v199_v0, %v164_v10  ;;  %v346_v0 = vsel %vm344_vm5, %v11392_v7, %v11408_v25  ;;  %v322_v10 = vmul.f32 %v11055_v22, %v11150_v60 }
 0x13c   :  { %5236 = vrot.lane.b32.xlu1 %v5218_v37, %s10980_s12  ;;  %v200_v37 = vsel %vm197_vm2, %v11328_v24, %v11322_v19 }
 0x13d   :  { %5238 = vrot.lane.b32.xlu0 %v5219_v27, %s10980_s12  ;;  %v246_v27 = vsel %vm243_vm3, %v11348_v38, %v11342_v35  ;;  %v256_v29 = vadd.f32 %v245_v34, %v210_v61  ;;  %v211_v24 = vadd.f32 %v200_v37, %v165_v40  ;;  %v292_v61 = vsel %vm289_vm4, %v11368_v48, %v11362_v46 }
 0x13e   :  { %v11480_v32 = vpop.permute.xlu1 %5056  ;;  %v373_v34 = vmul.f32 %v11186_v8, %v11055_v22  ;;  %v71_v37 = vmul.f32 %v11082_v36, %v11269_v52  ;;  %v397_v40 = vsel %vm395_vm6, %v11438_v45, %v11442_v5 }
 0x13f   :  { %v11487_v9 = vpop.permute.xlu0 %5058  ;;  %v302_v38 = vadd.f32 %v291_v44, %v256_v29  ;;  %v424_v29 = vmul.f32 %v11212_v21, %v11055_v22  ;;  %v244_v22 = vsel %vm243_vm3, %v11358_v43, %v11332_v28  ;;  %v5266_v43 = vmul.f32 %v11058_v23, %v11212_v21 }
 0x140   :  { %5282 = vrot.lane.b32.xlu1 %v5264_v12, %s10981_s13  ;;  %v106_v12 = vsel %vm105_vm0, %v11298_v4, %v11278_v56  ;;  %v152_v56 = vsel %vm151_vm1, %v11318_v16, %v11292_v2  ;;  %v347_v4 = vsel %vm344_vm5, %v11408_v25, %v11402_v17  ;;  %v398_v2 = vsel %vm395_vm6, %v11442_v5, %v11456_v30 }
 0x141   :  { %5284 = vrot.lane.b32.xlu0 %v5265_v20, %s10981_s13  ;;  %v257_v20 = vadd.f32 %v246_v27, %v211_v24  ;;  %v358_v48 = vadd.f32 %v346_v0, %v302_v38  ;;  %v117_v36 = vadd.f32 %v106_v12, %v71_v37  ;;  %v198_v24 = vsel %vm197_vm2, %v11338_v31, %v11312_v14 }
 0x142   :  { %v382_v63 = vpop.permute.xlu1 %381  ;;  %v5174_v25 = vmul.f32 %v11058_v23, %v11150_v60  ;;  %v5220_v60 = vmul.f32 %v11058_v23, %v11186_v8  ;;  %v345_v8 = vsel %vm344_vm5, %v11428_v47, %v11392_v7 }
 0x143   :  { %v11510_v50 = vpop.permute.xlu0 %5052  ;;  %v303_v44 = vadd.f32 %v292_v61, %v257_v20  ;;  %v163_v0 = vadd.f32 %v152_v56, %v117_v36  ;;  %v396_v23 = vsel %vm395_vm6, %v382_v63, %v11438_v45 }
 0x144   :  { %342 = vrot.lane.b32.xlu1 %v322_v10, %s10979_s11  ;;  %v409_v10 = vadd.f32 %v397_v40, %v358_v48 }
 0x145   :  { %393 = vrot.lane.b32.xlu0 %v373_v34, %s10980_s12  ;;  %v359_v12 = vadd.f32 %v347_v4, %v303_v44  ;;  %v209_v31 = vadd.f32 %v198_v24, %v163_v0  ;;  %v290_v34 = vsel %vm289_vm4, %v11382_v62, %v11352_v41 }
 0x146   :  { %v435_v27 = vpop.permute.xlu1 %434 }
 0x147   :  { %v437_v16 = vpop.permute.xlu0 %436  ;;  %v410_v38 = vadd.f32 %v398_v2, %v359_v12  ;;  %v255_v40 = vadd.f32 %v244_v22, %v209_v31 }
 0x148   :  { %v448_v61 = vsel %vm446_vm7, %v435_v27, %v437_v16  ;;  %444 = vrot.lane.b32.xlu1 %v424_v29, %s10981_s13 }
 0x149   :  { %v460_v14 = vadd.f32 %v448_v61, %v409_v10  ;;  %5194 = vrot.lane.b32.xlu0 %v5174_v25, %s10979_s11  ;;  %v301_v41 = vadd.f32 %v290_v34, %v255_v40  ;;  %v4983_v34 = vsel %vm105_vm0, %v11378_v59, %v11372_v53 }
 0x14a   :  { %v11543_v5 = vpop.permute.xlu1 %438 }
 0x14b   :  { %v471_v37 = vadd.f32 %v11267_v51, %v460_v14  ;;  %v449_v20 = vsel %vm446_vm7, %v437_v16, %v11543_v5  ;;  %v11553_v28 = vpop.permute.xlu0 %5095  ;;  %v357_v36 = vadd.f32 %v345_v8, %v301_v41  ;;  %v4954_v41 = vmul.f32 %v11135_v55, %v11269_v52 }
 0x14c   :  { %v461_v56 = vadd.f32 %v449_v20, %v410_v38  ;;  %5240 = vrot.lane.b32.xlu1 %v5220_v60, %s10980_s12  ;;  %v5024_v20 = vsel %vm151_vm1, %v11412_v33, %v11418_v39  ;;  %v5023_v55 = vsel %vm151_vm1, %v11432_v54, %v11412_v33 }
 0x14d   :  { %v11561_v4 = vmax.f32 %v471_v37, 0.0  ;;  %5286 = vrot.lane.b32.xlu0 %v5266_v43, %s10981_s13  ;;  %v408_v7 = vadd.f32 %v396_v23, %v357_v36  ;;  %v4953_v37 = vmul.f32 %v11142_v57, %v11269_v52  ;;  %v4982_v57 = vsel %vm105_vm0, %v11398_v15, %v11378_v59 }
 0x14e   :  { %v472_v62 = vadd.f32 %v11267_v51, %v461_v56  ;;  %v11565_v48 = vpop.permute.xlu1 %5097  ;;  %v4984_v56 = vsel %vm105_vm0, %v11372_v53, %v11388_v3  ;;  %v4952_v23 = vmul.f32 %v11164_v1, %v11269_v52  ;;  %v5025_v53 = vsel %vm151_vm1, %v11418_v39, %v11422_v42 }
 0x14f   :  { %v11569_v21 = vpop.permute.xlu0 %5099  ;;  %v4994_v40 = vadd.f32 %v4983_v34, %v4953_v37  ;;  %v5106_v59 = vsel %vm243_vm3, %v11553_v28, %v11565_v48  ;;  %v5066_v1 = vsel %vm197_vm2, %v11480_v32, %v11487_v9  ;;  %v5064_v39 = vsel %vm197_vm2, %v11510_v50, %v11463_v49 }
 0x150   :  { %v11571_v44 = vmax.f32 %v472_v62, 0.0  ;;  %497 = vrot.lane.b32.xlu1 %v11561_v4, %s10974_s2  ;;  %v5065_v62 = vsel %vm197_vm2, %v11463_v49, %v11480_v32  ;;  %v5107_v37 = vsel %vm243_vm3, %v11565_v48, %v11569_v21 }
 0x151   :  { %v5035_v36 = vadd.f32 %v5024_v20, %v4994_v40 }
 0x152   :  { %v433_v47 = vpop.permute.xlu1 %432  ;;  %499 = vrot.lane.b32.xlu0 %v11571_v44, %s10974_s2 }
 0x153   :  { %v447_v29 = vsel %vm446_vm7, %v433_v47, %v435_v27  ;;  %v5094_v24 = vpop.permute.xlu0 %5093  ;;  %v4993_v47 = vadd.f32 %v4982_v57, %v4952_v23 }
 0x154   :  { %v459_v10 = vadd.f32 %v447_v29, %v408_v7  ;;  %v4995_v7 = vadd.f32 %v4984_v56, %v4954_v41  ;;  %v5076_v29 = vadd.f32 %v5065_v62, %v5035_v36  ;;  %v5105_v40 = vsel %vm243_vm3, %v5094_v24, %v11553_v28 }
 0x155   :  { %v5034_v54 = vadd.f32 %v5023_v55, %v4993_v47 }
 0x156   :  { %v470_v2 = vadd.f32 %v11267_v51, %v459_v10  ;;  %v5137_v45 = vpop.permute.xlu1 %5136  ;;  %526 = vrot.lane.b32.xlu0 %v11561_v4, %s10975_s30  ;;  %v5117_v34 = vadd.f32 %v5106_v59, %v5076_v29 }
 0x157   :  { %v5139_v63 = vpop.permute.xlu0 %5138  ;;  %v5075_v41 = vadd.f32 %v5064_v39, %v5034_v54 }
 0x158   :  { %v11581_v16 = vmax.f32 %v470_v2, 0.0  ;;  %v5036_v2 = vadd.f32 %v5025_v53, %v4995_v7  ;;  %v5147_v33 = vsel %vm289_vm4, %v5137_v45, %v5139_v63 }
 0x159   :  { %v5158_v57 = vadd.f32 %v5147_v33, %v5117_v34  ;;  %v5116_v36 = vadd.f32 %v5105_v40, %v5075_v41 }
 0x15a   :  { %v11583_v25 = vpop.permute.xlu1 %5140  ;;  %555 = vrot.lane.b32.xlu0 %v11561_v4, %s10976_s8  ;;  %495 = vrot.lane.b32.xlu1 %v11581_v16, %s10974_s2  ;;  %v5077_v20 = vadd.f32 %v5066_v1, %v5036_v2 }
 0x15b   :  { %v5135_v27 = vpop.permute.xlu0 %5134  ;;  %v5148_v49 = vsel %vm289_vm4, %v5139_v63, %v11583_v25 }
 0x15c   :  { %v5118_v62 = vadd.f32 %v5107_v37, %v5077_v20  ;;  %v5146_v23 = vsel %vm289_vm4, %v5135_v27, %v5137_v45 }
 0x15d   :  { %v5157_v59 = vadd.f32 %v5146_v23, %v5116_v36 }
 0x15e   :  { %v11589_v0 = vpop.permute.xlu1 %101  ;;  %524 = vrot.lane.b32.xlu0 %v11581_v16, %s10975_s30  ;;  %528 = vrot.lane.b32.xlu1 %v11571_v44, %s10975_s30  ;;  %v5159_v24 = vadd.f32 %v5148_v49, %v5118_v62 }
 0x15f   :  { %v11595_v12 = vpop.permute.xlu0 %103 }
 0x162   :  { %v5185_v61 = vpop.permute.xlu1 %5184  ;;  %584 = vrot.lane.b32.xlu0 %v11561_v4, %s10977_s9  ;;  %557 = vrot.lane.b32.xlu1 %v11571_v44, %s10976_s8 }
 0x163   :  { %v5187_v22 = vpop.permute.xlu0 %5186 }
 0x164   :  { %v5197_v32 = vsel %vm344_vm5, %v5185_v61, %v5187_v22 }
 0x165   :  { %v5209_v53 = vadd.f32 %v5197_v32, %v5158_v57 }
 0x166   :  { %v11601_v14 = vpop.permute.xlu1 %5188  ;;  %613 = vrot.lane.b32.xlu0 %v11561_v4, %s10978_s10  ;;  %553 = vrot.lane.b32.xlu1 %v11581_v16, %s10976_s8 }
 0x167   :  { %v5183_v31 = vpop.permute.xlu0 %5182  ;;  %v5198_v28 = vsel %vm344_vm5, %v5187_v22, %v11601_v14 }
 0x168   :  { %v5196_v7 = vsel %vm344_vm5, %v5183_v31, %v5185_v61  ;;  %v5210_v1 = vadd.f32 %v5198_v28, %v5159_v24 }
 0x169   :  { %v5208_v2 = vadd.f32 %v5196_v7, %v5157_v59  ;;  %v109_v59 = vsel %vm105_vm0, %v11280_v58, %v11589_v0 }
 0x16a   :  { %v11607_v38 = vpop.permute.xlu1 %147  ;;  %586 = vrot.lane.b32.xlu1 %v11571_v44, %s10977_s9 }
 0x16b   :  { %v11611_v60 = vpop.permute.xlu0 %149 }
 0x16e   :  { %v5231_v43 = vpop.permute.xlu1 %5230  ;;  %615 = vrot.lane.b32.xlu1 %v11571_v44, %s10978_s10 }
 0x16f   :  { %v5233_v8 = vpop.permute.xlu0 %5232 }
 0x170   :  { %v5243_v48 = vsel %vm395_vm6, %v5231_v43, %v5233_v8 }
 0x171   :  { %v5255_v47 = vadd.f32 %v5243_v48, %v5209_v53 }
 0x172   :  { %v11645_v15 = vpop.permute.xlu1 %5234 }
 0x173   :  { %v5229_v10 = vpop.permute.xlu0 %5228  ;;  %v5244_v63 = vsel %vm395_vm6, %v5233_v8, %v11645_v15 }
 0x174   :  { %v5242_v45 = vsel %vm395_vm6, %v5229_v10, %v5231_v43  ;;  %v5256_v33 = vadd.f32 %v5244_v63, %v5210_v1  ;;  %v74_v63 = vmul.f32 %v11062_v26, %v11269_v52  ;;  %v75_v1 = vmul.f32 %v11041_v11, %v11269_v52 }
 0x175   :  { %v5254_v22 = vadd.f32 %v5242_v45, %v5208_v2  ;;  %v155_v45 = vsel %vm151_vm1, %v11302_v6, %v11607_v38 }
 0x176   :  { %v11660_v56 = vpop.permute.xlu1 %193  ;;  %v120_v58 = vadd.f32 %v109_v59, %v74_v63 }
 0x177   :  { %v11664_v50 = vpop.permute.xlu0 %195 }
 0x178   :  { %v166_v6 = vadd.f32 %v155_v45, %v120_v58 }
 0x17a   :  { %v5277_v55 = vpop.permute.xlu1 %5276 }
 0x17b   :  { %v5279_v29 = vpop.permute.xlu0 %5278 }
 0x17c   :  { %v5289_v27 = vsel %vm446_vm7, %v5277_v55, %v5279_v29 }
 0x17d   :  { %v5301_v39 = vadd.f32 %v5289_v27, %v5255_v47  ;;  %v156_v27 = vsel %vm151_vm1, %v11607_v38, %v11611_v60 }
 0x17e   :  { %v11675_v54 = vpop.permute.xlu1 %5280 }
 0x17f   :  { %v5307_v61 = vadd.f32 %v5301_v39, %v11267_v51  ;;  %v5290_v31 = vsel %vm446_vm7, %v5279_v29, %v11675_v54  ;;  %v5275_v34 = vpop.permute.xlu0 %5274  ;;  %v110_v29 = vsel %vm105_vm0, %v11589_v0, %v11595_v12  ;;  %v201_v0 = vsel %vm197_vm2, %v11322_v19, %v11660_v56 }
 0x180   :  { %v5302_v37 = vadd.f32 %v5290_v31, %v5256_v33  ;;  %v5288_v8 = vsel %vm446_vm7, %v5275_v34, %v5277_v55  ;;  %v121_v26 = vadd.f32 %v110_v29, %v75_v1  ;;  %v202_v39 = vsel %vm197_vm2, %v11660_v56, %v11664_v50 }
 0x181   :  { %v11681_v20 = vmax.f32 %v5307_v61, 0.0  ;;  %v5300_v43 = vadd.f32 %v5288_v8, %v5254_v22  ;;  %v212_v22 = vadd.f32 %v201_v0, %v166_v6 }
 0x182   :  { %v5308_v10 = vadd.f32 %v5302_v37, %v11267_v51  ;;  %v240_v40 = vpop.permute.xlu1 %239  ;;  %v167_v38 = vadd.f32 %v156_v27, %v121_v26 }
 0x183   :  { %v5306_v32 = vadd.f32 %v5300_v43, %v11267_v51  ;;  %5332 = vrot.lane.b32.xlu0 %v11681_v20, %s10974_s2  ;;  %v11687_v41 = vpop.permute.xlu0 %241  ;;  %v247_v33 = vsel %vm243_vm3, %v11342_v35, %v240_v40 }
 0x184   :  { %v11689_v57 = vmax.f32 %v5308_v10, 0.0  ;;  %v248_v61 = vsel %vm243_vm3, %v240_v40, %v11687_v41  ;;  %v213_v19 = vadd.f32 %v202_v39, %v167_v38  ;;  %v258_v37 = vadd.f32 %v247_v33, %v212_v22 }
 0x185   :  { %v11691_v49 = vmax.f32 %v5306_v32, 0.0 }
 0x186   :  { %v286_v62 = vpop.permute.xlu1 %285  ;;  %5334 = vrot.lane.b32.xlu1 %v11689_v57, %s10974_s2  ;;  %v259_v8 = vadd.f32 %v248_v61, %v213_v19 }
 0x187   :  { %582 = vrot.lane.b32.xlu0 %v11581_v16, %s10977_s9  ;;  %v11697_v23 = vpop.permute.xlu0 %287  ;;  %v293_v34 = vsel %vm289_vm4, %v11362_v46, %v286_v62 }
 0x188   :  { %v294_v35 = vsel %vm289_vm4, %v286_v62, %v11697_v23  ;;  %v304_v10 = vadd.f32 %v293_v34, %v258_v37 }
 0x189   :  { %v305_v46 = vadd.f32 %v294_v35, %v259_v8  ;;  %v13586_v8 = vld [vmem:[#allocation6_spill] sm:$0xff] }
 0x18a   :  { %v4979_v48 = vpop.permute.xlu1 %4978  ;;  %611 = vrot.lane.b32.xlu1 %v11581_v16, %s10978_s10 }
 0x18b   :  { %5330 = vrot.lane.b32.xlu0 %v11691_v49, %s10974_s2  ;;  %v11703_v36 = vpop.permute.xlu0 %4980  ;;  %v4985_v59 = vsel %vm105_vm0, %v11388_v3, %v4979_v48  ;;  %v4956_v3 = vmul.f32 %v11046_v13, %v11269_v52 }
 0x18e   :  { %v339_v53 = vpop.permute.xlu1 %338  ;;  %642 = vrot.lane.b32.xlu1 %v11561_v4, %s10979_s11 }
 0x18f   :  { %644 = vrot.lane.b32.xlu0 %v11571_v44, %s10979_s11  ;;  %v11709_v28 = vpop.permute.xlu0 %340  ;;  %v348_v43 = vsel %vm344_vm5, %v11402_v17, %v339_v53  ;;  %v13585_v17 = vld [vmem:[#allocation7_spill] sm:$0xff] }
 0x190   :  { %v349_v40 = vsel %vm344_vm5, %v339_v53, %v11709_v28  ;;  %v4955_v29 = vmul.f32 %v13585_v17, %v11269_v52  ;;  %v4986_v53 = vsel %vm105_vm0, %v4979_v48, %v11703_v36  ;;  %v360_v1 = vadd.f32 %v348_v43, %v304_v10 }
 0x191   :  { %v361_v58 = vadd.f32 %v349_v40, %v305_v46  ;;  %v4997_v13 = vadd.f32 %v4986_v53, %v4956_v3 }
 0x192   :  { %v5020_v24 = vpop.permute.xlu1 %5019  ;;  %671 = vrot.lane.b32.xlu1 %v11561_v4, %s10980_s12  ;;  %v4996_v26 = vadd.f32 %v4985_v59, %v4955_v29 }
 0x193   :  { %673 = vrot.lane.b32.xlu0 %v11571_v44, %s10980_s12  ;;  %v11715_v7 = vpop.permute.xlu0 %5021 }
 0x194   :  { %v5027_v0 = vsel %vm151_vm1, %v5020_v24, %v11715_v7 }
 0x195   :  { %v5038_v22 = vadd.f32 %v5027_v0, %v4997_v13 }
 0x196   :  { %v390_v55 = vpop.permute.xlu1 %389  ;;  %5361 = vrot.lane.b32.xlu1 %v11681_v20, %s10975_s30 }
 0x197   :  { %5363 = vrot.lane.b32.xlu0 %v11689_v57, %s10975_s30  ;;  %v11724_v47 = vpop.permute.xlu0 %391  ;;  %v399_v63 = vsel %vm395_vm6, %v11456_v30, %v390_v55  ;;  %v5026_v30 = vsel %vm151_vm1, %v11422_v42, %v5020_v24 }
 0x198   :  { %v400_v45 = vsel %vm395_vm6, %v390_v55, %v11724_v47  ;;  %v411_v6 = vadd.f32 %v399_v63, %v360_v1  ;;  %v5037_v38 = vadd.f32 %v5026_v30, %v4996_v26  ;;  %v4957_v30 = vmul.f32 %v11049_v18, %v11269_v52 }
 0x199   :  { %v412_v55 = vadd.f32 %v400_v45, %v361_v58 }
 0x19a   :  { %v5061_v2 = vpop.permute.xlu1 %5060  ;;  %5390 = vrot.lane.b32.xlu1 %v11681_v20, %s10976_s8 }
 0x19b   :  { %5392 = vrot.lane.b32.xlu0 %v11689_v57, %s10976_s8  ;;  %v11746_v11 = vpop.permute.xlu0 %5062  ;;  %v5067_v42 = vsel %vm197_vm2, %v11487_v9, %v5061_v2 }
 0x19c   :  { %v5068_v24 = vsel %vm197_vm2, %v5061_v2, %v11746_v11  ;;  %v5078_v19 = vadd.f32 %v5067_v42, %v5037_v38 }
 0x19d   :  { %v5079_v37 = vadd.f32 %v5068_v24, %v5038_v22 }
 0x19e   :  { %v441_v31 = vpop.permute.xlu1 %440  ;;  %640 = vrot.lane.b32.xlu1 %v11581_v16, %s10979_s11 }
 0x19f   :  { %669 = vrot.lane.b32.xlu0 %v11581_v16, %s10980_s12  ;;  %v11761_v56 = vpop.permute.xlu0 %442  ;;  %v450_v27 = vsel %vm446_vm7, %v11543_v5, %v441_v31 }
 0x1a0   :  { %v451_v48 = vsel %vm446_vm7, %v441_v31, %v11761_v56  ;;  %v462_v33 = vadd.f32 %v450_v27, %v411_v6 }
 0x1a1   :  { %v463_v61 = vadd.f32 %v451_v48, %v412_v55 }
 0x1a2   :  { %v5102_v32 = vpop.permute.xlu1 %5101  ;;  %5359 = vrot.lane.b32.xlu1 %v11691_v49, %s10975_s30  ;;  %v473_v43 = vadd.f32 %v11267_v51, %v462_v33 }
 0x1a3   :  { %5388 = vrot.lane.b32.xlu0 %v11691_v49, %s10976_s8  ;;  %v11777_v62 = vpop.permute.xlu0 %5103  ;;  %v5108_v31 = vsel %vm243_vm3, %v11569_v21, %v5102_v32  ;;  %v76_v21 = vmul.f32 %v13586_v8, %v11269_v52 }
 0x1a4   :  { %v5109_v34 = vsel %vm243_vm3, %v5102_v32, %v11777_v62  ;;  %v5119_v10 = vadd.f32 %v5108_v31, %v5078_v19  ;;  %v474_v32 = vadd.f32 %v11267_v51, %v463_v61  ;;  %v11835_v3 = vmax.f32 %v473_v43, 0.0 }
 0x1a5   :  { %v5120_v46 = vadd.f32 %v5109_v34, %v5079_v37  ;;  %v122_v59 = vadd.f32 %v11595_v12, %v76_v21  ;;  %v10982_v31 = vmov 0.0  }
 0x1a6   :  { %v5143_v39 = vpop.permute.xlu1 %5142  ;;  %5419 = vrot.lane.b32.xlu1 %v11681_v20, %s10977_s9  ;;  %v11840_v27 = vmax.f32 %v474_v32, 0.0  ;;  %861 = vmatprep.mubr.f32.mxu1 %v10982_v31 }
 0x1a7   :  { %5421 = vrot.lane.b32.xlu0 %v11689_v57, %s10977_s9  ;;  %v11801_v5 = vpop.permute.xlu0 %5144  ;;  %v5149_v35 = vsel %vm289_vm4, %v11583_v25, %v5143_v39  ;;  %5680 = vmatprep.mubr.f32.mxu0 %v10982_v31 }
 0x1a8   :  { %v5150_v40 = vsel %vm289_vm4, %v5143_v39, %v11801_v5  ;;  %v5160_v63 = vadd.f32 %v5149_v35, %v5119_v10 }
 0x1a9   :  { %v5161_v53 = vadd.f32 %v5150_v40, %v5120_v46 }
 0x1aa   :  { %v5191_v9 = vpop.permute.xlu1 %5190  ;;  %5448 = vrot.lane.b32.xlu1 %v11681_v20, %s10978_s10 }
 0x1ab   :  { %5450 = vrot.lane.b32.xlu0 %v11689_v57, %s10978_s10  ;;  %v11815_v2 = vpop.permute.xlu0 %5192  ;;  %v5199_v25 = vsel %vm344_vm5, %v11601_v14, %v5191_v9  ;;  %v168_v14 = vadd.f32 %v11611_v60, %v122_v59  ;;  %v4998_v60 = vadd.f32 %v11703_v36, %v4957_v30 }
 0x1ac   :  { %v5200_v17 = vsel %vm344_vm5, %v5191_v9, %v11815_v2  ;;  %v5211_v12 = vadd.f32 %v5199_v25, %v5160_v63 }
 0x1ad   :  { %v5212_v26 = vadd.f32 %v5200_v17, %v5161_v53  ;;  %v214_v0 = vadd.f32 %v11664_v50, %v168_v14  ;;  %v5039_v55 = vadd.f32 %v11715_v7, %v4998_v60 }
 0x1ae   :  { %v5237_v29 = vpop.permute.xlu1 %5236  ;;  %5417 = vrot.lane.b32.xlu1 %v11691_v49, %s10977_s9 }
 0x1af   :  { %v5245_v1 = vsel %vm395_vm6, %v11645_v15, %v5237_v29  ;;  %5446 = vrot.lane.b32.xlu0 %v11691_v49, %s10978_s10  ;;  %v5239_v45 = vpop.permute.xlu0 %5238  ;;  %v260_v52 = vadd.f32 %v11687_v41, %v214_v0 }
 0x1b0   :  { %v5246_v58 = vsel %vm395_vm6, %v5237_v29, %v5239_v45  ;;  %v5257_v15 = vadd.f32 %v5245_v1, %v5211_v12 }
 0x1b1   :  { %v5258_v48 = vadd.f32 %v5246_v58, %v5212_v26  ;;  %v306_v38 = vadd.f32 %v11697_v23, %v260_v52 }
 0x1b2   :  { %v5283_v6 = vpop.permute.xlu1 %5282  ;;  %501 = vrot.lane.b32.xlu1 %v11835_v3, %s10974_s2 }
 0x1b3   :  { %v5291_v39 = vsel %vm446_vm7, %v11675_v54, %v5283_v6  ;;  %503 = vrot.lane.b32.xlu0 %v11840_v27, %s10974_s2  ;;  %v5285_v18 = vpop.permute.xlu0 %5284  ;;  %v5080_v54 = vadd.f32 %v11746_v11, %v5039_v55 }
 0x1b4   :  { %v5303_v13 = vadd.f32 %v5291_v39, %v5257_v15  ;;  %v5292_v50 = vsel %vm446_vm7, %v5283_v6, %v5285_v18 }
 0x1b5   :  { %v5304_v42 = vadd.f32 %v5292_v50, %v5258_v48  ;;  %v5121_v11 = vadd.f32 %v11777_v62, %v5080_v54 }
 0x1b6   :  { %v5309_v36 = vadd.f32 %v5303_v13, %v11267_v51  ;;  %v343_v24 = vpop.permute.xlu1 %342  ;;  %700 = vrot.lane.b32.xlu1 %v11561_v4, %s10981_s13 }
 0x1b7   :  { %v5310_v33 = vadd.f32 %v5304_v42, %v11267_v51  ;;  %v350_v41 = vsel %vm344_vm5, %v11709_v28, %v343_v24  ;;  %702 = vrot.lane.b32.xlu0 %v11571_v44, %s10981_s13  ;;  %v394_v7 = vpop.permute.xlu0 %393  ;;  %v5162_v9 = vadd.f32 %v11801_v5, %v5121_v11 }
 0x1b8   :  { %v11863_v22 = vmax.f32 %v5309_v36, 0.0  ;;  %v362_v23 = vadd.f32 %v350_v41, %v306_v38  ;;  %v401_v61 = vsel %vm395_vm6, %v11724_v47, %v394_v7 }
 0x1b9   :  { %v11870_v19 = vmax.f32 %v5310_v33, 0.0 }
 0x1ba   :  { %v413_v28 = vadd.f32 %v401_v61, %v362_v23  ;;  %v445_v34 = vpop.permute.xlu1 %444  ;;  %698 = vrot.lane.b32.xlu1 %v11581_v16, %s10981_s13 }
 0x1bb   :  { %v452_v37 = vsel %vm446_vm7, %v11761_v56, %v445_v34  ;;  %5477 = vrot.lane.b32.xlu0 %v11681_v20, %s10979_s11  ;;  %v5195_v47 = vpop.permute.xlu0 %5194 }
 0x1bc   :  { %v464_v35 = vadd.f32 %v452_v37, %v413_v28  ;;  %v5201_v62 = vsel %vm344_vm5, %v11815_v2, %v5195_v47 }
 0x1bd   :  { %v5213_v8 = vadd.f32 %v5201_v62, %v5162_v9 }
 0x1be   :  { %v475_v21 = vadd.f32 %v11267_v51, %v464_v35  ;;  %v5241_v43 = vpop.permute.xlu1 %5240  ;;  %5479 = vrot.lane.b32.xlu1 %v11689_v57, %s10979_s11 }
 0x1bf   :  { %v5247_v5 = vsel %vm395_vm6, %v5239_v45, %v5241_v43  ;;  %5506 = vrot.lane.b32.xlu0 %v11681_v20, %s10980_s12  ;;  %v5287_v56 = vpop.permute.xlu0 %5286 }
 0x1c0   :  { %v11887_v10 = vmax.f32 %v475_v21, 0.0  ;;  %v5259_v40 = vadd.f32 %v5247_v5, %v5213_v8  ;;  %v5293_v32 = vsel %vm446_vm7, %v5285_v18, %v5287_v56 }
 0x1c2   :  { %v5305_v2 = vadd.f32 %v5293_v32, %v5259_v40  ;;  %5508 = vrot.lane.b32.xlu1 %v11689_v57, %s10980_s12  ;;  %488 = vst.msk [vmem:[#allocation2 + $0x28] sm:$0xff] %vm487_vm8, %v11887_v10  ;;  %v498_v25 = vpop.permute.xlu1 %497 }
 0x1c3   :  { %5475 = vrot.lane.b32.xlu0 %v11691_v49, %s10979_s11 }
 0x1c4   :  { %v5311_v46 = vadd.f32 %v5305_v2, %v11267_v51  ;;  %v11897_v59 = vpop.permute.xlu0 %499 }
 0x1c5   :  { %v508_v63 = vsel %vm105_vm0, %v498_v25, %v11897_v59 }
 0x1c6   :  { %5504 = vrot.lane.b32.xlu1 %v11691_v49, %s10980_s12  ;;  %v10208_v17 = vpack.c.bf16 %v508_v63, %v11561_v4  ;;  %v11906_v29 = vmax.f32 %v5311_v46, 0.0 }
 0x1c7   :  { %530 = vrot.lane.b32.xlu0 %v11835_v3, %s10975_s30 }
 0x1c8   :  { %v527_v53 = vpop.permute.xlu0 %526  ;;  %10209 = vmatprep.subr.bf16.mxu1 %v10208_v17 }
 0x1c9   :  { %v11908_v1 = vld [vmem:[#allocation2 + $0x28] sm:$0xff] }
 0x1ca   :  { %532 = vrot.lane.b32.xlu1 %v11840_v27, %s10975_s30  ;;  %5323 = vst.msk [vmem:[#allocation2 + $0x28] sm:$0xff] %vm487_vm8, %v11906_v29 }
 0x1cb   :  { %559 = vrot.lane.b32.xlu0 %v11835_v3, %s10976_s8 }
 0x1cc   :  { %v496_v51 = vpop.permute.xlu1 %495  ;;  %v556_v45 = vpop.permute.xlu0 %555 }
 0x1cd   :  { %v507_v4 = vsel %vm105_vm0, %v496_v51, %v498_v25 }
 0x1ce   :  { %561 = vrot.lane.b32.xlu1 %v11840_v27, %s10976_s8  ;;  %v10210_v14 = vpack.c.bf16 %v507_v4, %v11581_v16 }
 0x1cf   :  { %588 = vrot.lane.b32.xlu0 %v11835_v3, %s10977_s9 }
 0x1d0   :  { %v11922_v12 = vpop.permute.xlu1 %528  ;;  %10211 = vmatpush1.bf16.msra.mxu1 %v10210_v14  ;;  %v525_v58 = vpop.permute.xlu0 %524 }
 0x1d1   :  { %v537_v26 = vsel %vm151_vm1, %v527_v53, %v11922_v12  ;;  %v536_v6 = vsel %vm151_vm1, %v525_v58, %v527_v53 }
 0x1d2   :  { %590 = vrot.lane.b32.xlu1 %v11840_v27, %s10977_s9 }
 0x1d3   :  { %617 = vrot.lane.b32.xlu0 %v11835_v3, %s10978_s10 }
 0x1d4   :  { %v11928_v30 = vpop.permute.xlu1 %557  ;;  %v585_v48 = vpop.permute.xlu0 %584 }
 0x1d5   :  { %v566_v16 = vsel %vm197_vm2, %v556_v45, %v11928_v30 }
 0x1d6   :  { %619 = vrot.lane.b32.xlu1 %v11840_v27, %s10978_s10  ;;  %v10212_v0 = vpack.c.bf16 %v566_v16, %v537_v26 }
 0x1d7   :  { %5336 = vrot.lane.b32.xlu0 %v11863_v22, %s10974_s2 }
 0x1d8   :  { %v554_v15 = vpop.permute.xlu1 %553  ;;  %10213 = vmatprep.subr.bf16.mxu1 %v10212_v0  ;;  %v614_v52 = vpop.permute.xlu0 %613 }
 0x1d9   :  { %v565_v60 = vsel %vm197_vm2, %v554_v15, %v556_v45 }
 0x1da   :  { %5338 = vrot.lane.b32.xlu1 %v11870_v19, %s10974_s2  ;;  %v10214_v39 = vpack.c.bf16 %v565_v60, %v536_v6 }
 0x1db   :  { %5535 = vrot.lane.b32.xlu0 %v11681_v20, %s10981_s13 }
 0x1dc   :  { %v11944_v18 = vpop.permute.xlu1 %586  ;;  %10215 = vmatpush1.bf16.msra.mxu1 %v10214_v39 }
 0x1dd   :  { %v595_v50 = vsel %vm243_vm3, %v585_v48, %v11944_v18 }
 0x1de   :  { %5537 = vrot.lane.b32.xlu1 %v11689_v57, %s10981_s13 }
 0x1df   :  { %5533 = vrot.lane.b32.xlu0 %v11691_v49, %s10981_s13 }
 0x1e0   :  { %v11950_v13 = vpop.permute.xlu1 %615 }
 0x1e1   :  { %v624_v55 = vsel %vm289_vm4, %v614_v52, %v11950_v13 }
 0x1e2   :  { %646 = vrot.lane.b32.xlu1 %v11835_v3, %s10979_s11  ;;  %v10216_v42 = vpack.c.bf16 %v624_v55, %v595_v50 }
 0x1e3   :  { %648 = vrot.lane.b32.xlu0 %v11840_v27, %s10979_s11 }
 0x1e4   :  { %10217 = vmatprep.subr.bf16.mxu1 %v10216_v42 }
 0x1e6   :  { %675 = vrot.lane.b32.xlu1 %v11835_v3, %s10980_s12 }
 0x1e7   :  { %677 = vrot.lane.b32.xlu0 %v11840_v27, %s10980_s12 }
 0x1ea   :  { %5365 = vrot.lane.b32.xlu1 %v11863_v22, %s10975_s30 }
 0x1eb   :  { %5367 = vrot.lane.b32.xlu0 %v11870_v19, %s10975_s30 }
 0x1ee   :  { %5394 = vrot.lane.b32.xlu1 %v11863_v22, %s10976_s8 }
 0x1ef   :  { %5396 = vrot.lane.b32.xlu0 %v11870_v19, %s10976_s8 }
 0x1f2   :  { %5423 = vrot.lane.b32.xlu1 %v11863_v22, %s10977_s9 }
 0x1f3   :  { %5425 = vrot.lane.b32.xlu0 %v11870_v19, %s10977_s9 }
 0x1f5   :  { %v5333_v38 = vpop.permute.xlu0 %5332 }
 0x1f6   :  { %5452 = vrot.lane.b32.xlu1 %v11863_v22, %s10978_s10 }
 0x1f7   :  { %5454 = vrot.lane.b32.xlu0 %v11870_v19, %s10978_s10 }
 0x1f8   :  { %v11980_v36 = vpop.permute.xlu1 %5334 }
 0x1f9   :  { %v5343_v24 = vsel %vm105_vm0, %v5333_v38, %v11980_v36  ;;  %v583_v54 = vpop.permute.xlu0 %582 }
 0x1fa   :  { %704 = vrot.lane.b32.xlu1 %v11835_v3, %s10981_s13  ;;  %v10464_v33 = vpack.c.bf16 %v5343_v24, %v11681_v20  ;;  %v594_v7 = vsel %vm243_vm3, %v583_v54, %v585_v48  ;;  %v31_v24 = vld [vmem:[%s13577_s4] sm:$0xff] }
 0x1fb   :  { %706 = vrot.lane.b32.xlu0 %v11840_v27, %s10981_s13 }
 0x1fc   :  { %v612_v41 = vpop.permute.xlu1 %611  ;;  %10465 = vmatprep.subr.bf16.mxu0 %v10464_v33 }
 0x1fd   :  { %v623_v23 = vsel %vm289_vm4, %v612_v41, %v614_v52  ;;  %v5331_v61 = vpop.permute.xlu0 %5330 }
 0x1fe   :  { %v5342_v11 = vsel %vm105_vm0, %v5331_v61, %v5333_v38  ;;  %505 = vrot.lane.b32.xlu1 %v11887_v10, %s10974_s2  ;;  %v10218_v28 = vpack.c.bf16 %v623_v23, %v594_v7  ;;  %v12086_v61 = vld [vmem:[%s13576_s3] sm:$0xff] }
 0x1ff   :  { %5481 = vrot.lane.b32.xlu0 %v11863_v22, %s10979_s11  ;;  %v10466_v20 = vpack.c.bf16 %v5342_v11, %v11691_v49 }
 0x200   :  { %v643_v34 = vpop.permute.xlu1 %642  ;;  %10219 = vmatpush1.bf16.msra.mxu1 %v10218_v28 }
 0x201   :  { %v11997_v9 = vpop.permute.xlu0 %644  ;;  %10467 = vmatpush1.bf16.msra.mxu0 %v10466_v20 }
 0x202   :  { %5483 = vrot.lane.b32.xlu1 %v11870_v19, %s10979_s11  ;;  %v653_v35 = vsel %vm344_vm5, %v643_v34, %v11997_v9 }
 0x203   :  { %5510 = vrot.lane.b32.xlu0 %v11863_v22, %s10980_s12 }
 0x204   :  { %v672_v37 = vpop.permute.xlu1 %671 }
 0x205   :  { %v12003_v47 = vpop.permute.xlu0 %673 }
 0x206   :  { %v682_v49 = vsel %vm395_vm6, %v672_v37, %v12003_v47  ;;  %5512 = vrot.lane.b32.xlu1 %v11870_v19, %s10980_s12 }
 0x207   :  { %534 = vrot.lane.b32.xlu0 %v11887_v10, %s10975_s30  ;;  %v10220_v62 = vpack.c.bf16 %v682_v49, %v653_v35 }
 0x208   :  { %v5362_v8 = vpop.permute.xlu1 %5361 }
 0x209   :  { %v12013_v21 = vpop.permute.xlu0 %5363  ;;  %10221 = vmatprep.subr.bf16.mxu1 %v10220_v62 }
 0x20a   :  { %v5372_v43 = vsel %vm151_vm1, %v5362_v8, %v12013_v21  ;;  %563 = vrot.lane.b32.xlu1 %v11887_v10, %s10976_s8 }
 0x20b   :  { %5539 = vrot.lane.b32.xlu0 %v11863_v22, %s10981_s13 }
 0x20c   :  { %v5391_v5 = vpop.permute.xlu1 %5390 }
 0x20d   :  { %v12021_v56 = vpop.permute.xlu0 %5392 }
 0x20e   :  { %v5401_v40 = vsel %vm197_vm2, %v5391_v5, %v12021_v56  ;;  %5541 = vrot.lane.b32.xlu1 %v11870_v19, %s10981_s13 }
 0x20f   :  { %592 = vrot.lane.b32.xlu0 %v11887_v10, %s10977_s9  ;;  %v10468_v32 = vpack.c.bf16 %v5401_v40, %v5372_v43 }
 0x210   :  { %v641_v2 = vpop.permute.xlu1 %640 }
 0x211   :  { %v652_v46 = vsel %vm344_vm5, %v641_v2, %v643_v34  ;;  %v670_v25 = vpop.permute.xlu0 %669  ;;  %10469 = vmatprep.subr.bf16.mxu0 %v10468_v32 }
 0x212   :  { %v681_v63 = vsel %vm395_vm6, %v670_v25, %v672_v37  ;;  %621 = vrot.lane.b32.xlu1 %v11887_v10, %s10978_s10  ;;  %v12099_v37 = vld [vmem:[%s13576_s3 + $0x8] sm:$0xff] }
 0x213   :  { %5340 = vrot.lane.b32.xlu0 %v11906_v29, %s10974_s2  ;;  %v10222_v17 = vpack.c.bf16 %v681_v63, %v652_v46 }
 0x214   :  { %v5360_v53 = vpop.permute.xlu1 %5359 }
 0x215   :  { %v5371_v51 = vsel %vm151_vm1, %v5360_v53, %v5362_v8  ;;  %v5389_v4 = vpop.permute.xlu0 %5388  ;;  %10223 = vmatpush1.bf16.msra.mxu1 %v10222_v17 }
 0x216   :  { %v5400_v45 = vsel %vm197_vm2, %v5389_v4, %v5391_v5  ;;  %650 = vrot.lane.b32.xlu1 %v11887_v10, %s10979_s11 }
 0x217   :  { %679 = vrot.lane.b32.xlu0 %v11887_v10, %s10980_s12  ;;  %v10470_v14 = vpack.c.bf16 %v5400_v45, %v5371_v51 }
 0x218   :  { %v5420_v58 = vpop.permute.xlu1 %5419 }
 0x219   :  { %v12041_v26 = vpop.permute.xlu0 %5421  ;;  %10471 = vmatpush1.bf16.msra.mxu0 %v10470_v14 }
 0x21a   :  { %v5430_v16 = vsel %vm243_vm3, %v5420_v58, %v12041_v26  ;;  %5369 = vrot.lane.b32.xlu1 %v11906_v29, %s10975_s30 }
 0x21b   :  { %5398 = vrot.lane.b32.xlu0 %v11906_v29, %s10976_s8 }
 0x21c   :  { %v5449_v0 = vpop.permute.xlu1 %5448 }
 0x21d   :  { %v12049_v15 = vpop.permute.xlu0 %5450 }
 0x21e   :  { %v5459_v6 = vsel %vm289_vm4, %v5449_v0, %v12049_v15  ;;  %5427 = vrot.lane.b32.xlu1 %v11906_v29, %s10977_s9 }
 0x21f   :  { %5456 = vrot.lane.b32.xlu0 %v11906_v29, %s10978_s10  ;;  %v10472_v60 = vpack.c.bf16 %v5459_v6, %v5430_v16 }
 0x220   :  { %v5418_v48 = vpop.permute.xlu1 %5417 }
 0x221   :  { %v5429_v39 = vsel %vm243_vm3, %v5418_v48, %v5420_v58  ;;  %v5447_v52 = vpop.permute.xlu0 %5446  ;;  %10473 = vmatprep.subr.bf16.mxu0 %v10472_v60 }
 0x222   :  { %v5458_v50 = vsel %vm289_vm4, %v5447_v52, %v5449_v0  ;;  %708 = vrot.lane.b32.xlu1 %v11887_v10, %s10981_s13  ;;  %v32_v10 = vld [vmem:[%s13577_s4 + $0x8] sm:$0xff] }
 0x223   :  { %5485 = vrot.lane.b32.xlu0 %v11906_v29, %s10979_s11  ;;  %v10474_v55 = vpack.c.bf16 %v5458_v50, %v5429_v39 }
 0x224   :  { %v502_v42 = vpop.permute.xlu1 %501 }
 0x225   :  { %v12063_v38 = vpop.permute.xlu0 %503  ;;  %10475 = vmatpush1.bf16.msra.mxu0 %v10474_v55 }
 0x226   :  { %5514 = vrot.lane.b32.xlu1 %v11906_v29, %s10980_s12  ;;  %v510_v41 = vsel %vm105_vm0, %v502_v42, %v12063_v38 }
 0x227   :  { %5543 = vrot.lane.b32.xlu0 %v11906_v29, %s10981_s13  ;;  %v509_v29 = vsel %vm105_vm0, %v11897_v59, %v502_v42  ;;  %v10224_v20 = vpack.c.bf16 %v510_v41, %v11835_v3 }
 0x228   :  { %v701_v54 = vpop.permute.xlu1 %700  ;;  %v10226_v34 = vpack.c.bf16 %v509_v29, %v11571_v44 }
 0x229   :  { %v12075_v33 = vpop.permute.xlu0 %702 }
 0x22a   :  { %v711_v7 = vsel %vm446_vm7, %v701_v54, %v12075_v33  ;;  %783 = vperm.xlu1 %10940, %v31_v24  }
 0x22b   :  { %788 = vperm.xlu0 %10939, %v32_v10   ;;  %813 = vmatprep.subr.mxu1 %v711_v7 }
 0x22c   :  { %v699_v23 = vpop.permute.xlu1 %698 }
 0x22d   :  { %v710_v11 = vsel %vm446_vm7, %v699_v23, %v701_v54  ;;  %v5478_v28 = vpop.permute.xlu0 %5477 }
 0x22e   :  { %814 = vmatpush1.msra.mxu1 %v710_v11 }
 0x22f   :  { %9739 = vmatmul.mubr.msk.f32.vlgmr.msra.gmra.mrb[0].mxu1 %vm344_vm5, %v12086_v61  ;;  %10225 = vmatprep.subr.bf16.mxu1 %v10224_v20 }
 0x230   :  { %v12093_v59 = vpop.permute.xlu1 %5479  ;;  %10227 = vmatpush1.bf16.msra.mxu1 %v10226_v34  ;;  %867 = vmatprep.mubr.f32.mxu1 %v10982_v31 }
 0x231   :  { %v5488_v3 = vsel %vm344_vm5, %v5478_v28, %v12093_v59  ;;  %v5507_v35 = vpop.permute.xlu0 %5506 }
 0x233   :  { %9740 = vmatmul.mubr.msk.f32.gmra.mrb[2].mxu1 %vm344_vm5, %v12099_v37 }
 0x234   :  { %v12105_v44 = vpop.permute.xlu1 %5508  ;;  %938 = vmatprep.mubr.f32.mxu1 %v10982_v31 }
 0x235   :  { %v5517_v49 = vsel %vm395_vm6, %v5507_v35, %v12105_v44  ;;  %v5476_v62 = vpop.permute.xlu0 %5475 }
 0x236   :  { %v5487_v8 = vsel %vm344_vm5, %v5476_v62, %v5478_v28  ;;  %v10476_v43 = vpack.c.bf16 %v5517_v49, %v5488_v3 }
 0x238   :  { %v5505_v5 = vpop.permute.xlu1 %5504  ;;  %10477 = vmatprep.subr.bf16.mxu0 %v10476_v43 }
 0x239   :  { %v5516_v40 = vsel %vm395_vm6, %v5505_v5, %v5507_v35  ;;  %v531_v32 = vpop.permute.xlu0 %530 }
 0x23a   :  { %v10478_v2 = vpack.c.bf16 %v5516_v40, %v5487_v8  ;;  %v538_v45 = vsel %vm151_vm1, %v11922_v12, %v531_v32 }
 0x23c   :  { %v12112_v46 = vpop.permute.xlu1 %532  ;;  %10479 = vmatpush1.bf16.msra.mxu0 %v10478_v2 }
 0x23d   :  { %v560_v25 = vpop.permute.xlu0 %559  ;;  %v539_v53 = vsel %vm151_vm1, %v531_v32, %v12112_v46 }
 0x23e   :  { %v567_v63 = vsel %vm197_vm2, %v11928_v30, %v560_v25 }
 0x23f   :  { %v10230_v58 = vpack.c.bf16 %v567_v63, %v538_v45 }
 0x240   :  { %v12116_v17 = vpop.permute.xlu1 %561 }
 0x241   :  { %v568_v51 = vsel %vm197_vm2, %v560_v25, %v12116_v17  ;;  %v589_v4 = vpop.permute.xlu0 %588 }
 0x242   :  { %v10228_v14 = vpack.c.bf16 %v568_v51, %v539_v53  ;;  %v596_v12 = vsel %vm243_vm3, %v11944_v18, %v589_v4 }
 0x244   :  { %v12124_v16 = vpop.permute.xlu1 %590  ;;  %10229 = vmatprep.subr.bf16.mxu1 %v10228_v14 }
 0x245   :  { %v618_v0 = vpop.permute.xlu0 %617  ;;  %10231 = vmatpush1.bf16.msra.mxu1 %v10230_v58  ;;  %v597_v60 = vsel %vm243_vm3, %v589_v4, %v12124_v16 }
 0x246   :  { %v625_v30 = vsel %vm289_vm4, %v11950_v13, %v618_v0 }
 0x247   :  { %v10234_v55 = vpack.c.bf16 %v625_v30, %v596_v12 }
 0x248   :  { %v12128_v6 = vpop.permute.xlu1 %619 }
 0x249   :  { %v626_v48 = vsel %vm289_vm4, %v618_v0, %v12128_v6  ;;  %v5337_v39 = vpop.permute.xlu0 %5336 }
 0x24a   :  { %v5344_v52 = vsel %vm105_vm0, %v11980_v36, %v5337_v39  ;;  %v10232_v50 = vpack.c.bf16 %v626_v48, %v597_v60 }
 0x24b   :  { %v10482_v7 = vpack.c.bf16 %v5344_v52, %v11689_v57 }
 0x24c   :  { %v12138_v42 = vpop.permute.xlu1 %5338  ;;  %10233 = vmatprep.subr.bf16.mxu1 %v10232_v50 }
 0x24d   :  { %v5345_v13 = vsel %vm105_vm0, %v5337_v39, %v12138_v42  ;;  %v5536_v24 = vpop.permute.xlu0 %5535  ;;  %10235 = vmatpush1.bf16.msra.mxu1 %v10234_v55 }
 0x24e   :  { %v10480_v36 = vpack.c.bf16 %v5345_v13, %v11863_v22 }
 0x250   :  { %v12142_v54 = vpop.permute.xlu1 %5537 }
 0x251   :  { %v5546_v10 = vsel %vm446_vm7, %v5536_v24, %v12142_v54  ;;  %v5534_v41 = vpop.permute.xlu0 %5533 }
 0x252   :  { %v5545_v18 = vsel %vm446_vm7, %v5534_v41, %v5536_v24  ;;  %5632 = vmatprep.subr.mxu0 %v5546_v10 }
 0x253   :  { %5633 = vmatpush1.msra.mxu0 %v5545_v18 }
 0x254   :  { %v647_v29 = vpop.permute.xlu1 %646  ;;  %9974 = vmatmul.mubr.msk.f32.vlgmr.msra.gmra.mrb[0].mxu0 %vm344_vm5, %v12086_v61  ;;  %10481 = vmatprep.subr.bf16.mxu0 %v10480_v36 }
 0x255   :  { %v12151_v23 = vpop.permute.xlu0 %648  ;;  %10483 = vmatpush1.bf16.msra.mxu0 %v10482_v7  ;;  %5686 = vmatprep.mubr.f32.mxu0 %v10982_v31  ;;  %v654_v34 = vsel %vm344_vm5, %v11997_v9, %v647_v29 }
 0x256   :  { %v655_v57 = vsel %vm344_vm5, %v647_v29, %v12151_v23 }
 0x258   :  { %v676_v11 = vpop.permute.xlu1 %675  ;;  %9975 = vmatmul.mubr.msk.f32.gmra.mrb[2].mxu0 %vm344_vm5, %v12099_v37 }
 0x259   :  { %v683_v22 = vsel %vm395_vm6, %v12003_v47, %v676_v11  ;;  %v12158_v28 = vpop.permute.xlu0 %677  ;;  %5757 = vmatprep.mubr.f32.mxu0 %v10982_v31 }
 0x25a   :  { %v684_v20 = vsel %vm395_vm6, %v676_v11, %v12158_v28  ;;  %v10238_v49 = vpack.c.bf16 %v683_v22, %v654_v34 }
 0x25b   :  { %v10236_v3 = vpack.c.bf16 %v684_v20, %v655_v57 }
 0x25c   :  { %v5366_v35 = vpop.permute.xlu1 %5365 }
 0x25d   :  { %v5373_v62 = vsel %vm151_vm1, %v12013_v21, %v5366_v35  ;;  %v12169_v47 = vpop.permute.xlu0 %5367  ;;  %10237 = vmatprep.subr.bf16.mxu1 %v10236_v3 }
 0x25e   :  { %v5374_v8 = vsel %vm151_vm1, %v5366_v35, %v12169_v47  ;;  %10239 = vmatpush1.bf16.msra.mxu1 %v10238_v49 }
 0x260   :  { %v5395_v43 = vpop.permute.xlu1 %5394 }
 0x261   :  { %v5402_v5 = vsel %vm197_vm2, %v12021_v56, %v5395_v43  ;;  %v12175_v40 = vpop.permute.xlu0 %5396 }
 0x262   :  { %v5403_v9 = vsel %vm197_vm2, %v5395_v43, %v12175_v40  ;;  %v10486_v25 = vpack.c.bf16 %v5402_v5, %v5373_v62 }
 0x263   :  { %v10484_v32 = vpack.c.bf16 %v5403_v9, %v5374_v8 }
 0x264   :  { %v5424_v2 = vpop.permute.xlu1 %5423 }
 0x265   :  { %v5431_v21 = vsel %vm243_vm3, %v12041_v26, %v5424_v2  ;;  %v12181_v63 = vpop.permute.xlu0 %5425  ;;  %10485 = vmatprep.subr.bf16.mxu0 %v10484_v32 }
 0x266   :  { %v5432_v53 = vsel %vm243_vm3, %v5424_v2, %v12181_v63  ;;  %10487 = vmatpush1.bf16.msra.mxu0 %v10486_v25  ;;  %v5567_v25 = vld [vmem:[#allocation2 + $0x28] sm:$0xff] }
 0x268   :  { %v5453_v51 = vpop.permute.xlu1 %5452 }
 0x269   :  { %v5460_v56 = vsel %vm289_vm4, %v12049_v15, %v5453_v51  ;;  %v12187_v4 = vpop.permute.xlu0 %5454 }
 0x26a   :  { %v5461_v45 = vsel %vm289_vm4, %v5453_v51, %v12187_v4  ;;  %v10490_v0 = vpack.c.bf16 %v5460_v56, %v5431_v21 }
 0x26b   :  { %v10488_v14 = vpack.c.bf16 %v5461_v45, %v5432_v53 }
 0x26c   :  { %v705_v58 = vpop.permute.xlu1 %704 }
 0x26d   :  { %v12191_v26 = vpop.permute.xlu0 %706  ;;  %10489 = vmatprep.subr.bf16.mxu0 %v10488_v14  ;;  %v712_v60 = vsel %vm446_vm7, %v12075_v33, %v705_v58 }
 0x26e   :  { %v713_v30 = vsel %vm446_vm7, %v705_v58, %v12191_v26  ;;  %10491 = vmatpush1.bf16.msra.mxu0 %v10490_v0 }
 0x26f   :  { %890 = vmatprep.subr.mxu1 %v713_v30 }
 0x270   :  { %v506_v15 = vpop.permute.xlu1 %505  ;;  %891 = vmatpush1.msra.mxu1 %v712_v60 }
 0x271   :  { %523 = vst.msk [vmem:[#allocation2 + $0x58] sm:$0xff] %vm487_vm8, %v506_v15  ;;  %v5482_v48 = vpop.permute.xlu0 %5481  ;;  %9741 = vmatmul.mubr.msk.f32.vlgmr.msra.gmra.mrb[4].mxu1 %vm344_vm5, %v12086_v61  ;;  %v511_v55 = vsel %vm105_vm0, %v12063_v38, %v506_v15 }
 0x272   :  { %v5489_v39 = vsel %vm344_vm5, %v12093_v59, %v5482_v48  ;;  %944 = vmatprep.mubr.f32.mxu1 %v10982_v31  ;;  %v10242_v18 = vpack.c.bf16 %v511_v55, %v11840_v27  ;;  %v1041_v55 = vld [vmem:[%s13578_s5 + $0x8] sm:$0xff] }
 0x274   :  { %v12203_v12 = vpop.permute.xlu1 %5483 }
 0x275   :  { %v5490_v52 = vsel %vm344_vm5, %v5482_v48, %v12203_v12  ;;  %v5511_v33 = vpop.permute.xlu0 %5510  ;;  %9742 = vmatmul.mubr.msk.f32.gmra.mrb[6].mxu1 %vm344_vm5, %v12099_v37 }
 0x276   :  { %v5518_v50 = vsel %vm395_vm6, %v12105_v44, %v5511_v33  ;;  %1015 = vmatprep.mubr.f32.mxu1 %v10982_v31 }
 0x277   :  { %v10494_v44 = vpack.c.bf16 %v5518_v50, %v5489_v39 }
 0x278   :  { %v12214_v59 = vpop.permute.xlu1 %5512  ;;  %v738_v13 = vld [vmem:[#allocation2 + $0x58] sm:$0xff] }
 0x279   :  { %v5519_v24 = vsel %vm395_vm6, %v5511_v33, %v12214_v59  ;;  %v535_v10 = vpop.permute.xlu0 %534  ;;  %v10240_v41 = vpack.c.bf16 %v738_v13, %v11908_v1  ;;  %v1047_v13 = vld [vmem:[%s13578_s5 + $0x38] sm:$0x3] }
 0x27a   :  { %552 = vst.msk [vmem:[#allocation2 + $0x88] sm:$0xff] %vm487_vm8, %v535_v10  ;;  %v10492_v36 = vpack.c.bf16 %v5519_v24, %v5490_v52  ;;  %v540_v38 = vsel %vm151_vm1, %v12112_v46, %v535_v10 }
 0x27b   :  { %10241 = vmatprep.subr.bf16.mxu1 %v10240_v41 }
 0x27c   :  { %v564_v7 = vpop.permute.xlu1 %563  ;;  %10243 = vmatpush1.bf16.msra.mxu1 %v10242_v18  ;;  %10493 = vmatprep.subr.bf16.mxu0 %v10492_v36 }
 0x27d   :  { %v569_v29 = vsel %vm197_vm2, %v12116_v17, %v564_v7  ;;  %581 = vst.msk [vmem:[#allocation2 + $0xb8] sm:$0xff] %vm487_vm8, %v564_v7  ;;  %v5540_v11 = vpop.permute.xlu0 %5539  ;;  %10495 = vmatpush1.bf16.msra.mxu0 %v10494_v44  ;;  %v10256_v44 = vpack.c.bf16 %v1047_v13, %v1041_v55 }
 0x27e   :  { %v5547_v1 = vsel %vm446_vm7, %v12142_v54, %v5540_v11  ;;  %v10246_v27 = vpack.c.bf16 %v569_v29, %v540_v38  ;;  %v1046_v29 = vld [vmem:[%s13578_s5 + $0x30] sm:$0x3] }
 0x280   :  { %v12228_v22 = vpop.permute.xlu1 %5541 }
 0x281   :  { %v5548_v57 = vsel %vm446_vm7, %v5540_v11, %v12228_v22  ;;  %v593_v20 = vpop.permute.xlu0 %592  ;;  %v744_v17 = vld [vmem:[#allocation2 + $0x88] sm:$0xff] }
 0x282   :  { %610 = vst.msk [vmem:[#allocation2 + $0xe8] sm:$0xff] %vm487_vm8, %v593_v20  ;;  %5709 = vmatprep.subr.mxu0 %v5548_v57  ;;  %v598_v54 = vsel %vm243_vm3, %v12124_v16, %v593_v20  ;;  %v5866_v57 = vld [vmem:[%s13578_s5 + $0x38] sm:$0x3] }
 0x283   :  { %5710 = vmatpush1.msra.mxu0 %v5547_v1 }
 0x284   :  { %v622_v46 = vpop.permute.xlu1 %621  ;;  %v750_v34 = vld [vmem:[#allocation2 + $0xb8] sm:$0xff]  ;;  %9976 = vmatmul.mubr.msk.f32.vlgmr.msra.gmra.mrb[4].mxu0 %vm344_vm5, %v12086_v61 }
 0x285   :  { %v627_v3 = vsel %vm289_vm4, %v12128_v6, %v622_v46  ;;  %639 = vst.msk [vmem:[#allocation2 + $0x118] sm:$0xff] %vm487_vm8, %v622_v46  ;;  %v5341_v35 = vpop.permute.xlu0 %5340  ;;  %v10244_v49 = vpack.c.bf16 %v750_v34, %v744_v17  ;;  %5763 = vmatprep.mubr.f32.mxu0 %v10982_v31  ;;  %v10512_v46 = vpack.c.bf16 %v5866_v57, %v1041_v55  ;;  %v5865_v17 = vld [vmem:[%s13578_s5 + $0x30] sm:$0x3] }
 0x286   :  { %v5346_v62 = vsel %vm105_vm0, %v12138_v42, %v5341_v35  ;;  %5358 = vst.msk [vmem:[#allocation2 + $0x58] sm:$0xff] %vm487_vm8, %v5341_v35  ;;  %v10250_v8 = vpack.c.bf16 %v627_v3, %v598_v54  ;;  %v1043_v54 = vld [vmem:[%s13578_s5 + $0x18] sm:$0xff] }
 0x287   :  { %10245 = vmatprep.subr.bf16.mxu1 %v10244_v49  ;;  %v10498_v56 = vpack.c.bf16 %v5346_v62, %v11870_v19 }
 0x288   :  { %v651_v43 = vpop.permute.xlu1 %650  ;;  %10247 = vmatpush1.bf16.msra.mxu1 %v10246_v27  ;;  %9977 = vmatmul.mubr.msk.f32.gmra.mrb[6].mxu0 %vm344_vm5, %v12099_v37 }
 0x289   :  { %668 = vst.msk [vmem:[#allocation2 + $0x148] sm:$0xff] %vm487_vm8, %v651_v43  ;;  %v680_v16 = vpop.permute.xlu0 %679  ;;  %5834 = vmatprep.mubr.f32.mxu0 %v10982_v31  ;;  %v756_v5 = vld [vmem:[#allocation2 + $0xe8] sm:$0xff]  ;;  %v656_v45 = vsel %vm344_vm5, %v12151_v23, %v651_v43  ;;  %v1042_v43 = vld [vmem:[%s13578_s5 + $0x10] sm:$0xff] }
 0x28a   :  { %697 = vst.msk [vmem:[#allocation2 + $0x178] sm:$0xff] %vm487_vm8, %v680_v16 }
 0x28c   :  { %v5370_v6 = vpop.permute.xlu1 %5369  ;;  %v762_v9 = vld [vmem:[#allocation2 + $0x118] sm:$0xff] }
 0x28d   :  { %v5375_v42 = vsel %vm151_vm1, %v12169_v47, %v5370_v6  ;;  %5387 = vst.msk [vmem:[#allocation2 + $0x88] sm:$0xff] %vm487_vm8, %v5370_v6  ;;  %v5399_v32 = vpop.permute.xlu0 %5398  ;;  %v10248_v2 = vpack.c.bf16 %v762_v9, %v756_v5  ;;  %v5573_v21 = vld [vmem:[#allocation2 + $0x58] sm:$0xff]  ;;  %v685_v47 = vsel %vm395_vm6, %v12158_v28, %v680_v16  ;;  %v1048_v16 = vld [vmem:[%s13578_s5 + $0x40] sm:$0x3]  ;;  %v1045_v5 = vld [vmem:[%s13578_s5 + $0x28] sm:$0xff] }
 0x28e   :  { %v5404_v53 = vsel %vm197_vm2, %v12175_v40, %v5399_v32  ;;  %5416 = vst.msk [vmem:[#allocation2 + $0xb8] sm:$0xff] %vm487_vm8, %v5399_v32  ;;  %v10496_v51 = vpack.c.bf16 %v5573_v21, %v5567_v25  ;;  %v10254_v60 = vpack.c.bf16 %v685_v47, %v656_v45  ;;  %v1051_v9 = vld [vmem:[%s13578_s5 + $0x58] sm:$0x3] }
 0x28f   :  { %10249 = vmatprep.subr.bf16.mxu1 %v10248_v2  ;;  %v10502_v33 = vpack.c.bf16 %v5404_v53, %v5375_v42  ;;  %v10262_v2 = vpack.c.bf16 %v1048_v16, %v1042_v43  ;;  %v10264_v53 = vpack.c.bf16 %v1051_v9, %v1045_v5 }
 0x290   :  { %v5428_v14 = vpop.permute.xlu1 %5427  ;;  %10251 = vmatpush1.bf16.msra.mxu1 %v10250_v8  ;;  %10497 = vmatprep.subr.bf16.mxu0 %v10496_v51  ;;  %v768_v58 = vld [vmem:[#allocation2 + $0x148] sm:$0xff] }
 0x291   :  { %v5433_v0 = vsel %vm243_vm3, %v12181_v63, %v5428_v14  ;;  %5445 = vst.msk [vmem:[#allocation2 + $0xe8] sm:$0xff] %vm487_vm8, %v5428_v14  ;;  %10499 = vmatpush1.bf16.msra.mxu0 %v10498_v56  ;;  %v5457_v40 = vpop.permute.xlu0 %5456  ;;  %v774_v30 = vld [vmem:[#allocation2 + $0x178] sm:$0xff]  ;;  %v5867_v14 = vld [vmem:[%s13578_s5 + $0x40] sm:$0x3] }
 0x292   :  { %v5462_v19 = vsel %vm289_vm4, %v12187_v4, %v5457_v40  ;;  %5474 = vst.msk [vmem:[#allocation2 + $0x118] sm:$0xff] %vm487_vm8, %v5457_v40  ;;  %v10252_v23 = vpack.c.bf16 %v774_v30, %v768_v58  ;;  %v33_v51 = vld [vmem:[%s13579_s6] sm:$0x1] }
 0x293   :  { %v10506_v36 = vpack.c.bf16 %v5462_v19, %v5433_v0  ;;  %v5870_v0 = vld [vmem:[%s13578_s5 + $0x58] sm:$0x3]  ;;  %v10518_v19 = vpack.c.bf16 %v5867_v14, %v1042_v43 }
 0x294   :  { %v709_v28 = vpop.permute.xlu1 %708  ;;  %10253 = vmatprep.subr.bf16.mxu1 %v10252_v23  ;;  %v5579_v15 = vld [vmem:[#allocation2 + $0x88] sm:$0xff] }
 0x295   :  { %726 = vst.msk [vmem:[#allocation2 + $0x1a8] sm:$0xff] %vm487_vm8, %v709_v28  ;;  %10255 = vmatpush1.bf16.msra.mxu1 %v10254_v60  ;;  %v5486_v48 = vpop.permute.xlu0 %5485  ;;  %v5585_v63 = vld [vmem:[#allocation2 + $0xb8] sm:$0xff]  ;;  %v714_v38 = vsel %vm446_vm7, %v12191_v26, %v709_v28  ;;  %v10520_v28 = vpack.c.bf16 %v5870_v0, %v1045_v5  ;;  %v9756_v5 = vld [vmem:[%s13578_s5 + $0xa0] sm:$0x3] }
 0x296   :  { %v5491_v39 = vsel %vm344_vm5, %v12203_v12, %v5486_v48  ;;  %5503 = vst.msk [vmem:[#allocation2 + $0x148] sm:$0xff] %vm487_vm8, %v5486_v48  ;;  %v10500_v52 = vpack.c.bf16 %v5585_v63, %v5579_v15 }
 0x298   :  { %v5515_v4 = vpop.permute.xlu1 %5514  ;;  %10501 = vmatprep.subr.bf16.mxu0 %v10500_v52  ;;  %v5591_v50 = vld [vmem:[#allocation2 + $0xe8] sm:$0xff]  ;;  %v1050_v52 = vld [vmem:[%s13578_s5 + $0x50] sm:$0x3] }
 0x299   :  { %v5520_v24 = vsel %vm395_vm6, %v12214_v59, %v5515_v4  ;;  %5532 = vst.msk [vmem:[#allocation2 + $0x178] sm:$0xff] %vm487_vm8, %v5515_v4  ;;  %10503 = vmatpush1.bf16.msra.mxu0 %v10502_v33  ;;  %v5544_v12 = vpop.permute.xlu0 %5543  ;;  %v5597_v10 = vld [vmem:[#allocation2 + $0x118] sm:$0xff]  ;;  %v1040_v59 = vld [vmem:[%s13578_s5] sm:$0xff]  ;;  %v9749_v4 = vld [vmem:[%s13578_s5 + $0x68] sm:$0xff] }
 0x29a   :  { %v5549_v41 = vsel %vm446_vm7, %v12228_v22, %v5544_v12  ;;  %v10504_v18 = vpack.c.bf16 %v5597_v10, %v5591_v50  ;;  %v10258_v27 = vpack.c.bf16 %v1046_v29, %v1040_v59  ;;  %v10510_v22 = vpack.c.bf16 %v5520_v24, %v5491_v39  ;;  %v1044_v39 = vld [vmem:[%s13578_s5 + $0x20] sm:$0xff]  ;;  %v9755_v50 = vld [vmem:[%s13578_s5 + $0x98] sm:$0x3] }
 0x29b   :  { %v10514_v34 = vpack.c.bf16 %v5865_v17, %v1040_v59  ;;  %v10267_v24 = vpack.c.bf16 %v1050_v52, %v1044_v39  ;;  %v9990_v59 = vld [vmem:[%s13578_s5 + $0x98] sm:$0x3]  ;;  %v9748_v17 = vld [vmem:[%s13578_s5 + $0x60] sm:$0xff] }
 0x29c   :  { %10505 = vmatprep.subr.bf16.mxu0 %v10504_v18  ;;  %v780_v7 = vld [vmem:[#allocation2 + $0x1a8] sm:$0xff] }
 0x29d   :  { %967 = vmatprep.subr.mxu1 %v780_v7  ;;  %5561 = vst.msk [vmem:[#allocation2 + $0x1a8] sm:$0xff] %vm487_vm8, %v5544_v12  ;;  %10507 = vmatpush1.bf16.msra.mxu0 %v10506_v36  ;;  %v5603_v26 = vld [vmem:[#allocation2 + $0x148] sm:$0xff]  ;;  %v5869_v7 = vld [vmem:[%s13578_s5 + $0x50] sm:$0x3] }
 0x29e   :  { %968 = vmatpush1.msra.mxu1 %v714_v38 }
 0x29f   :  { %9743 = vmatmul.mubr.msk.f32.vlgmr.msra.gmra.mrb[8].mxu1 %vm344_vm5, %v12086_v61  ;;  %10257 = vmatprep.subr.bf16.mxu1 %v10256_v44 }
 0x2a0   :  { %1021 = vmatprep.mubr.f32.mxu1 %v10982_v31  ;;  %v5609_v11 = vld [vmem:[#allocation2 + $0x178] sm:$0xff] }
 0x2a1   :  { %v10508_v1 = vpack.c.bf16 %v5609_v11, %v5603_v26  ;;  %v10523_v11 = vpack.c.bf16 %v5869_v7, %v1044_v39 }
 0x2a3   :  { %9744 = vmatmul.mubr.msk.f32.gmra.mrb[10].mxu1 %vm344_vm5, %v12099_v37  ;;  %10509 = vmatprep.subr.bf16.mxu0 %v10508_v1 }
 0x2a4   :  { %10511 = vmatpush1.bf16.msra.mxu0 %v10510_v22  ;;  %v5615_v20 = vld [vmem:[#allocation2 + $0x1a8] sm:$0xff]  ;;  %v10525_v22 = vpack.c.bf16 %v9990_v59, %v9749_v4  ;;  %v9994_v59 = vld [vmem:[%s13578_s5 + $0xb8] sm:$0x3] }
 0x2a5   :  { %5786 = vmatprep.subr.mxu0 %v5615_v20  ;;  %10259 = vmatpush1.bf16.xpose.msra.mxu1 %v10258_v27 }
 0x2a8   :  { %5787 = vmatpush1.msra.mxu0 %v5549_v41  ;;  %v10269_v41 = vpack.c.bf16 %v9755_v50, %v9749_v4  ;;  %v9752_v50 = vld [vmem:[%s13578_s5 + $0x80] sm:$0xff] }
 0x2a9   :  { %9978 = vmatmul.mubr.msk.f32.vlgmr.msra.gmra.mrb[8].mxu0 %vm344_vm5, %v12086_v61  ;;  %10513 = vmatprep.subr.bf16.mxu0 %v10512_v46  ;;  %v1049_v61 = vld [vmem:[%s13578_s5 + $0x48] sm:$0x3]  ;;  %v12315_v49 = vpop.permute.xlu1 %783 }
 0x2aa   :  { %5840 = vmatprep.mubr.f32.mxu0 %v10982_v31  ;;  %v10260_v3 = vpack.c.bf16 %v1049_v61, %v1043_v54  ;;  %v5868_v31 = vld [vmem:[%s13578_s5 + $0x48] sm:$0x3]  ;;  %v9751_v61 = vld [vmem:[%s13578_s5 + $0x78] sm:$0xff] }
 0x2ab   :  { %v10516_v35 = vpack.c.bf16 %v5868_v31, %v1043_v54 }
 0x2ac   :  { %10261 = vmatprep.subr.bf16.mxu1 %v10260_v3  ;;  %v9757_v3 = vld [vmem:[%s13578_s5 + $0xa8] sm:$0x3] }
 0x2ad   :  { %9979 = vmatmul.mubr.msk.f32.gmra.mrb[10].mxu0 %vm344_vm5, %v12099_v37  ;;  %v10273_v43 = vpack.c.bf16 %v9757_v3, %v9751_v61 }
 0x2af   :  { %10515 = vmatpush1.bf16.xpose.msra.mxu0 %v10514_v34  ;;  %v9754_v34 = vld [vmem:[%s13578_s5 + $0x90] sm:$0x3] }
 0x2b0   :  { %10517 = vmatprep.subr.bf16.mxu0 %v10516_v35 }
 0x302   :  { %v863_v37 = vpop.f32.mrb[0].mxu1 }
 0x303   :  { %v864_v62 = vadd.f32 %v863_v37, %v12315_v49  ;;  %v865_v8 = vpop.f32.mrb[1].mxu1  ;;  %v10271_v37 = vpack.c.bf16 %v9754_v34, %v9748_v17  ;;  %v9769_v34 = vld [vmem:[%s13578_s5 + $0xf0] sm:$0x3] }
 0x304   :  { %v866_v6 = vadd.f32 %v865_v8, %v12315_v49 }
 0x305   :  { %v12335_v25 = vmax.f32 %v864_v62, 0.0 }
 0x306   :  { %v12331_v42 = vmax.f32 %v866_v6, 0.0  ;;  %v12333_v32 = vpop.f32.mrb[2].mxu1  ;;  %v9750_v6 = vld [vmem:[%s13578_s5 + $0x70] sm:$0xff] }
 0x307   :  { %v12337_v21 = vpop.f32.mrb[3].mxu1  ;;  %v10275_v14 = vpack.c.bf16 %v9756_v5, %v9750_v6  ;;  %v1290_v0 = vrot.slane %v12335_v25, 1 }
 0x308   :  { %1125 = vmatprep.mubr.f32.mxu1 %v12331_v42  ;;  %v1291_v16 = vrot.slane %v12331_v42, 1  ;;  %v1534_v5 = vrot.slane %v12331_v42, 2 }
 0x309   :  { %1126 = vmatmul.mubr.f32.vlgmr.msra.gmra.mrb[12].mxu1 %v12335_v25 }
 0x30a   :  { %10263 = vmatpush1.bf16.xpose.msra.mxu1 %v10262_v2  ;;  %v9753_v2 = vld [vmem:[%s13578_s5 + $0x88] sm:$0xff] }
 0x30b   :  { %10266 = vmatprep.subr.msk.bf16.mxu1 %vm12342_vm9, %v10264_v53  ;;  %v9759_v53 = vld [vmem:[%s13578_s5 + $0xb8] sm:$0x3] }
 0x327   :  { %v5682_v56 = vpop.f32.mrb[0].mxu0 }
 0x328   :  { %v5683_v45 = vadd.f32 %v5682_v56, %v12315_v49  ;;  %v5684_v47 = vpop.f32.mrb[1].mxu0 }
 0x329   :  { %v5685_v58 = vadd.f32 %v5684_v47, %v12315_v49 }
 0x32a   :  { %v12361_v23 = vmax.f32 %v5683_v45, 0.0 }
 0x32b   :  { %v12357_v40 = vmax.f32 %v5685_v58, 0.0  ;;  %v12359_v30 = vpop.f32.mrb[2].mxu0  ;;  %v9989_v58 = vld [vmem:[%s13578_s5 + $0x90] sm:$0x3] }
 0x32c   :  { %v12363_v60 = vpop.f32.mrb[3].mxu0  ;;  %v10527_v39 = vpack.c.bf16 %v9989_v58, %v9748_v17  ;;  %v9763_v17 = vld [vmem:[%s13578_s5 + $0xc0] sm:$0xff]  ;;  %v9774_v58 = vld [vmem:[%s13578_s5 + $0x118] sm:$0x3] }
 0x32d   :  { %5944 = vmatprep.mubr.f32.mxu0 %v12357_v40  ;;  %v6109_v4 = vrot.slane %v12357_v40, 1  ;;  %v10284_v3 = vpack.c.bf16 %v9769_v34, %v9763_v17 }
 0x32e   :  { %5945 = vmatmul.mubr.f32.vlgmr.msra.gmra.mrb[12].mxu0 %v12361_v23 }
 0x32f   :  { %10519 = vmatpush1.bf16.xpose.msra.mxu0 %v10518_v19  ;;  %v10277_v19 = vpack.c.bf16 %v9759_v53, %v9753_v2 }
 0x330   :  { %10522 = vmatprep.subr.msk.bf16.mxu0 %vm12342_vm9, %v10520_v28  ;;  %v9992_v28 = vld [vmem:[%s13578_s5 + $0xa8] sm:$0x3] }
 0x344   :  { %v940_v15 = vpop.f32.mrb[4].mxu1 }
 0x345   :  { %v941_v48 = vadd.f32 %v940_v15, %v12315_v49  ;;  %v942_v63 = vpop.f32.mrb[5].mxu1 }
 0x346   :  { %v943_v33 = vadd.f32 %v942_v63, %v12315_v49 }
 0x347   :  { %v12387_v12 = vmax.f32 %v941_v48, 0.0 }
 0x348   :  { %v12383_v55 = vmax.f32 %v943_v33, 0.0  ;;  %v12385_v13 = vpop.f32.mrb[6].mxu1  ;;  %v10529_v33 = vpack.c.bf16 %v9992_v28, %v9751_v61  ;;  %v9772_v61 = vld [vmem:[%s13578_s5 + $0x108] sm:$0x3]  ;;  %v1533_v28 = vrot.slane %v12335_v25, 2 }
 0x349   :  { %v12389_v10 = vpop.f32.mrb[7].mxu1  ;;  %v1292_v7 = vrot.slane %v12387_v12, 1 }
 0x34a   :  { %1195 = vmatprep.mubr.f32.mxu1 %v12383_v55  ;;  %v1293_v63 = vrot.slane %v12383_v55, 1 }
 0x34b   :  { %1196 = vmatmul.mubr.f32.vlgmr.msra.gmra.mrb[12].mxu1 %v12387_v12 }
 0x34c   :  { %10268 = vmatpush1.bf16.xpose.msra.mxu1 %v10267_v24  ;;  %v9758_v24 = vld [vmem:[%s13578_s5 + $0xb0] sm:$0x3] }
 0x34d   :  { %10270 = vmatprep.subr.bf16.mxu1 %v10269_v41  ;;  %v9764_v41 = vld [vmem:[%s13578_s5 + $0xc8] sm:$0xff] }
 0x357   :  { %v5759_v18 = vpop.f32.mrb[4].mxu0 }
 0x358   :  { %v5760_v36 = vadd.f32 %v5759_v18, %v12315_v49  ;;  %v5761_v44 = vpop.f32.mrb[5].mxu0  ;;  %v9770_v18 = vld [vmem:[%s13578_s5 + $0xf8] sm:$0x3] }
 0x359   :  { %v5762_v38 = vadd.f32 %v5761_v44, %v12315_v49  ;;  %v9991_v44 = vld [vmem:[%s13578_s5 + $0xa0] sm:$0x3] }
 0x35a   :  { %v12405_v1 = vmax.f32 %v5760_v36, 0.0  ;;  %v10280_v36 = vpack.c.bf16 %v9758_v24, %v9752_v50 }
 0x35b   :  { %v12401_v29 = vmax.f32 %v5762_v38, 0.0  ;;  %v12403_v26 = vpop.f32.mrb[6].mxu0  ;;  %v10282_v38 = vpack.c.bf16 %v9770_v18, %v9764_v41  ;;  %v9767_v18 = vld [vmem:[%s13578_s5 + $0xe0] sm:$0xff] }
 0x35c   :  { %v12407_v27 = vpop.f32.mrb[7].mxu0 }
 0x35d   :  { %6014 = vmatprep.mubr.f32.mxu0 %v12401_v29 }
 0x35e   :  { %6015 = vmatmul.mubr.f32.vlgmr.msra.gmra.mrb[12].mxu0 %v12405_v1 }
 0x35f   :  { %10524 = vmatpush1.bf16.xpose.msra.mxu0 %v10523_v11 }
 0x360   :  { %10526 = vmatprep.subr.bf16.mxu0 %v10525_v22  ;;  %v10531_v22 = vpack.c.bf16 %v9991_v44, %v9750_v6  ;;  %v10005_v6 = vld [vmem:[%s13578_s5 + $0xf8] sm:$0x3]  ;;  %v9779_v44 = vld [vmem:[%s13578_s5 + $0x128] sm:$0xff] }
 0x361   :  { %v10538_v53 = vpack.c.bf16 %v10005_v6, %v9764_v41  ;;  %v6351_v41 = vrot.slane %v12357_v40, 2  ;;  %v10008_v6 = vld [vmem:[%s13578_s5 + $0x110] sm:$0x3] }
 0x372   :  { %v1017_v57 = vpop.f32.mrb[8].mxu1 }
 0x373   :  { %v1018_v20 = vadd.f32 %v1017_v57, %v12315_v49  ;;  %v1019_v46 = vpop.f32.mrb[9].mxu1  ;;  %v6108_v57 = vrot.slane %v12361_v23, 1 }
 0x374   :  { %v1020_v54 = vadd.f32 %v1019_v46, %v12315_v49  ;;  %v6111_v46 = vrot.slane %v12401_v29, 1 }
 0x375   :  { %v12429_v62 = vmax.f32 %v1018_v20, 0.0  ;;  %v10533_v20 = vpack.c.bf16 %v9994_v59, %v9753_v2  ;;  %v6110_v2 = vrot.slane %v12405_v1, 1  ;;  %v10006_v59 = vld [vmem:[%s13578_s5 + $0x100] sm:$0x3] }
 0x376   :  { %v12425_v31 = vmax.f32 %v1020_v54, 0.0  ;;  %v12427_v35 = vpop.f32.mrb[10].mxu1  ;;  %v9766_v54 = vld [vmem:[%s13578_s5 + $0xd8] sm:$0xff] }
 0x377   :  { %v12431_v8 = vpop.f32.mrb[11].mxu1 }
 0x378   :  { %9747 = vmatprep.mubr.msk.f32.mxu1 %vm487_vm8, %v12425_v31  ;;  %v1295_v11 = vrot.slane %v12425_v31, 1 }
 0x379   :  { %1266 = vmatmul.mubr.f32.vlgmr.msra.gmra.mrb[12].mxu1 %v12429_v62 }
 0x37a   :  { %10272 = vmatpush1.bf16.xpose.msra.mxu1 %v10271_v37  ;;  %1373 = vmatprep.mubr.f32.mxu1 %v1291_v16  ;;  %v9993_v37 = vld [vmem:[%s13578_s5 + $0xb0] sm:$0x3]  ;;  %v10286_v16 = vpack.c.bf16 %v9772_v61, %v9766_v54  ;;  %v9778_v61 = vld [vmem:[%s13578_s5 + $0x120] sm:$0xff] }
 0x37b   :  { %10274 = vmatprep.subr.bf16.mxu1 %v10273_v43  ;;  %v1294_v43 = vrot.slane %v12429_v62, 1 }
 0x37c   :  { %v5836_v9 = vpop.f32.mrb[8].mxu0 }
 0x37d   :  { %v5838_v56 = vpop.f32.mrb[9].mxu0  ;;  %v5837_v45 = vadd.f32 %v5836_v9, %v12315_v49  ;;  %v10536_v9 = vpack.c.bf16 %v9993_v37, %v9752_v50  ;;  %v9781_v37 = vld [vmem:[%s13578_s5 + $0x138] sm:$0xff] }
 0x37e   :  { %v5839_v47 = vadd.f32 %v5838_v56, %v12315_v49 }
 0x37f   :  { %v12465_v52 = vmax.f32 %v5837_v45, 0.0  ;;  %v9765_v45 = vld [vmem:[%s13578_s5 + $0xd0] sm:$0xff] }
 0x380   :  { %v12458_v15 = vmax.f32 %v5839_v47, 0.0  ;;  %v12460_v48 = vpop.f32.mrb[10].mxu0  ;;  %v9771_v47 = vld [vmem:[%s13578_s5 + $0x100] sm:$0x3] }
 0x381   :  { %1374 = vmatmul.mubr.f32.vlgmr.msra.gmra.mrb[12].mxu1 %v1290_v0  ;;  %v12463_v49 = vpop.f32.mrb[11].mxu0  ;;  %v10288_v0 = vpack.c.bf16 %v9771_v47, %v9765_v45  ;;  %v6112_v50 = vrot.slane %v12465_v52, 1 }
 0x382   :  { %10276 = vmatpush1.bf16.xpose.msra.mxu1 %v10275_v14  ;;  %1443 = vmatprep.mubr.f32.mxu1 %v1293_v63  ;;  %v6113_v56 = vrot.slane %v12458_v15, 1  ;;  %v9768_v14 = vld [vmem:[%s13578_s5 + $0xe8] sm:$0xff] }
 0x383   :  { %9982 = vmatprep.mubr.msk.f32.mxu0 %vm487_vm8, %v12458_v15  ;;  %10279 = vmatprep.subr.msk.bf16.mxu1 %vm12342_vm9, %v10277_v19  ;;  %v10004_v19 = vld [vmem:[%s13578_s5 + $0xf0] sm:$0x3]  ;;  %v10290_v63 = vpack.c.bf16 %v9774_v58, %v9768_v14 }
 0x384   :  { %6085 = vmatmul.mubr.f32.vlgmr.msra.gmra.mrb[12].mxu0 %v12465_v52  ;;  %v9780_v58 = vld [vmem:[%s13578_s5 + $0x130] sm:$0xff] }
 0x385   :  { %10528 = vmatpush1.bf16.xpose.msra.mxu0 %v10527_v39  ;;  %6191 = vmatprep.mubr.f32.mxu0 %v6109_v4  ;;  %v10007_v39 = vld [vmem:[%s13578_s5 + $0x108] sm:$0x3]  ;;  %v10540_v4 = vpack.c.bf16 %v10004_v19, %v9763_v17  ;;  %v6350_v17 = vrot.slane %v12361_v23, 2 }
 0x386   :  { %10530 = vmatprep.subr.bf16.mxu0 %v10529_v33  ;;  %v1536_v33 = vrot.slane %v12383_v55, 2  ;;  %v10542_v24 = vpack.c.bf16 %v10007_v39, %v9766_v54  ;;  %v6353_v54 = vrot.slane %v12401_v29, 2  ;;  %v9783_v19 = vld [vmem:[%s13578_s5 + $0x148] sm:$0xff]  ;;  %v10019_v39 = vld [vmem:[%s13578_s5 + $0x150] sm:$0x3] }
 0x389   :  { %1444 = vmatmul.mubr.f32.vlgmr.msra.gmra.mrb[12].mxu1 %v1292_v7  ;;  %v9785_v7 = vld [vmem:[%s13578_s5 + $0x158] sm:$0x3] }
 0x38a   :  { %10281 = vmatpush1.bf16.xpose.msra.mxu1 %v10280_v36  ;;  %9762 = vmatprep.mubr.msk.f32.mxu1 %vm487_vm8, %v1295_v11  ;;  %v9773_v36 = vld [vmem:[%s13578_s5 + $0x110] sm:$0x3]  ;;  %v1535_v11 = vrot.slane %v12387_v12, 2 }
 0x38b   :  { %10283 = vmatprep.subr.bf16.mxu1 %v10282_v38  ;;  %v10293_v38 = vpack.c.bf16 %v9773_v36, %v9767_v18 }
 0x38c   :  { %6192 = vmatmul.mubr.f32.vlgmr.msra.gmra.mrb[12].mxu0 %v6108_v57  ;;  %v10009_v57 = vld [vmem:[%s13578_s5 + $0x118] sm:$0x3] }
 0x38d   :  { %10532 = vmatpush1.bf16.xpose.msra.mxu0 %v10531_v22  ;;  %6261 = vmatprep.mubr.f32.mxu0 %v6111_v46  ;;  %v10295_v22 = vpack.c.bf16 %v9785_v7, %v9779_v44  ;;  %v10544_v46 = vpack.c.bf16 %v10006_v59, %v9765_v45  ;;  %v10546_v34 = vpack.c.bf16 %v10009_v57, %v9768_v14  ;;  %v6352_v45 = vrot.slane %v12405_v1, 2  ;;  %v9782_v7 = vld [vmem:[%s13578_s5 + $0x140] sm:$0xff]  ;;  %v9794_v59 = vld [vmem:[%s13578_s5 + $0x188] sm:$0xff] }
 0x38e   :  { %10535 = vmatprep.subr.msk.bf16.mxu0 %vm12342_vm9, %v10533_v20  ;;  %v1538_v20 = vrot.slane %v12425_v31, 2  ;;  %v6355_v14 = vrot.slane %v12458_v15, 2  ;;  %v10021_v57 = vld [vmem:[%s13578_s5 + $0x160] sm:$0x3] }
 0x391   :  { %1514 = vmatmul.mubr.f32.vlgmr.msra.gmra.mrb[12].mxu1 %v1294_v43  ;;  %v9787_v43 = vld [vmem:[%s13578_s5 + $0x168] sm:$0x3] }
 0x392   :  { %10285 = vmatpush1.bf16.xpose.msra.mxu1 %v10284_v3  ;;  %1616 = vmatprep.mubr.f32.mxu1 %v1534_v5  ;;  %v9784_v3 = vld [vmem:[%s13578_s5 + $0x150] sm:$0x3]  ;;  %v1537_v5 = vrot.slane %v12429_v62, 2 }
 0x393   :  { %10287 = vmatprep.subr.bf16.mxu1 %v10286_v16  ;;  %v10297_v16 = vpack.c.bf16 %v9784_v3, %v9778_v61 }
 0x394   :  { %6262 = vmatmul.mubr.f32.vlgmr.msra.gmra.mrb[12].mxu0 %v6110_v2  ;;  %v10020_v2 = vld [vmem:[%s13578_s5 + $0x158] sm:$0x3] }
 0x395   :  { %10537 = vmatpush1.bf16.xpose.msra.mxu0 %v10536_v9  ;;  %9997 = vmatprep.mubr.msk.f32.mxu0 %vm487_vm8, %v6113_v56  ;;  %v10299_v9 = vpack.c.bf16 %v9787_v43, %v9781_v37  ;;  %v10549_v56 = vpack.c.bf16 %v10008_v6, %v9767_v18  ;;  %v10551_v47 = vpack.c.bf16 %v10020_v2, %v9779_v44  ;;  %v6354_v18 = vrot.slane %v12465_v52, 2  ;;  %v9793_v43 = vld [vmem:[%s13578_s5 + $0x180] sm:$0xff]  ;;  %v9796_v6 = vld [vmem:[%s13578_s5 + $0x198] sm:$0xff]  ;;  %v10023_v2 = vld [vmem:[%s13578_s5 + $0x170] sm:$0x3] }
 0x396   :  { %10539 = vmatprep.subr.bf16.mxu0 %v10538_v53  ;;  %v1777_v53 = vrot.slane %v12331_v42, 3  ;;  %v6593_v44 = vrot.slane %v12357_v40, 3 }
 0x399   :  { %1617 = vmatmul.mubr.f32.vlgmr.msra.gmra.mrb[12].mxu1 %v1533_v28  ;;  %v9789_v28 = vld [vmem:[%s13578_s5 + $0x178] sm:$0x3] }
 0x39a   :  { %10289 = vmatpush1.bf16.xpose.msra.mxu1 %v10288_v0  ;;  %1686 = vmatprep.mubr.f32.mxu1 %v1536_v33  ;;  %v9786_v0 = vld [vmem:[%s13578_s5 + $0x160] sm:$0x3]  ;;  %v1776_v33 = vrot.slane %v12335_v25, 3 }
 0x39b   :  { %10292 = vmatprep.subr.msk.bf16.mxu1 %vm12342_vm9, %v10290_v63  ;;  %v10301_v63 = vpack.c.bf16 %v9786_v0, %v9780_v58 }
 0x39c   :  { %6332 = vmatmul.mubr.f32.vlgmr.msra.gmra.mrb[12].mxu0 %v6112_v50  ;;  %v10022_v50 = vld [vmem:[%s13578_s5 + $0x168] sm:$0x3] }
 0x39d   :  { %10541 = vmatpush1.bf16.xpose.msra.mxu0 %v10540_v4  ;;  %6433 = vmatprep.mubr.f32.mxu0 %v6351_v41  ;;  %v10303_v4 = vpack.c.bf16 %v9789_v28, %v9783_v19  ;;  %v10553_v41 = vpack.c.bf16 %v10019_v39, %v9778_v61  ;;  %v10555_v36 = vpack.c.bf16 %v10022_v50, %v9781_v37  ;;  %v6592_v61 = vrot.slane %v12361_v23, 3  ;;  %v9795_v28 = vld [vmem:[%s13578_s5 + $0x190] sm:$0xff]  ;;  %v9798_v39 = vld [vmem:[%s13578_s5 + $0x1a8] sm:$0xff] }
 0x39e   :  { %10543 = vmatprep.subr.bf16.mxu0 %v10542_v24  ;;  %v1779_v24 = vrot.slane %v12383_v55, 3  ;;  %v6595_v37 = vrot.slane %v12401_v29, 3  ;;  %v10034_v50 = vld [vmem:[%s13578_s5 + $0x1b0] sm:$0x3] }
 0x3a1   :  { %1687 = vmatmul.mubr.f32.vlgmr.msra.gmra.mrb[12].mxu1 %v1535_v11  ;;  %v9800_v11 = vld [vmem:[%s13578_s5 + $0x1b8] sm:$0x3] }
 0x3a2   :  { %10294 = vmatpush1.bf16.xpose.msra.mxu1 %v10293_v38  ;;  %9777 = vmatprep.mubr.msk.f32.mxu1 %vm487_vm8, %v1538_v20  ;;  %v9788_v38 = vld [vmem:[%s13578_s5 + $0x170] sm:$0x3]  ;;  %v1778_v20 = vrot.slane %v12387_v12, 3 }
 0x3a3   :  { %10296 = vmatprep.subr.bf16.mxu1 %v10295_v22  ;;  %v10306_v22 = vpack.c.bf16 %v9788_v38, %v9782_v7 }
 0x3a4   :  { %6434 = vmatmul.mubr.f32.vlgmr.msra.gmra.mrb[12].mxu0 %v6350_v17  ;;  %v10024_v17 = vld [vmem:[%s13578_s5 + $0x178] sm:$0x3] }
 0x3a5   :  { %10545 = vmatpush1.bf16.xpose.msra.mxu0 %v10544_v46  ;;  %6503 = vmatprep.mubr.f32.mxu0 %v6353_v54  ;;  %v10308_v46 = vpack.c.bf16 %v9800_v11, %v9794_v59  ;;  %v10557_v54 = vpack.c.bf16 %v10021_v57, %v9780_v58  ;;  %v10559_v3 = vpack.c.bf16 %v10024_v17, %v9783_v19  ;;  %v6594_v58 = vrot.slane %v12405_v1, 3  ;;  %v9797_v11 = vld [vmem:[%s13578_s5 + $0x1a0] sm:$0xff]  ;;  %v9809_v57 = vld [vmem:[%s13578_s5 + $0x1e8] sm:$0xff] }
 0x3a6   :  { %10548 = vmatprep.subr.msk.bf16.mxu0 %vm12342_vm9, %v10546_v34  ;;  %v1781_v34 = vrot.slane %v12425_v31, 3  ;;  %v6597_v19 = vrot.slane %v12458_v15, 3  ;;  %v10036_v17 = vld [vmem:[%s13578_s5 + $0x1c0] sm:$0x3] }
 0x3a9   :  { %1757 = vmatmul.mubr.f32.vlgmr.msra.gmra.mrb[12].mxu1 %v1537_v5  ;;  %v9802_v5 = vld [vmem:[%s13578_s5 + $0x1c8] sm:$0x3] }
 0x3aa   :  { %10298 = vmatpush1.bf16.xpose.msra.mxu1 %v10297_v16  ;;  %1859 = vmatprep.mubr.f32.mxu1 %v1777_v53  ;;  %v9799_v16 = vld [vmem:[%s13578_s5 + $0x1b0] sm:$0x3]  ;;  %v1780_v53 = vrot.slane %v12429_v62, 3 }
 0x3ab   :  { %10300 = vmatprep.subr.bf16.mxu1 %v10299_v9  ;;  %v10310_v9 = vpack.c.bf16 %v9799_v16, %v9793_v43 }
 0x3ac   :  { %6504 = vmatmul.mubr.f32.vlgmr.msra.gmra.mrb[12].mxu0 %v6352_v45  ;;  %v10035_v45 = vld [vmem:[%s13578_s5 + $0x1b8] sm:$0x3] }
 0x3ad   :  { %10550 = vmatpush1.bf16.xpose.msra.mxu0 %v10549_v56  ;;  %10012 = vmatprep.mubr.msk.f32.mxu0 %vm487_vm8, %v6355_v14  ;;  %v10312_v56 = vpack.c.bf16 %v9802_v5, %v9796_v6  ;;  %v10562_v14 = vpack.c.bf16 %v10023_v2, %v9782_v7  ;;  %v10564_v0 = vpack.c.bf16 %v10035_v45, %v9794_v59  ;;  %v6596_v7 = vrot.slane %v12465_v52, 3  ;;  %v9808_v5 = vld [vmem:[%s13578_s5 + $0x1e0] sm:$0xff]  ;;  %v9811_v2 = vld [vmem:[%s13578_s5 + $0x1f8] sm:$0xff]  ;;  %v10038_v45 = vld [vmem:[%s13578_s5 + $0x1d0] sm:$0x3] }
 0x3ae   :  { %10552 = vmatprep.subr.bf16.mxu0 %v10551_v47  ;;  %v2020_v47 = vrot.slane %v12331_v42, 4  ;;  %v6835_v59 = vrot.slane %v12357_v40, 4 }
 0x3b1   :  { %1860 = vmatmul.mubr.f32.vlgmr.msra.gmra.mrb[12].mxu1 %v1776_v33  ;;  %v9804_v33 = vld [vmem:[%s13578_s5 + $0x1d8] sm:$0x3] }
 0x3b2   :  { %10302 = vmatpush1.bf16.xpose.msra.mxu1 %v10301_v63  ;;  %1929 = vmatprep.mubr.f32.mxu1 %v1779_v24  ;;  %v9801_v63 = vld [vmem:[%s13578_s5 + $0x1c0] sm:$0x3]  ;;  %v2019_v24 = vrot.slane %v12335_v25, 4 }
 0x3b3   :  { %10305 = vmatprep.subr.msk.bf16.mxu1 %vm12342_vm9, %v10303_v4  ;;  %v10314_v4 = vpack.c.bf16 %v9801_v63, %v9795_v28 }
 0x3b4   :  { %6574 = vmatmul.mubr.f32.vlgmr.msra.gmra.mrb[12].mxu0 %v6354_v18  ;;  %v10037_v18 = vld [vmem:[%s13578_s5 + $0x1c8] sm:$0x3] }
 0x3b5   :  { %10554 = vmatpush1.bf16.xpose.msra.mxu0 %v10553_v41  ;;  %6675 = vmatprep.mubr.f32.mxu0 %v6593_v44  ;;  %v10316_v41 = vpack.c.bf16 %v9804_v33, %v9798_v39  ;;  %v10566_v44 = vpack.c.bf16 %v10034_v50, %v9793_v43  ;;  %v10568_v38 = vpack.c.bf16 %v10037_v18, %v9796_v6  ;;  %v6834_v43 = vrot.slane %v12361_v23, 4  ;;  %v9810_v33 = vld [vmem:[%s13578_s5 + $0x1f0] sm:$0xff]  ;;  %v9813_v50 = vld [vmem:[%s13578_s5 + $0x208] sm:$0xff] }
 0x3b6   :  { %10556 = vmatprep.subr.bf16.mxu0 %v10555_v36  ;;  %v2022_v36 = vrot.slane %v12383_v55, 4  ;;  %v6837_v6 = vrot.slane %v12401_v29, 4  ;;  %v10049_v18 = vld [vmem:[%s13578_s5 + $0x210] sm:$0x3] }
 0x3b9   :  { %1930 = vmatmul.mubr.f32.vlgmr.msra.gmra.mrb[12].mxu1 %v1778_v20  ;;  %v9815_v20 = vld [vmem:[%s13578_s5 + $0x218] sm:$0x3] }
 0x3ba   :  { %10307 = vmatpush1.bf16.xpose.msra.mxu1 %v10306_v22  ;;  %9792 = vmatprep.mubr.msk.f32.mxu1 %vm487_vm8, %v1781_v34  ;;  %v9803_v22 = vld [vmem:[%s13578_s5 + $0x1d0] sm:$0x3]  ;;  %v2021_v34 = vrot.slane %v12387_v12, 4 }
 0x3bb   :  { %10309 = vmatprep.subr.bf16.mxu1 %v10308_v46  ;;  %v10319_v46 = vpack.c.bf16 %v9803_v22, %v9797_v11 }
 0x3bc   :  { %6676 = vmatmul.mubr.f32.vlgmr.msra.gmra.mrb[12].mxu0 %v6592_v61  ;;  %v10039_v61 = vld [vmem:[%s13578_s5 + $0x1d8] sm:$0x3] }
 0x3bd   :  { %10558 = vmatpush1.bf16.xpose.msra.mxu0 %v10557_v54  ;;  %6745 = vmatprep.mubr.f32.mxu0 %v6595_v37  ;;  %v10321_v54 = vpack.c.bf16 %v9815_v20, %v9809_v57  ;;  %v10570_v37 = vpack.c.bf16 %v10036_v17, %v9795_v28  ;;  %v10572_v16 = vpack.c.bf16 %v10039_v61, %v9798_v39  ;;  %v6836_v28 = vrot.slane %v12405_v1, 4  ;;  %v9812_v20 = vld [vmem:[%s13578_s5 + $0x200] sm:$0xff]  ;;  %v9824_v17 = vld [vmem:[%s13578_s5 + $0x248] sm:$0xff] }
 0x3be   :  { %10561 = vmatprep.subr.msk.bf16.mxu0 %vm12342_vm9, %v10559_v3  ;;  %v2024_v3 = vrot.slane %v12425_v31, 4  ;;  %v6839_v39 = vrot.slane %v12458_v15, 4  ;;  %v10051_v61 = vld [vmem:[%s13578_s5 + $0x220] sm:$0x3] }
 0x3c1   :  { %2000 = vmatmul.mubr.f32.vlgmr.msra.gmra.mrb[12].mxu1 %v1780_v53  ;;  %v9817_v53 = vld [vmem:[%s13578_s5 + $0x228] sm:$0x3] }
 0x3c2   :  { %10311 = vmatpush1.bf16.xpose.msra.mxu1 %v10310_v9  ;;  %2102 = vmatprep.mubr.f32.mxu1 %v2020_v47  ;;  %v9814_v9 = vld [vmem:[%s13578_s5 + $0x210] sm:$0x3]  ;;  %v2023_v47 = vrot.slane %v12429_v62, 4 }
 0x3c3   :  { %10313 = vmatprep.subr.bf16.mxu1 %v10312_v56  ;;  %v10323_v56 = vpack.c.bf16 %v9814_v9, %v9808_v5 }
 0x3c4   :  { %6746 = vmatmul.mubr.f32.vlgmr.msra.gmra.mrb[12].mxu0 %v6594_v58  ;;  %v10050_v58 = vld [vmem:[%s13578_s5 + $0x218] sm:$0x3] }
 0x3c5   :  { %10563 = vmatpush1.bf16.xpose.msra.mxu0 %v10562_v14  ;;  %10027 = vmatprep.mubr.msk.f32.mxu0 %vm487_vm8, %v6597_v19  ;;  %v10325_v14 = vpack.c.bf16 %v9817_v53, %v9811_v2  ;;  %v10575_v19 = vpack.c.bf16 %v10038_v45, %v9797_v11  ;;  %v10577_v63 = vpack.c.bf16 %v10050_v58, %v9809_v57  ;;  %v6838_v11 = vrot.slane %v12465_v52, 4  ;;  %v9823_v53 = vld [vmem:[%s13578_s5 + $0x240] sm:$0xff]  ;;  %v9826_v45 = vld [vmem:[%s13578_s5 + $0x258] sm:$0xff]  ;;  %v10053_v58 = vld [vmem:[%s13578_s5 + $0x230] sm:$0x3] }
 0x3c6   :  { %10565 = vmatprep.subr.bf16.mxu0 %v10564_v0  ;;  %v2263_v0 = vrot.slane %v12331_v42, 5  ;;  %v7077_v57 = vrot.slane %v12357_v40, 5 }
 0x3c9   :  { %2103 = vmatmul.mubr.f32.vlgmr.msra.gmra.mrb[12].mxu1 %v2019_v24  ;;  %v9819_v24 = vld [vmem:[%s13578_s5 + $0x238] sm:$0x3] }
 0x3ca   :  { %10315 = vmatpush1.bf16.xpose.msra.mxu1 %v10314_v4  ;;  %2172 = vmatprep.mubr.f32.mxu1 %v2022_v36  ;;  %v9816_v4 = vld [vmem:[%s13578_s5 + $0x220] sm:$0x3]  ;;  %v2262_v36 = vrot.slane %v12335_v25, 5 }
 0x3cb   :  { %10318 = vmatprep.subr.msk.bf16.mxu1 %vm12342_vm9, %v10316_v41  ;;  %v10327_v41 = vpack.c.bf16 %v9816_v4, %v9810_v33 }
 0x3cc   :  { %6816 = vmatmul.mubr.f32.vlgmr.msra.gmra.mrb[12].mxu0 %v6596_v7  ;;  %v10052_v7 = vld [vmem:[%s13578_s5 + $0x228] sm:$0x3] }
 0x3cd   :  { %10567 = vmatpush1.bf16.xpose.msra.mxu0 %v10566_v44  ;;  %6917 = vmatprep.mubr.f32.mxu0 %v6835_v59  ;;  %v10329_v44 = vpack.c.bf16 %v9819_v24, %v9813_v50  ;;  %v10579_v59 = vpack.c.bf16 %v10049_v18, %v9808_v5  ;;  %v10581_v22 = vpack.c.bf16 %v10052_v7, %v9811_v2  ;;  %v7076_v5 = vrot.slane %v12361_v23, 5  ;;  %v9825_v24 = vld [vmem:[%s13578_s5 + $0x250] sm:$0xff]  ;;  %v9828_v18 = vld [vmem:[%s13578_s5 + $0x268] sm:$0xff] }
 0x3ce   :  { %10569 = vmatprep.subr.bf16.mxu0 %v10568_v38  ;;  %v2265_v38 = vrot.slane %v12383_v55, 5  ;;  %v7079_v2 = vrot.slane %v12401_v29, 5  ;;  %v10064_v7 = vld [vmem:[%s13578_s5 + $0x270] sm:$0x3] }
 0x3d1   :  { %2173 = vmatmul.mubr.f32.vlgmr.msra.gmra.mrb[12].mxu1 %v2021_v34  ;;  %v9830_v34 = vld [vmem:[%s13578_s5 + $0x278] sm:$0x3] }
 0x3d2   :  { %10320 = vmatpush1.bf16.xpose.msra.mxu1 %v10319_v46  ;;  %9807 = vmatprep.mubr.msk.f32.mxu1 %vm487_vm8, %v2024_v3  ;;  %v9818_v46 = vld [vmem:[%s13578_s5 + $0x230] sm:$0x3]  ;;  %v2264_v3 = vrot.slane %v12387_v12, 5 }
 0x3d3   :  { %10322 = vmatprep.subr.bf16.mxu1 %v10321_v54  ;;  %v10332_v54 = vpack.c.bf16 %v9818_v46, %v9812_v20 }
 0x3d4   :  { %6918 = vmatmul.mubr.f32.vlgmr.msra.gmra.mrb[12].mxu0 %v6834_v43  ;;  %v10054_v43 = vld [vmem:[%s13578_s5 + $0x238] sm:$0x3] }
 0x3d5   :  { %10571 = vmatpush1.bf16.xpose.msra.mxu0 %v10570_v37  ;;  %6987 = vmatprep.mubr.f32.mxu0 %v6837_v6  ;;  %v10334_v37 = vpack.c.bf16 %v9830_v34, %v9824_v17  ;;  %v10583_v6 = vpack.c.bf16 %v10051_v61, %v9810_v33  ;;  %v10585_v9 = vpack.c.bf16 %v10054_v43, %v9813_v50  ;;  %v7078_v33 = vrot.slane %v12405_v1, 5  ;;  %v9827_v34 = vld [vmem:[%s13578_s5 + $0x260] sm:$0xff]  ;;  %v9839_v61 = vld [vmem:[%s13578_s5 + $0x2a8] sm:$0xff] }
 0x3d6   :  { %10574 = vmatprep.subr.msk.bf16.mxu0 %vm12342_vm9, %v10572_v16  ;;  %v2267_v16 = vrot.slane %v12425_v31, 5  ;;  %v7081_v50 = vrot.slane %v12458_v15, 5  ;;  %v10066_v43 = vld [vmem:[%s13578_s5 + $0x280] sm:$0x3] }
 0x3d9   :  { %2243 = vmatmul.mubr.f32.vlgmr.msra.gmra.mrb[12].mxu1 %v2023_v47  ;;  %v9832_v47 = vld [vmem:[%s13578_s5 + $0x288] sm:$0x3] }
 0x3da   :  { %10324 = vmatpush1.bf16.xpose.msra.mxu1 %v10323_v56  ;;  %2345 = vmatprep.mubr.f32.mxu1 %v2263_v0  ;;  %v9829_v56 = vld [vmem:[%s13578_s5 + $0x270] sm:$0x3]  ;;  %v2266_v0 = vrot.slane %v12429_v62, 5 }
 0x3db   :  { %10326 = vmatprep.subr.bf16.mxu1 %v10325_v14  ;;  %v10336_v14 = vpack.c.bf16 %v9829_v56, %v9823_v53 }
 0x3dc   :  { %6988 = vmatmul.mubr.f32.vlgmr.msra.gmra.mrb[12].mxu0 %v6836_v28  ;;  %v10065_v28 = vld [vmem:[%s13578_s5 + $0x278] sm:$0x3] }
 0x3dd   :  { %10576 = vmatpush1.bf16.xpose.msra.mxu0 %v10575_v19  ;;  %10042 = vmatprep.mubr.msk.f32.mxu0 %vm487_vm8, %v6839_v39  ;;  %v10338_v19 = vpack.c.bf16 %v9832_v47, %v9826_v45  ;;  %v10588_v39 = vpack.c.bf16 %v10053_v58, %v9812_v20  ;;  %v10590_v4 = vpack.c.bf16 %v10065_v28, %v9824_v17  ;;  %v7080_v20 = vrot.slane %v12465_v52, 5  ;;  %v9838_v47 = vld [vmem:[%s13578_s5 + $0x2a0] sm:$0xff]  ;;  %v9841_v58 = vld [vmem:[%s13578_s5 + $0x2b8] sm:$0xff]  ;;  %v10068_v28 = vld [vmem:[%s13578_s5 + $0x290] sm:$0x3] }
 0x3de   :  { %10578 = vmatprep.subr.bf16.mxu0 %v10577_v63  ;;  %v2506_v63 = vrot.slane %v12331_v42, 6  ;;  %v7319_v17 = vrot.slane %v12357_v40, 6 }
 0x3e1   :  { %2346 = vmatmul.mubr.f32.vlgmr.msra.gmra.mrb[12].mxu1 %v2262_v36  ;;  %v9834_v36 = vld [vmem:[%s13578_s5 + $0x298] sm:$0x3] }
 0x3e2   :  { %10328 = vmatpush1.bf16.xpose.msra.mxu1 %v10327_v41  ;;  %2415 = vmatprep.mubr.f32.mxu1 %v2265_v38  ;;  %v9831_v41 = vld [vmem:[%s13578_s5 + $0x280] sm:$0x3]  ;;  %v2505_v38 = vrot.slane %v12335_v25, 6 }
 0x3e3   :  { %10331 = vmatprep.subr.msk.bf16.mxu1 %vm12342_vm9, %v10329_v44  ;;  %v10340_v44 = vpack.c.bf16 %v9831_v41, %v9825_v24 }
 0x3e4   :  { %7058 = vmatmul.mubr.f32.vlgmr.msra.gmra.mrb[12].mxu0 %v6838_v11  ;;  %v10067_v11 = vld [vmem:[%s13578_s5 + $0x288] sm:$0x3] }
 0x3e5   :  { %10580 = vmatpush1.bf16.xpose.msra.mxu0 %v10579_v59  ;;  %7159 = vmatprep.mubr.f32.mxu0 %v7077_v57  ;;  %v10342_v59 = vpack.c.bf16 %v9834_v36, %v9828_v18  ;;  %v10592_v57 = vpack.c.bf16 %v10064_v7, %v9823_v53  ;;  %v10594_v46 = vpack.c.bf16 %v10067_v11, %v9826_v45  ;;  %v7318_v53 = vrot.slane %v12361_v23, 6  ;;  %v9840_v36 = vld [vmem:[%s13578_s5 + $0x2b0] sm:$0xff]  ;;  %v9849_v7 = vld [vmem:[%s13578_s5 + $0x2f8] sm:$0x3] }
 0x3e6   :  { %10582 = vmatprep.subr.bf16.mxu0 %v10581_v22  ;;  %v2508_v22 = vrot.slane %v12383_v55, 6  ;;  %v7321_v45 = vrot.slane %v12401_v29, 6  ;;  %v2748_v11 = vrot.slane %v12335_v25, 7  ;;  %v9842_v25 = vld [vmem:[%s13578_s5 + $0x2c0] sm:$0xff] }
 0x3e9   :  { %2416 = vmatmul.mubr.f32.vlgmr.msra.gmra.mrb[12].mxu1 %v2264_v3  ;;  %v9845_v3 = vld [vmem:[%s13578_s5 + $0x2d8] sm:$0x3] }
 0x3ea   :  { %10333 = vmatpush1.bf16.xpose.msra.mxu1 %v10332_v54  ;;  %9822 = vmatprep.mubr.msk.f32.mxu1 %vm487_vm8, %v2267_v16  ;;  %v9833_v54 = vld [vmem:[%s13578_s5 + $0x290] sm:$0x3]  ;;  %v2507_v16 = vrot.slane %v12387_v12, 6 }
 0x3eb   :  { %10335 = vmatprep.subr.bf16.mxu1 %v10334_v37  ;;  %v10345_v37 = vpack.c.bf16 %v9833_v54, %v9827_v34  ;;  %v7561_v54 = vrot.slane %v12357_v40, 7  ;;  %v9860_v40 = vld [vmem:[%s13578_s5 + $0x338] sm:$0x3] }
 0x3ec   :  { %7160 = vmatmul.mubr.f32.vlgmr.msra.gmra.mrb[12].mxu0 %v7076_v5  ;;  %v10069_v5 = vld [vmem:[%s13578_s5 + $0x298] sm:$0x3] }
 0x3ed   :  { %10584 = vmatpush1.bf16.xpose.msra.mxu0 %v10583_v6  ;;  %7229 = vmatprep.mubr.f32.mxu0 %v7079_v2  ;;  %v10347_v6 = vpack.c.bf16 %v9845_v3, %v9839_v61  ;;  %v10596_v2 = vpack.c.bf16 %v10066_v43, %v9825_v24  ;;  %v10598_v56 = vpack.c.bf16 %v10069_v5, %v9828_v18  ;;  %v7320_v24 = vrot.slane %v12405_v1, 6 }
 0x3ee   :  { %10587 = vmatprep.subr.msk.bf16.mxu0 %vm12342_vm9, %v10585_v9  ;;  %v2510_v9 = vrot.slane %v12425_v31, 6  ;;  %v7323_v18 = vrot.slane %v12458_v15, 6  ;;  %v2750_v43 = vrot.slane %v12387_v12, 7  ;;  %v2753_v5 = vrot.slane %v12425_v31, 7  ;;  %v9853_v12 = vld [vmem:[%s13578_s5 + $0x300] sm:$0xff] }
 0x3ef   :  { %v9859_v31 = vld [vmem:[%s13578_s5 + $0x330] sm:$0x3] }
 0x3f1   :  { %2486 = vmatmul.mubr.f32.vlgmr.msra.gmra.mrb[12].mxu1 %v2266_v0  ;;  %v9847_v0 = vld [vmem:[%s13578_s5 + $0x2e8] sm:$0x3] }
 0x3f2   :  { %10337 = vmatpush1.bf16.xpose.msra.mxu1 %v10336_v14  ;;  %2588 = vmatprep.mubr.f32.mxu1 %v2506_v63  ;;  %v9844_v14 = vld [vmem:[%s13578_s5 + $0x2d0] sm:$0x3]  ;;  %v2509_v63 = vrot.slane %v12429_v62, 6 }
 0x3f3   :  { %10339 = vmatprep.subr.bf16.mxu1 %v10338_v19  ;;  %v10349_v19 = vpack.c.bf16 %v9844_v14, %v9838_v47  ;;  %v10362_v14 = vpack.c.bf16 %v9859_v31, %v9853_v12 }
 0x3f4   :  { %7230 = vmatmul.mubr.f32.vlgmr.msra.gmra.mrb[12].mxu0 %v7078_v33  ;;  %v10080_v33 = vld [vmem:[%s13578_s5 + $0x2d8] sm:$0x3] }
 0x3f5   :  { %10589 = vmatpush1.bf16.xpose.msra.mxu0 %v10588_v39  ;;  %10057 = vmatprep.mubr.msk.f32.mxu0 %vm487_vm8, %v7081_v50  ;;  %v10351_v39 = vpack.c.bf16 %v9847_v0, %v9841_v58  ;;  %v10601_v50 = vpack.c.bf16 %v10068_v28, %v9827_v34  ;;  %v10603_v41 = vpack.c.bf16 %v10080_v33, %v9839_v61  ;;  %v9854_v61 = vld [vmem:[%s13578_s5 + $0x308] sm:$0xff] }
 0x3f6   :  { %10591 = vmatprep.subr.bf16.mxu0 %v10590_v4  ;;  %v2749_v4 = vrot.slane %v12331_v42, 7  ;;  %v9843_v42 = vld [vmem:[%s13578_s5 + $0x2c8] sm:$0xff] }
 0x3f9   :  { %2589 = vmatmul.mubr.f32.vlgmr.msra.gmra.mrb[12].mxu1 %v2505_v38 }
 0x3fa   :  { %10341 = vmatpush1.bf16.xpose.msra.mxu1 %v10340_v44  ;;  %2658 = vmatprep.mubr.f32.mxu1 %v2508_v22  ;;  %v9846_v44 = vld [vmem:[%s13578_s5 + $0x2e0] sm:$0x3]  ;;  %v10355_v22 = vpack.c.bf16 %v9849_v7, %v9843_v42 }
 0x3fb   :  { %10344 = vmatprep.subr.msk.bf16.mxu1 %vm12342_vm9, %v10342_v59  ;;  %v10353_v38 = vpack.c.bf16 %v9846_v44, %v9840_v36  ;;  %v10079_v59 = vld [vmem:[%s13578_s5 + $0x2d0] sm:$0x3] }
 0x3fc   :  { %7300 = vmatmul.mubr.f32.vlgmr.msra.gmra.mrb[12].mxu0 %v7080_v20  ;;  %v2751_v20 = vrot.slane %v12383_v55, 7  ;;  %v9848_v55 = vld [vmem:[%s13578_s5 + $0x2f0] sm:$0x3] }
 0x3fd   :  { %10593 = vmatpush1.bf16.xpose.msra.mxu0 %v10592_v57  ;;  %7401 = vmatprep.mubr.f32.mxu0 %v7319_v17  ;;  %v10082_v57 = vld [vmem:[%s13578_s5 + $0x2e8] sm:$0x3]  ;;  %v7322_v17 = vrot.slane %v12465_v52, 6  ;;  %v10358_v3 = vpack.c.bf16 %v9848_v55, %v9842_v25 }
 0x3fe   :  { %10595 = vmatprep.subr.bf16.mxu0 %v10594_v46  ;;  %v10605_v46 = vpack.c.bf16 %v10079_v59, %v9838_v47  ;;  %v10607_v34 = vpack.c.bf16 %v10082_v57, %v9841_v58  ;;  %v10083_v58 = vld [vmem:[%s13578_s5 + $0x2f0] sm:$0x3]  ;;  %v7564_v59 = vrot.slane %v12465_v52, 7  ;;  %v9857_v57 = vld [vmem:[%s13578_s5 + $0x320] sm:$0xff] }
 0x401   :  { %2659 = vmatmul.mubr.f32.vlgmr.msra.gmra.mrb[12].mxu1 %v2507_v16  ;;  %v10360_v16 = vpack.c.bf16 %v9860_v40, %v9854_v61 }
 0x402   :  { %10346 = vmatpush1.bf16.xpose.msra.mxu1 %v10345_v37  ;;  %9837 = vmatprep.mubr.msk.f32.mxu1 %vm487_vm8, %v2510_v9  ;;  %v10081_v37 = vld [vmem:[%s13578_s5 + $0x2e0] sm:$0x3] }
 0x403   :  { %10348 = vmatprep.subr.bf16.mxu1 %v10347_v6  ;;  %v10084_v6 = vld [vmem:[%s13578_s5 + $0x2f8] sm:$0x3]  ;;  %v10609_v9 = vpack.c.bf16 %v10081_v37, %v9840_v36 }
 0x404   :  { %7402 = vmatmul.mubr.f32.vlgmr.msra.gmra.mrb[12].mxu0 %v7318_v53  ;;  %v10611_v53 = vpack.c.bf16 %v10084_v6, %v9843_v42  ;;  %v10097_v42 = vld [vmem:[%s13578_s5 + $0x348] sm:$0x3]  ;;  %v9874_v6 = vld [vmem:[%s13578_s5 + $0x390] sm:$0x3] }
 0x405   :  { %10597 = vmatpush1.bf16.xpose.msra.mxu0 %v10596_v2  ;;  %7471 = vmatprep.mubr.f32.mxu0 %v7321_v45  ;;  %v7560_v2 = vrot.slane %v12361_v23, 7  ;;  %v7563_v45 = vrot.slane %v12401_v29, 7  ;;  %v9856_v23 = vld [vmem:[%s13578_s5 + $0x318] sm:$0xff]  ;;  %v9862_v29 = vld [vmem:[%s13578_s5 + $0x348] sm:$0x3] }
 0x406   :  { %10600 = vmatprep.subr.msk.bf16.mxu0 %vm12342_vm9, %v10598_v56  ;;  %v12927_v56 = vpop.permute.xlu0 %788  ;;  %v10364_v0 = vpack.c.bf16 %v9862_v29, %v9856_v23 }
 0x407   :  { %v872_v47 = vadd.f32 %v12337_v21, %v12927_v56  ;;  %v2752_v21 = vrot.slane %v12429_v62, 7  ;;  %v7565_v62 = vrot.slane %v12458_v15, 7  ;;  %v1026_v52 = vadd.f32 %v12431_v8, %v12927_v56  ;;  %v10096_v8 = vld [vmem:[%s13578_s5 + $0x340] sm:$0x3] }
 0x409   :  { %2729 = vmatmul.mubr.f32.vlgmr.msra.gmra.mrb[12].mxu1 %v2509_v63  ;;  %v12953_v28 = vmax.f32 %v872_v47, 0.0  ;;  %v10614_v63 = vpack.c.bf16 %v10083_v58, %v9842_v25  ;;  %v5768_v25 = vadd.f32 %v12407_v27, %v12927_v56  ;;  %v13023_v40 = vmax.f32 %v1026_v52, 0.0  ;;  %v10110_v47 = vld [vmem:[%s13578_s5 + $0x398] sm:$0x3] }
 0x40a   :  { %10350 = vmatpush1.bf16.xpose.msra.mxu1 %v10349_v19  ;;  %2831 = vmatprep.mubr.f32.mxu1 %v2749_v4  ;;  %v10095_v19 = vld [vmem:[%s13578_s5 + $0x338] sm:$0x3]  ;;  %v870_v4 = vadd.f32 %v12333_v32, %v12927_v56  ;;  %v1024_v27 = vadd.f32 %v12427_v35, %v12927_v56  ;;  %v5766_v35 = vadd.f32 %v12403_v26, %v12927_v56 }
 0x40b   :  { %10352 = vmatprep.subr.bf16.mxu1 %v10351_v39  ;;  %v7562_v39 = vrot.slane %v12405_v1, 7  ;;  %v10616_v33 = vpack.c.bf16 %v10095_v19, %v9854_v61  ;;  %v9858_v1 = vld [vmem:[%s13578_s5 + $0x328] sm:$0xff]  ;;  %v9864_v32 = vld [vmem:[%s13578_s5 + $0x358] sm:$0x3]  ;;  %v3230_v26 = vrot.slane %v12953_v28, 1 }
 0x40c   :  { %7472 = vmatmul.mubr.f32.vlgmr.msra.gmra.mrb[12].mxu0 %v7320_v24  ;;  %v9861_v24 = vld [vmem:[%s13578_s5 + $0x340] sm:$0x3]  ;;  %v12978_v36 = vmax.f32 %v870_v4, 0.0  ;;  %v10368_v44 = vpack.c.bf16 %v9864_v32, %v9858_v1  ;;  %v10099_v61 = vld [vmem:[%s13578_s5 + $0x358] sm:$0x3]  ;;  %v13064_v29 = vmax.f32 %v5766_v35, 0.0 }
 0x40d   :  { %10602 = vmatpush1.bf16.xpose.msra.mxu0 %v10601_v50  ;;  %10072 = vmatprep.mubr.msk.f32.mxu0 %vm487_vm8, %v7323_v18  ;;  %v9855_v50 = vld [vmem:[%s13578_s5 + $0x310] sm:$0xff]  ;;  %v10624_v37 = vpack.c.bf16 %v10099_v61, %v9858_v1  ;;  %v9879_v19 = vld [vmem:[%s13578_s5 + $0x3b8] sm:$0x3]  ;;  %v9872_v32 = vld [vmem:[%s13578_s5 + $0x380] sm:$0xff] }
 0x40e   :  { %10604 = vmatprep.subr.bf16.mxu0 %v10603_v41  ;;  %v949_v41 = vadd.f32 %v12389_v10, %v12927_v56  ;;  %v10366_v15 = vpack.c.bf16 %v9861_v24, %v9855_v50  ;;  %v10094_v18 = vld [vmem:[%s13578_s5 + $0x330] sm:$0x3]  ;;  %v5691_v10 = vadd.f32 %v12363_v60, %v12927_v56  ;;  %v947_v60 = vadd.f32 %v12385_v13, %v12927_v56  ;;  %v9875_v13 = vld [vmem:[%s13578_s5 + $0x398] sm:$0x3] }
 0x40f   :  { %v3229_v4 = vrot.slane %v12978_v36, 1  ;;  %v9885_v35 = vld [vmem:[%s13578_s5 + $0x3d0] sm:$0xff] }
 0x410   :  { %v12985_v7 = vmax.f32 %v949_v41, 0.0 }
 0x411   :  { %2832 = vmatmul.mubr.f32.vlgmr.msra.gmra.mrb[12].mxu1 %v2748_v11  ;;  %v10620_v11 = vpack.c.bf16 %v10097_v42, %v9856_v23  ;;  %v10111_v42 = vld [vmem:[%s13578_s5 + $0x3a0] sm:$0x3] }
 0x412   :  { %10354 = vmatpush1.bf16.xpose.msra.mxu1 %v10353_v38  ;;  %2901 = vmatprep.mubr.f32.mxu1 %v2751_v20  ;;  %v10618_v38 = vpack.c.bf16 %v10094_v18, %v9853_v12  ;;  %v9863_v20 = vld [vmem:[%s13578_s5 + $0x350] sm:$0x3]  ;;  %v5845_v12 = vadd.f32 %v12463_v49, %v12927_v56  ;;  %v3232_v24 = vrot.slane %v12985_v7, 1  ;;  %v9884_v18 = vld [vmem:[%s13578_s5 + $0x3c8] sm:$0xff] }
 0x413   :  { %10357 = vmatprep.subr.msk.bf16.mxu1 %vm12342_vm9, %v10355_v22  ;;  %v12990_v22 = vmax.f32 %v5691_v10, 0.0  ;;  %v9870_v49 = vld [vmem:[%s13578_s5 + $0x370] sm:$0xff]  ;;  %v9890_v10 = vld [vmem:[%s13578_s5 + $0x3f8] sm:$0x3] }
 0x414   :  { %7542 = vmatmul.mubr.f32.vlgmr.msra.gmra.mrb[12].mxu0 %v7322_v17  ;;  %v5689_v17 = vadd.f32 %v12359_v30, %v12927_v56  ;;  %v10622_v30 = vpack.c.bf16 %v10096_v8, %v9855_v50  ;;  %v13066_v58 = vmax.f32 %v5845_v12, 0.0  ;;  %v10112_v50 = vld [vmem:[%s13578_s5 + $0x3a8] sm:$0x3]  ;;  %v9894_v12 = vld [vmem:[%s13578_s5 + $0x418] sm:$0x3] }
 0x415   :  { %10606 = vmatpush1.bf16.xpose.msra.mxu0 %v10605_v46  ;;  %7643 = vmatprep.mubr.f32.mxu0 %v7561_v54  ;;  %v9869_v46 = vld [vmem:[%s13578_s5 + $0x368] sm:$0xff]  ;;  %v13016_v54 = vmax.f32 %v947_v60, 0.0  ;;  %v3234_v60 = vrot.slane %v13023_v40, 1 }
 0x416   :  { %10608 = vmatprep.subr.bf16.mxu0 %v10607_v34  ;;  %v10371_v34 = vpack.c.bf16 %v9863_v20, %v9857_v57  ;;  %v10373_v55 = vpack.c.bf16 %v9875_v13, %v9869_v46  ;;  %v9883_v13 = vld [vmem:[%s13578_s5 + $0x3c0] sm:$0xff]  ;;  %v9892_v8 = vld [vmem:[%s13578_s5 + $0x408] sm:$0x3] }
 0x419   :  { %2902 = vmatmul.mubr.f32.vlgmr.msra.gmra.mrb[12].mxu1 %v2750_v43  ;;  %v13030_v43 = vmax.f32 %v5768_v25, 0.0 }
 0x41a   :  { %10359 = vmatpush1.bf16.xpose.msra.mxu1 %v10358_v3  ;;  %9852 = vmatprep.mubr.msk.f32.mxu1 %vm487_vm8, %v2753_v5  ;;  %v13026_v3 = vmax.f32 %v5689_v17, 0.0  ;;  %v9871_v5 = vld [vmem:[%s13578_s5 + $0x378] sm:$0xff]  ;;  %v9889_v17 = vld [vmem:[%s13578_s5 + $0x3f0] sm:$0x3] }
 0x41b   :  { %10361 = vmatprep.subr.bf16.mxu1 %v10360_v16  ;;  %v9868_v16 = vld [vmem:[%s13578_s5 + $0x360] sm:$0xff]  ;;  %v10388_v25 = vpack.c.bf16 %v9889_v17, %v9883_v13 }
 0x41c   :  { %7644 = vmatmul.mubr.f32.vlgmr.msra.gmra.mrb[12].mxu0 %v7560_v2  ;;  %v10375_v2 = vpack.c.bf16 %v9874_v6, %v9868_v16  ;;  %v8039_v20 = vrot.slane %v13026_v3, 1  ;;  %v8041_v6 = vrot.slane %v13064_v29, 1 }
 0x41d   :  { %10610 = vmatpush1.bf16.xpose.msra.mxu0 %v10609_v9  ;;  %7713 = vmatprep.mubr.f32.mxu0 %v7563_v45  ;;  %v9877_v9 = vld [vmem:[%s13578_s5 + $0x3a8] sm:$0x3]  ;;  %v13055_v45 = vmax.f32 %v1024_v27, 0.0  ;;  %v3473_v27 = vrot.slane %v12953_v28, 2 }
 0x41e   :  { %10613 = vmatprep.subr.msk.bf16.mxu0 %vm12342_vm9, %v10611_v53  ;;  %v10098_v53 = vld [vmem:[%s13578_s5 + $0x350] sm:$0x3]  ;;  %v10377_v31 = vpack.c.bf16 %v9877_v9, %v9871_v5  ;;  %v8044_v9 = vrot.slane %v13066_v58, 1 }
 0x41f   :  { %v10627_v23 = vpack.c.bf16 %v10098_v53, %v9857_v57  ;;  %v10635_v57 = vpack.c.bf16 %v10111_v42, %v9870_v49  ;;  %v3233_v61 = vrot.slane %v13055_v45, 1  ;;  %v9888_v53 = vld [vmem:[%s13578_s5 + $0x3e8] sm:$0xff]  ;;  %v9898_v42 = vld [vmem:[%s13578_s5 + $0x420] sm:$0xff] }
 0x421   :  { %2972 = vmatmul.mubr.f32.vlgmr.msra.gmra.mrb[12].mxu1 %v2752_v21  ;;  %v9876_v21 = vld [vmem:[%s13578_s5 + $0x3a0] sm:$0x3] }
 0x422   :  { %10363 = vmatpush1.bf16.xpose.msra.mxu1 %v10362_v14  ;;  %3064 = vmatprep.mubr.f32.mxu1 %v12953_v28  ;;  %v10629_v14 = vpack.c.bf16 %v10110_v47, %v9869_v46  ;;  %v8042_v46 = vrot.slane %v13030_v43, 1  ;;  %v10124_v47 = vld [vmem:[%s13578_s5 + $0x3f0] sm:$0x3] }
 0x423   :  { %10365 = vmatprep.subr.bf16.mxu1 %v10364_v0  ;;  %v9873_v0 = vld [vmem:[%s13578_s5 + $0x388] sm:$0xff] }
 0x424   :  { %7714 = vmatmul.mubr.f32.vlgmr.msra.gmra.mrb[12].mxu0 %v7562_v39  ;;  %v10379_v39 = vpack.c.bf16 %v9876_v21, %v9870_v49  ;;  %v3475_v49 = vrot.slane %v12985_v7, 2  ;;  %v10644_v21 = vpack.c.bf16 %v10124_v47, %v9883_v13  ;;  %v3716_v13 = vrot.slane %v12953_v28, 3  ;;  %v9902_v47 = vld [vmem:[%s13578_s5 + $0x440] sm:$0xff] }
 0x425   :  { %10615 = vmatpush1.bf16.xpose.msra.mxu0 %v10614_v63  ;;  %10087 = vmatprep.mubr.msk.f32.mxu0 %vm487_vm8, %v7565_v62  ;;  %v5843_v63 = vadd.f32 %v12460_v48, %v12927_v56  ;;  %v10381_v62 = vpack.c.bf16 %v9879_v19, %v9873_v0  ;;  %v10633_v48 = vpack.c.bf16 %v10112_v50, %v9871_v5  ;;  %v8040_v56 = vrot.slane %v12990_v22, 1 }
 0x426   :  { %10617 = vmatprep.subr.bf16.mxu0 %v10616_v33  ;;  %v10109_v33 = vld [vmem:[%s13578_s5 + $0x390] sm:$0x3] }
 0x427   :  { %v10631_v41 = vpack.c.bf16 %v10109_v33, %v9868_v16  ;;  %v13093_v1 = vmax.f32 %v5843_v63, 0.0  ;;  %v8282_v63 = vrot.slane %v12990_v22, 2  ;;  %v9893_v33 = vld [vmem:[%s13578_s5 + $0x410] sm:$0x3] }
 0x429   :  { %3065 = vmatmul.mubr.f32.vlgmr.msra.gmra.mrb[12].mxu1 %v12978_v36 }
 0x42a   :  { %10367 = vmatpush1.bf16.xpose.msra.mxu1 %v10366_v15  ;;  %3134 = vmatprep.mubr.f32.mxu1 %v12985_v7  ;;  %v9878_v15 = vld [vmem:[%s13578_s5 + $0x3b0] sm:$0x3] }
 0x42b   :  { %10370 = vmatprep.subr.msk.bf16.mxu1 %vm12342_vm9, %v10368_v44  ;;  %v10384_v44 = vpack.c.bf16 %v9878_v15, %v9872_v32 }
 0x42c   :  { %7784 = vmatmul.mubr.f32.vlgmr.msra.gmra.mrb[12].mxu0 %v7564_v59  ;;  %v10386_v59 = vpack.c.bf16 %v9890_v10, %v9884_v18 }
 0x42d   :  { %10619 = vmatpush1.bf16.xpose.msra.mxu0 %v10618_v38  ;;  %7875 = vmatprep.mubr.f32.mxu0 %v12990_v22  ;;  %v3231_v38 = vrot.slane %v13016_v54, 1 }
 0x42e   :  { %10621 = vmatprep.subr.bf16.mxu0 %v10620_v11  ;;  %v10114_v11 = vld [vmem:[%s13578_s5 + $0x3b8] sm:$0x3] }
 0x42f   :  { %v10637_v52 = vpack.c.bf16 %v10114_v11, %v9873_v0  ;;  %v8043_v0 = vrot.slane %v13093_v1, 1  ;;  %v9907_v11 = vld [vmem:[%s13578_s5 + $0x468] sm:$0x3] }
 0x431   :  { %3135 = vmatmul.mubr.f32.vlgmr.msra.gmra.mrb[12].mxu1 %v13016_v54 }
 0x432   :  { %10372 = vmatpush1.bf16.xpose.msra.mxu1 %v10371_v34  ;;  %9867 = vmatprep.mubr.msk.f32.mxu1 %vm487_vm8, %v13023_v40  ;;  %v9886_v34 = vld [vmem:[%s13578_s5 + $0x3d8] sm:$0xff] }
 0x433   :  { %10374 = vmatprep.subr.bf16.mxu1 %v10373_v55  ;;  %v10113_v55 = vld [vmem:[%s13578_s5 + $0x3b0] sm:$0x3] }
 0x434   :  { %7876 = vmatmul.mubr.f32.vlgmr.msra.gmra.mrb[12].mxu0 %v13026_v3  ;;  %v10640_v16 = vpack.c.bf16 %v10113_v55, %v9872_v32  ;;  %v3477_v32 = vrot.slane %v13023_v40, 2  ;;  %v9900_v55 = vld [vmem:[%s13578_s5 + $0x430] sm:$0xff] }
 0x435   :  { %10623 = vmatpush1.bf16.xpose.msra.mxu0 %v10622_v30  ;;  %7945 = vmatprep.mubr.f32.mxu0 %v13030_v43  ;;  %v10390_v30 = vpack.c.bf16 %v9892_v8, %v9886_v34 }
 0x436   :  { %10626 = vmatprep.subr.msk.bf16.mxu0 %vm12342_vm9, %v10624_v37  ;;  %v10125_v37 = vld [vmem:[%s13578_s5 + $0x3f8] sm:$0x3] }
 0x437   :  { %v10642_v5 = vpack.c.bf16 %v10125_v37, %v9884_v18  ;;  %v8281_v18 = vrot.slane %v13026_v3, 2  ;;  %v9909_v37 = vld [vmem:[%s13578_s5 + $0x478] sm:$0x3] }
 0x439   :  { %3205 = vmatmul.mubr.f32.vlgmr.msra.gmra.mrb[12].mxu1 %v13055_v45 }
 0x43a   :  { %10376 = vmatpush1.bf16.xpose.msra.mxu1 %v10375_v2  ;;  %3312 = vmatprep.mubr.f32.mxu1 %v3230_v26  ;;  %v9891_v2 = vld [vmem:[%s13578_s5 + $0x400] sm:$0x3]  ;;  %v3472_v26 = vrot.slane %v12978_v36, 2 }
 0x43b   :  { %10378 = vmatprep.subr.bf16.mxu1 %v10377_v31  ;;  %v10392_v31 = vpack.c.bf16 %v9891_v2, %v9885_v35 }
 0x43c   :  { %7946 = vmatmul.mubr.f32.vlgmr.msra.gmra.mrb[12].mxu0 %v13064_v29 }
 0x43d   :  { %10628 = vmatpush1.bf16.xpose.msra.mxu0 %v10627_v23  ;;  %10102 = vmatprep.mubr.msk.f32.mxu0 %vm487_vm8, %v13066_v58  ;;  %v10394_v23 = vpack.c.bf16 %v9894_v12, %v9888_v53 }
 0x43e   :  { %10630 = vmatprep.subr.bf16.mxu0 %v10629_v14  ;;  %v10127_v14 = vld [vmem:[%s13578_s5 + $0x408] sm:$0x3] }
 0x43f   :  { %v10646_v19 = vpack.c.bf16 %v10127_v14, %v9886_v34  ;;  %v8283_v34 = vrot.slane %v13064_v29, 2  ;;  %v9920_v14 = vld [vmem:[%s13578_s5 + $0x4b8] sm:$0x3] }
 0x441   :  { %3313 = vmatmul.mubr.f32.vlgmr.msra.gmra.mrb[12].mxu1 %v3229_v4  ;;  %v9899_v4 = vld [vmem:[%s13578_s5 + $0x428] sm:$0xff] }
 0x442   :  { %10380 = vmatpush1.bf16.xpose.msra.mxu1 %v10379_v39  ;;  %3382 = vmatprep.mubr.f32.mxu1 %v3232_v24  ;;  %v9887_v39 = vld [vmem:[%s13578_s5 + $0x3e0] sm:$0xff] }
 0x443   :  { %10383 = vmatprep.subr.msk.bf16.mxu1 %vm12342_vm9, %v10381_v62  ;;  %v9905_v62 = vld [vmem:[%s13578_s5 + $0x458] sm:$0x3]  ;;  %v10397_v50 = vpack.c.bf16 %v9893_v33, %v9887_v39  ;;  %v10126_v24 = vld [vmem:[%s13578_s5 + $0x400] sm:$0x3] }
 0x444   :  { %8016 = vmatmul.mubr.f32.vlgmr.msra.gmra.mrb[12].mxu0 %v13093_v1  ;;  %v10648_v15 = vpack.c.bf16 %v10126_v24, %v9885_v35  ;;  %v3718_v35 = vrot.slane %v12985_v7, 3  ;;  %v9913_v24 = vld [vmem:[%s13578_s5 + $0x480] sm:$0xff] }
 0x445   :  { %10632 = vmatpush1.bf16.xpose.msra.mxu0 %v10631_v41  ;;  %8122 = vmatprep.mubr.f32.mxu0 %v8040_v56  ;;  %v3474_v41 = vrot.slane %v13016_v54, 2  ;;  %v10129_v56 = vld [vmem:[%s13578_s5 + $0x418] sm:$0x3] }
 0x446   :  { %10634 = vmatprep.subr.bf16.mxu0 %v10633_v48  ;;  %v10399_v48 = vpack.c.bf16 %v9905_v62, %v9899_v4  ;;  %v10650_v10 = vpack.c.bf16 %v10129_v56, %v9888_v53  ;;  %v8285_v53 = vrot.slane %v13093_v1, 2  ;;  %v9922_v56 = vld [vmem:[%s13578_s5 + $0x4c8] sm:$0x3] }
 0x449   :  { %3383 = vmatmul.mubr.f32.vlgmr.msra.gmra.mrb[12].mxu1 %v3231_v38  ;;  %v9904_v38 = vld [vmem:[%s13578_s5 + $0x450] sm:$0x3] }
 0x44a   :  { %10385 = vmatpush1.bf16.xpose.msra.mxu1 %v10384_v44  ;;  %9882 = vmatprep.mubr.msk.f32.mxu1 %vm487_vm8, %v3234_v60  ;;  %v8284_v44 = vrot.slane %v13030_v43, 2  ;;  %v10401_v60 = vpack.c.bf16 %v9904_v38, %v9898_v42 }
 0x44b   :  { %10387 = vmatprep.subr.bf16.mxu1 %v10386_v59  ;;  %v9901_v59 = vld [vmem:[%s13578_s5 + $0x438] sm:$0xff] }
 0x44c   :  { %8123 = vmatmul.mubr.f32.vlgmr.msra.gmra.mrb[12].mxu0 %v8039_v20  ;;  %v3476_v20 = vrot.slane %v13055_v45, 2 }
 0x44d   :  { %10636 = vmatpush1.bf16.xpose.msra.mxu0 %v10635_v57  ;;  %8192 = vmatprep.mubr.f32.mxu0 %v8042_v46  ;;  %v10128_v57 = vld [vmem:[%s13578_s5 + $0x410] sm:$0x3]  ;;  %v10140_v46 = vld [vmem:[%s13578_s5 + $0x458] sm:$0x3] }
 0x44e   :  { %10639 = vmatprep.subr.msk.bf16.mxu0 %vm12342_vm9, %v10637_v52  ;;  %v10403_v52 = vpack.c.bf16 %v9907_v11, %v9901_v59  ;;  %v10653_v17 = vpack.c.bf16 %v10128_v57, %v9887_v39  ;;  %v10655_v8 = vpack.c.bf16 %v10140_v46, %v9899_v4  ;;  %v3720_v39 = vrot.slane %v13023_v40, 3  ;;  %v9915_v57 = vld [vmem:[%s13578_s5 + $0x490] sm:$0xff]  ;;  %v9924_v46 = vld [vmem:[%s13578_s5 + $0x4d8] sm:$0x3] }
 0x44f   :  { %v8523_v4 = vrot.slane %v13026_v3, 3 }
 0x451   :  { %3453 = vmatmul.mubr.f32.vlgmr.msra.gmra.mrb[12].mxu1 %v3233_v61  ;;  %v9906_v61 = vld [vmem:[%s13578_s5 + $0x460] sm:$0x3] }
 0x452   :  { %10389 = vmatpush1.bf16.xpose.msra.mxu1 %v10388_v25  ;;  %3555 = vmatprep.mubr.f32.mxu1 %v3473_v27  ;;  %v8286_v25 = vrot.slane %v13066_v58, 2  ;;  %v10405_v27 = vpack.c.bf16 %v9906_v61, %v9900_v55 }
 0x453   :  { %10391 = vmatprep.subr.bf16.mxu1 %v10390_v30  ;;  %v9903_v30 = vld [vmem:[%s13578_s5 + $0x448] sm:$0xff] }
 0x454   :  { %8193 = vmatmul.mubr.f32.vlgmr.msra.gmra.mrb[12].mxu0 %v8041_v6  ;;  %v3715_v6 = vrot.slane %v12978_v36, 3 }
 0x455   :  { %10641 = vmatpush1.bf16.xpose.msra.mxu0 %v10640_v16  ;;  %10117 = vmatprep.mubr.msk.f32.mxu0 %vm487_vm8, %v8044_v9  ;;  %v10139_v16 = vld [vmem:[%s13578_s5 + $0x450] sm:$0x3]  ;;  %v10142_v9 = vld [vmem:[%s13578_s5 + $0x468] sm:$0x3] }
 0x456   :  { %10643 = vmatprep.subr.bf16.mxu0 %v10642_v5  ;;  %v10407_v5 = vpack.c.bf16 %v9909_v37, %v9903_v30  ;;  %v10657_v2 = vpack.c.bf16 %v10139_v16, %v9898_v42  ;;  %v10659_v12 = vpack.c.bf16 %v10142_v9, %v9901_v59  ;;  %v3959_v42 = vrot.slane %v12953_v28, 4  ;;  %v9917_v16 = vld [vmem:[%s13578_s5 + $0x4a0] sm:$0xff]  ;;  %v9935_v9 = vld [vmem:[%s13578_s5 + $0x518] sm:$0x3] }
 0x457   :  { %v8525_v59 = vrot.slane %v13064_v29, 3 }
 0x459   :  { %3556 = vmatmul.mubr.f32.vlgmr.msra.gmra.mrb[12].mxu1 %v3472_v26  ;;  %v9908_v26 = vld [vmem:[%s13578_s5 + $0x470] sm:$0x3] }
 0x45a   :  { %10393 = vmatpush1.bf16.xpose.msra.mxu1 %v10392_v31  ;;  %3625 = vmatprep.mubr.f32.mxu1 %v3475_v49  ;;  %v8524_v31 = vrot.slane %v12990_v22, 3  ;;  %v10410_v49 = vpack.c.bf16 %v9908_v26, %v9902_v47 }
 0x45b   :  { %10396 = vmatprep.subr.msk.bf16.mxu1 %vm12342_vm9, %v10394_v23  ;;  %v9914_v23 = vld [vmem:[%s13578_s5 + $0x488] sm:$0xff] }
 0x45c   :  { %8263 = vmatmul.mubr.f32.vlgmr.msra.gmra.mrb[12].mxu0 %v8043_v0  ;;  %v3717_v0 = vrot.slane %v13016_v54, 3 }
 0x45d   :  { %10645 = vmatpush1.bf16.xpose.msra.mxu0 %v10644_v21  ;;  %8364 = vmatprep.mubr.f32.mxu0 %v8282_v63  ;;  %v10141_v21 = vld [vmem:[%s13578_s5 + $0x460] sm:$0x3]  ;;  %v10144_v63 = vld [vmem:[%s13578_s5 + $0x478] sm:$0x3] }
 0x45e   :  { %10647 = vmatprep.subr.bf16.mxu0 %v10646_v19  ;;  %v10412_v19 = vpack.c.bf16 %v9920_v14, %v9914_v23  ;;  %v10661_v33 = vpack.c.bf16 %v10141_v21, %v9900_v55  ;;  %v10663_v62 = vpack.c.bf16 %v10144_v63, %v9903_v30  ;;  %v3961_v55 = vrot.slane %v12985_v7, 4  ;;  %v9928_v21 = vld [vmem:[%s13578_s5 + $0x4e0] sm:$0xff]  ;;  %v9937_v63 = vld [vmem:[%s13578_s5 + $0x528] sm:$0x3] }
 0x45f   :  { %v8527_v30 = vrot.slane %v13093_v1, 3 }
 0x461   :  { %3626 = vmatmul.mubr.f32.vlgmr.msra.gmra.mrb[12].mxu1 %v3474_v41  ;;  %v9919_v41 = vld [vmem:[%s13578_s5 + $0x4b0] sm:$0x3] }
 0x462   :  { %10398 = vmatpush1.bf16.xpose.msra.mxu1 %v10397_v50  ;;  %9897 = vmatprep.mubr.msk.f32.mxu1 %vm487_vm8, %v3477_v32  ;;  %v8526_v50 = vrot.slane %v13030_v43, 3  ;;  %v10414_v32 = vpack.c.bf16 %v9919_v41, %v9913_v24 }
 0x463   :  { %10400 = vmatprep.subr.bf16.mxu1 %v10399_v48  ;;  %v9916_v48 = vld [vmem:[%s13578_s5 + $0x498] sm:$0xff] }
 0x464   :  { %8365 = vmatmul.mubr.f32.vlgmr.msra.gmra.mrb[12].mxu0 %v8281_v18  ;;  %v3719_v18 = vrot.slane %v13055_v45, 3 }
 0x465   :  { %10649 = vmatpush1.bf16.xpose.msra.mxu0 %v10648_v15  ;;  %8434 = vmatprep.mubr.f32.mxu0 %v8284_v44  ;;  %v10143_v15 = vld [vmem:[%s13578_s5 + $0x470] sm:$0x3]  ;;  %v10155_v44 = vld [vmem:[%s13578_s5 + $0x4b8] sm:$0x3] }
 0x466   :  { %10652 = vmatprep.subr.msk.bf16.mxu0 %vm12342_vm9, %v10650_v10  ;;  %v10416_v10 = vpack.c.bf16 %v9922_v56, %v9916_v48  ;;  %v10666_v38 = vpack.c.bf16 %v10143_v15, %v9902_v47  ;;  %v10668_v11 = vpack.c.bf16 %v10155_v44, %v9914_v23  ;;  %v3963_v47 = vrot.slane %v13023_v40, 4  ;;  %v9930_v15 = vld [vmem:[%s13578_s5 + $0x4f0] sm:$0xff]  ;;  %v9939_v44 = vld [vmem:[%s13578_s5 + $0x538] sm:$0x3] }
 0x467   :  { %v8765_v23 = vrot.slane %v13026_v3, 4 }
 0x469   :  { %3696 = vmatmul.mubr.f32.vlgmr.msra.gmra.mrb[12].mxu1 %v3476_v20  ;;  %v9921_v20 = vld [vmem:[%s13578_s5 + $0x4c0] sm:$0x3] }
 0x46a   :  { %10402 = vmatpush1.bf16.xpose.msra.mxu1 %v10401_v60  ;;  %3798 = vmatprep.mubr.f32.mxu1 %v3716_v13  ;;  %v8528_v60 = vrot.slane %v13066_v58, 3  ;;  %v10418_v13 = vpack.c.bf16 %v9921_v20, %v9915_v57 }
 0x46b   :  { %10404 = vmatprep.subr.bf16.mxu1 %v10403_v52  ;;  %v9918_v52 = vld [vmem:[%s13578_s5 + $0x4a8] sm:$0xff] }
 0x46c   :  { %8435 = vmatmul.mubr.f32.vlgmr.msra.gmra.mrb[12].mxu0 %v8283_v34  ;;  %v3958_v34 = vrot.slane %v12978_v36, 4 }
 0x46d   :  { %10654 = vmatpush1.bf16.xpose.msra.mxu0 %v10653_v17  ;;  %10132 = vmatprep.mubr.msk.f32.mxu0 %vm487_vm8, %v8286_v25  ;;  %v10154_v17 = vld [vmem:[%s13578_s5 + $0x4b0] sm:$0x3]  ;;  %v10157_v25 = vld [vmem:[%s13578_s5 + $0x4c8] sm:$0x3] }
 0x46e   :  { %10656 = vmatprep.subr.bf16.mxu0 %v10655_v8  ;;  %v10420_v8 = vpack.c.bf16 %v9924_v46, %v9918_v52  ;;  %v10670_v61 = vpack.c.bf16 %v10154_v17, %v9913_v24  ;;  %v10672_v37 = vpack.c.bf16 %v10157_v25, %v9916_v48  ;;  %v4202_v24 = vrot.slane %v12953_v28, 5  ;;  %v9932_v17 = vld [vmem:[%s13578_s5 + $0x500] sm:$0xff]  ;;  %v9950_v25 = vld [vmem:[%s13578_s5 + $0x578] sm:$0x3] }
 0x46f   :  { %v8767_v48 = vrot.slane %v13064_v29, 4 }
 0x471   :  { %3799 = vmatmul.mubr.f32.vlgmr.msra.gmra.mrb[12].mxu1 %v3715_v6  ;;  %v9923_v6 = vld [vmem:[%s13578_s5 + $0x4d0] sm:$0x3] }
 0x472   :  { %10406 = vmatpush1.bf16.xpose.msra.mxu1 %v10405_v27  ;;  %3868 = vmatprep.mubr.f32.mxu1 %v3718_v35  ;;  %v8766_v27 = vrot.slane %v12990_v22, 4  ;;  %v10423_v35 = vpack.c.bf16 %v9923_v6, %v9917_v16 }
 0x473   :  { %10409 = vmatprep.subr.msk.bf16.mxu1 %vm12342_vm9, %v10407_v5  ;;  %v9929_v5 = vld [vmem:[%s13578_s5 + $0x4e8] sm:$0xff] }
 0x474   :  { %8505 = vmatmul.mubr.f32.vlgmr.msra.gmra.mrb[12].mxu0 %v8285_v53  ;;  %v3960_v53 = vrot.slane %v13016_v54, 4 }
 0x475   :  { %10658 = vmatpush1.bf16.xpose.msra.mxu0 %v10657_v2  ;;  %8606 = vmatprep.mubr.f32.mxu0 %v8524_v31  ;;  %v10156_v2 = vld [vmem:[%s13578_s5 + $0x4c0] sm:$0x3]  ;;  %v10159_v31 = vld [vmem:[%s13578_s5 + $0x4d8] sm:$0x3] }
 0x476   :  { %10660 = vmatprep.subr.bf16.mxu0 %v10659_v12  ;;  %v10425_v12 = vpack.c.bf16 %v9935_v9, %v9929_v5  ;;  %v10674_v26 = vpack.c.bf16 %v10156_v2, %v9915_v57  ;;  %v10676_v14 = vpack.c.bf16 %v10159_v31, %v9918_v52  ;;  %v4204_v57 = vrot.slane %v12985_v7, 5  ;;  %v9943_v2 = vld [vmem:[%s13578_s5 + $0x540] sm:$0xff]  ;;  %v9952_v31 = vld [vmem:[%s13578_s5 + $0x588] sm:$0x3] }
 0x477   :  { %v8769_v52 = vrot.slane %v13093_v1, 4 }
 0x479   :  { %3869 = vmatmul.mubr.f32.vlgmr.msra.gmra.mrb[12].mxu1 %v3717_v0  ;;  %v9934_v0 = vld [vmem:[%s13578_s5 + $0x510] sm:$0x3] }
 0x47a   :  { %10411 = vmatpush1.bf16.xpose.msra.mxu1 %v10410_v49  ;;  %9912 = vmatprep.mubr.msk.f32.mxu1 %vm487_vm8, %v3720_v39  ;;  %v8768_v49 = vrot.slane %v13030_v43, 4  ;;  %v10427_v39 = vpack.c.bf16 %v9934_v0, %v9928_v21 }
 0x47b   :  { %10413 = vmatprep.subr.bf16.mxu1 %v10412_v19  ;;  %v9931_v19 = vld [vmem:[%s13578_s5 + $0x4f8] sm:$0xff] }
 0x47c   :  { %8607 = vmatmul.mubr.f32.vlgmr.msra.gmra.mrb[12].mxu0 %v8523_v4  ;;  %v3962_v4 = vrot.slane %v13055_v45, 4 }
 0x47d   :  { %10662 = vmatpush1.bf16.xpose.msra.mxu0 %v10661_v33  ;;  %8676 = vmatprep.mubr.f32.mxu0 %v8526_v50  ;;  %v10158_v33 = vld [vmem:[%s13578_s5 + $0x4d0] sm:$0x3]  ;;  %v10170_v50 = vld [vmem:[%s13578_s5 + $0x518] sm:$0x3] }
 0x47e   :  { %10665 = vmatprep.subr.msk.bf16.mxu0 %vm12342_vm9, %v10663_v62  ;;  %v10429_v62 = vpack.c.bf16 %v9937_v63, %v9931_v19  ;;  %v10679_v41 = vpack.c.bf16 %v10158_v33, %v9917_v16  ;;  %v10681_v56 = vpack.c.bf16 %v10170_v50, %v9929_v5  ;;  %v4206_v16 = vrot.slane %v13023_v40, 5  ;;  %v9945_v33 = vld [vmem:[%s13578_s5 + $0x550] sm:$0xff]  ;;  %v9954_v50 = vld [vmem:[%s13578_s5 + $0x598] sm:$0x3] }
 0x47f   :  { %v9007_v5 = vrot.slane %v13026_v3, 5 }
 0x481   :  { %3939 = vmatmul.mubr.f32.vlgmr.msra.gmra.mrb[12].mxu1 %v3719_v18  ;;  %v9936_v18 = vld [vmem:[%s13578_s5 + $0x520] sm:$0x3] }
 0x482   :  { %10415 = vmatpush1.bf16.xpose.msra.mxu1 %v10414_v32  ;;  %4041 = vmatprep.mubr.f32.mxu1 %v3959_v42  ;;  %v8770_v32 = vrot.slane %v13066_v58, 4  ;;  %v10431_v42 = vpack.c.bf16 %v9936_v18, %v9930_v15 }
 0x483   :  { %10417 = vmatprep.subr.bf16.mxu1 %v10416_v10  ;;  %v9933_v10 = vld [vmem:[%s13578_s5 + $0x508] sm:$0xff] }
 0x484   :  { %8677 = vmatmul.mubr.f32.vlgmr.msra.gmra.mrb[12].mxu0 %v8525_v59  ;;  %v4201_v59 = vrot.slane %v12978_v36, 5 }
 0x485   :  { %10667 = vmatpush1.bf16.xpose.msra.mxu0 %v10666_v38  ;;  %10147 = vmatprep.mubr.msk.f32.mxu0 %vm487_vm8, %v8528_v60  ;;  %v10169_v38 = vld [vmem:[%s13578_s5 + $0x510] sm:$0x3]  ;;  %v10172_v60 = vld [vmem:[%s13578_s5 + $0x528] sm:$0x3] }
 0x486   :  { %10669 = vmatprep.subr.bf16.mxu0 %v10668_v11  ;;  %v10433_v11 = vpack.c.bf16 %v9939_v44, %v9933_v10  ;;  %v10683_v20 = vpack.c.bf16 %v10169_v38, %v9928_v21  ;;  %v10685_v46 = vpack.c.bf16 %v10172_v60, %v9931_v19  ;;  %v4445_v21 = vrot.slane %v12953_v28, 6  ;;  %v9947_v38 = vld [vmem:[%s13578_s5 + $0x560] sm:$0xff]  ;;  %v9965_v60 = vld [vmem:[%s13578_s5 + $0x5d8] sm:$0x3] }
 0x487   :  { %v9009_v19 = vrot.slane %v13064_v29, 5 }
 0x489   :  { %4042 = vmatmul.mubr.f32.vlgmr.msra.gmra.mrb[12].mxu1 %v3958_v34  ;;  %v9938_v34 = vld [vmem:[%s13578_s5 + $0x530] sm:$0x3] }
 0x48a   :  { %10419 = vmatpush1.bf16.xpose.msra.mxu1 %v10418_v13  ;;  %4111 = vmatprep.mubr.f32.mxu1 %v3961_v55  ;;  %v9008_v13 = vrot.slane %v12990_v22, 5  ;;  %v10436_v55 = vpack.c.bf16 %v9938_v34, %v9932_v17 }
 0x48b   :  { %10422 = vmatprep.subr.msk.bf16.mxu1 %vm12342_vm9, %v10420_v8  ;;  %v9944_v8 = vld [vmem:[%s13578_s5 + $0x548] sm:$0xff] }
 0x48c   :  { %8747 = vmatmul.mubr.f32.vlgmr.msra.gmra.mrb[12].mxu0 %v8527_v30  ;;  %v4203_v30 = vrot.slane %v13016_v54, 5 }
 0x48d   :  { %10671 = vmatpush1.bf16.xpose.msra.mxu0 %v10670_v61  ;;  %8848 = vmatprep.mubr.f32.mxu0 %v8766_v27  ;;  %v10171_v61 = vld [vmem:[%s13578_s5 + $0x520] sm:$0x3]  ;;  %v10174_v27 = vld [vmem:[%s13578_s5 + $0x538] sm:$0x3] }
 0x48e   :  { %10673 = vmatprep.subr.bf16.mxu0 %v10672_v37  ;;  %v10438_v37 = vpack.c.bf16 %v9950_v25, %v9944_v8  ;;  %v10687_v6 = vpack.c.bf16 %v10171_v61, %v9930_v15  ;;  %v10689_v9 = vpack.c.bf16 %v10174_v27, %v9933_v10  ;;  %v4447_v15 = vrot.slane %v12985_v7, 6  ;;  %v9958_v61 = vld [vmem:[%s13578_s5 + $0x5a0] sm:$0xff]  ;;  %v9967_v27 = vld [vmem:[%s13578_s5 + $0x5e8] sm:$0x3] }
 0x48f   :  { %v9011_v10 = vrot.slane %v13093_v1, 5 }
 0x491   :  { %4112 = vmatmul.mubr.f32.vlgmr.msra.gmra.mrb[12].mxu1 %v3960_v53  ;;  %v9949_v53 = vld [vmem:[%s13578_s5 + $0x570] sm:$0x3] }
 0x492   :  { %10424 = vmatpush1.bf16.xpose.msra.mxu1 %v10423_v35  ;;  %9927 = vmatprep.mubr.msk.f32.mxu1 %vm487_vm8, %v3963_v47  ;;  %v9010_v35 = vrot.slane %v13030_v43, 5  ;;  %v10440_v47 = vpack.c.bf16 %v9949_v53, %v9943_v2 }
 0x493   :  { %10426 = vmatprep.subr.bf16.mxu1 %v10425_v12  ;;  %v9946_v12 = vld [vmem:[%s13578_s5 + $0x558] sm:$0xff] }
 0x494   :  { %8849 = vmatmul.mubr.f32.vlgmr.msra.gmra.mrb[12].mxu0 %v8765_v23  ;;  %v4205_v23 = vrot.slane %v13055_v45, 5 }
 0x495   :  { %10675 = vmatpush1.bf16.xpose.msra.mxu0 %v10674_v26  ;;  %8918 = vmatprep.mubr.f32.mxu0 %v8768_v49  ;;  %v10173_v26 = vld [vmem:[%s13578_s5 + $0x530] sm:$0x3]  ;;  %v10185_v49 = vld [vmem:[%s13578_s5 + $0x578] sm:$0x3] }
 0x496   :  { %10678 = vmatprep.subr.msk.bf16.mxu0 %vm12342_vm9, %v10676_v14  ;;  %v10442_v14 = vpack.c.bf16 %v9952_v31, %v9946_v12  ;;  %v10692_v0 = vpack.c.bf16 %v10173_v26, %v9932_v17  ;;  %v10694_v63 = vpack.c.bf16 %v10185_v49, %v9944_v8  ;;  %v4449_v17 = vrot.slane %v13023_v40, 6  ;;  %v9960_v26 = vld [vmem:[%s13578_s5 + $0x5b0] sm:$0xff] }
 0x497   :  { %v9249_v8 = vrot.slane %v13026_v3, 6 }
 0x499   :  { %4182 = vmatmul.mubr.f32.vlgmr.msra.gmra.mrb[12].mxu1 %v3962_v4  ;;  %v9951_v4 = vld [vmem:[%s13578_s5 + $0x580] sm:$0x3] }
 0x49a   :  { %10428 = vmatpush1.bf16.xpose.msra.mxu1 %v10427_v39  ;;  %4284 = vmatprep.mubr.f32.mxu1 %v4202_v24  ;;  %v9012_v39 = vrot.slane %v13066_v58, 5  ;;  %v10444_v24 = vpack.c.bf16 %v9951_v4, %v9945_v33  ;;  %v9253_v4 = vrot.slane %v13093_v1, 6 }
 0x49b   :  { %10430 = vmatprep.subr.bf16.mxu1 %v10429_v62  ;;  %v9948_v62 = vld [vmem:[%s13578_s5 + $0x568] sm:$0xff] }
 0x49c   :  { %8919 = vmatmul.mubr.f32.vlgmr.msra.gmra.mrb[12].mxu0 %v8767_v48  ;;  %v4444_v48 = vrot.slane %v12978_v36, 6 }
 0x49d   :  { %10680 = vmatpush1.bf16.xpose.msra.mxu0 %v10679_v41  ;;  %10162 = vmatprep.mubr.msk.f32.mxu0 %vm487_vm8, %v8770_v32  ;;  %v10184_v41 = vld [vmem:[%s13578_s5 + $0x570] sm:$0x3]  ;;  %v10187_v32 = vld [vmem:[%s13578_s5 + $0x588] sm:$0x3] }
 0x49e   :  { %10682 = vmatprep.subr.bf16.mxu0 %v10681_v56  ;;  %v10446_v56 = vpack.c.bf16 %v9954_v50, %v9948_v62  ;;  %v10696_v18 = vpack.c.bf16 %v10184_v41, %v9943_v2  ;;  %v10698_v44 = vpack.c.bf16 %v10187_v32, %v9946_v12  ;;  %v4688_v2 = vrot.slane %v12953_v28, 7  ;;  %v9963_v28 = vld [vmem:[%s13578_s5 + $0x5c8] sm:$0xff] }
 0x49f   :  { %v9251_v12 = vrot.slane %v13064_v29, 6  ;;  %v9492_v50 = vrot.slane %v12990_v22, 7  ;;  %v4689_v41 = vrot.slane %v13016_v54, 7 }
 0x4a1   :  { %4285 = vmatmul.mubr.f32.vlgmr.msra.gmra.mrb[12].mxu1 %v4201_v59  ;;  %v9953_v59 = vld [vmem:[%s13578_s5 + $0x590] sm:$0x3] }
 0x4a2   :  { %10432 = vmatpush1.bf16.xpose.msra.mxu1 %v10431_v42  ;;  %4354 = vmatprep.mubr.f32.mxu1 %v4204_v57  ;;  %v9250_v42 = vrot.slane %v12990_v22, 6  ;;  %v10449_v57 = vpack.c.bf16 %v9953_v59, %v9947_v38  ;;  %v10201_v22 = vld [vmem:[%s13578_s5 + $0x5e0] sm:$0x3] }
 0x4a3   :  { %10435 = vmatprep.subr.msk.bf16.mxu1 %vm12342_vm9, %v10433_v11  ;;  %v9959_v11 = vld [vmem:[%s13578_s5 + $0x5a8] sm:$0xff]  ;;  %v10713_v32 = vpack.c.bf16 %v10201_v22, %v9960_v26 }
 0x4a4   :  { %8989 = vmatmul.mubr.f32.vlgmr.msra.gmra.mrb[12].mxu0 %v8769_v52  ;;  %v4446_v52 = vrot.slane %v13016_v54, 6  ;;  %v10203_v54 = vld [vmem:[%s13578_s5 + $0x5f0] sm:$0x3] }
 0x4a5   :  { %10684 = vmatpush1.bf16.xpose.msra.mxu0 %v10683_v20  ;;  %9090 = vmatprep.mubr.f32.mxu0 %v9008_v13  ;;  %v10186_v20 = vld [vmem:[%s13578_s5 + $0x580] sm:$0x3]  ;;  %v10189_v13 = vld [vmem:[%s13578_s5 + $0x598] sm:$0x3] }
 0x4a6   :  { %10686 = vmatprep.subr.bf16.mxu0 %v10685_v46  ;;  %v10451_v46 = vpack.c.bf16 %v9965_v60, %v9959_v11  ;;  %v10700_v34 = vpack.c.bf16 %v10186_v20, %v9945_v33  ;;  %v10702_v25 = vpack.c.bf16 %v10189_v13, %v9948_v62 }
 0x4a9   :  { %4355 = vmatmul.mubr.f32.vlgmr.msra.gmra.mrb[12].mxu1 %v4203_v30  ;;  %v9964_v30 = vld [vmem:[%s13578_s5 + $0x5d0] sm:$0x3] }
 0x4aa   :  { %10437 = vmatpush1.bf16.xpose.msra.mxu1 %v10436_v55  ;;  %9942 = vmatprep.mubr.msk.f32.mxu1 %vm487_vm8, %v4206_v16  ;;  %v9252_v55 = vrot.slane %v13030_v43, 6  ;;  %v10453_v16 = vpack.c.bf16 %v9964_v30, %v9958_v61 }
 0x4ab   :  { %10439 = vmatprep.subr.bf16.mxu1 %v10438_v37  ;;  %v9961_v37 = vld [vmem:[%s13578_s5 + $0x5b8] sm:$0xff] }
 0x4ac   :  { %9091 = vmatmul.mubr.f32.vlgmr.msra.gmra.mrb[12].mxu0 %v9007_v5  ;;  %v4448_v5 = vrot.slane %v13055_v45, 6 }
 0x4ad   :  { %10688 = vmatpush1.bf16.xpose.msra.mxu0 %v10687_v6  ;;  %9160 = vmatprep.mubr.f32.mxu0 %v9010_v35  ;;  %v10188_v6 = vld [vmem:[%s13578_s5 + $0x590] sm:$0x3]  ;;  %v10200_v35 = vld [vmem:[%s13578_s5 + $0x5d8] sm:$0x3] }
 0x4ae   :  { %10691 = vmatprep.subr.msk.bf16.mxu0 %vm12342_vm9, %v10689_v9  ;;  %v10455_v9 = vpack.c.bf16 %v9967_v27, %v9961_v37  ;;  %v10705_v53 = vpack.c.bf16 %v10188_v6, %v9947_v38  ;;  %v10707_v31 = vpack.c.bf16 %v10200_v35, %v9959_v11 }
 0x4b1   :  { %4425 = vmatmul.mubr.f32.vlgmr.msra.gmra.mrb[12].mxu1 %v4205_v23  ;;  %v9966_v23 = vld [vmem:[%s13578_s5 + $0x5e0] sm:$0x3] }
 0x4b2   :  { %10441 = vmatpush1.bf16.xpose.msra.mxu1 %v10440_v47  ;;  %4527 = vmatprep.mubr.f32.mxu1 %v4445_v21  ;;  %v9254_v47 = vrot.slane %v13066_v58, 6  ;;  %v10457_v49 = vpack.c.bf16 %v9966_v23, %v9960_v26  ;;  %v10199_v21 = vld [vmem:[%s13578_s5 + $0x5d0] sm:$0x3] }
 0x4b3   :  { %10443 = vmatprep.subr.bf16.mxu1 %v10442_v14  ;;  %v9969_v14 = vld [vmem:[%s13578_s5 + $0x5f8] sm:$0x3]  ;;  %v10709_v33 = vpack.c.bf16 %v10199_v21, %v9958_v61 }
 0x4b4   :  { %9161 = vmatmul.mubr.f32.vlgmr.msra.gmra.mrb[12].mxu0 %v9009_v19  ;;  %v10459_v19 = vpack.c.bf16 %v9969_v14, %v9963_v28 }
 0x4b5   :  { %10693 = vmatpush1.bf16.xpose.msra.mxu0 %v10692_v0  ;;  %10177 = vmatprep.mubr.msk.f32.mxu0 %vm487_vm8, %v9012_v39  ;;  %v4687_v0 = vrot.slane %v12978_v36, 7  ;;  %v4690_v39 = vrot.slane %v12985_v7, 7  ;;  %v9962_v36 = vld [vmem:[%s13578_s5 + $0x5c0] sm:$0xff]  ;;  %v9968_v7 = vld [vmem:[%s13578_s5 + $0x5f0] sm:$0x3] }
 0x4b6   :  { %10695 = vmatprep.subr.bf16.mxu0 %v10694_v63  ;;  %v10202_v63 = vld [vmem:[%s13578_s5 + $0x5e8] sm:$0x3] }
 0x4b7   :  { %v10711_v62 = vpack.c.bf16 %v10202_v63, %v9961_v37 }
 0x4b9   :  { %4528 = vmatmul.mubr.f32.vlgmr.msra.gmra.mrb[12].mxu1 %v4444_v48  ;;  %v10204_v48 = vld [vmem:[%s13578_s5 + $0x5f8] sm:$0x3]  ;;  %s10983_s5 = smov [#allocation3]  }
 0x4ba   :  { %10445 = vmatpush1.bf16.xpose.msra.mxu1 %v10444_v24  ;;  %4597 = vmatprep.mubr.f32.mxu1 %v4447_v15  ;;  %v10462_v24 = vpack.c.bf16 %v9968_v7, %v9962_v36  ;;  %v9491_v15 = vrot.slane %v13026_v3, 7  ;;  %v9496_v3 = vrot.slane %v13066_v58, 7  ;;  %s9728_s12 = sshll.u32 %s10983_s5, 4  ;;  %s9729_s12 = int_to_ptr.vmem [resolvable:$true] %s9728_s12 }
 0x4bb   :  { %10448 = vmatprep.subr.msk.bf16.mxu1 %vm12342_vm9, %v10446_v56  ;;  %v4692_v56 = vrot.slane %v13023_v40, 7  ;;  %v4691_v40 = vrot.slane %v13055_v45, 7  ;;  %s10941_s13 = scalar_lea.vmem %s9729_s12, 32  ;;  %p10946_p1 = scmp.lt.s32.totalorder %s9729_s12, %s9729_s12 }
 0x4bc   :  { %9231 = vmatmul.mubr.f32.vlgmr.msra.gmra.mrb[12].mxu0 %v9011_v10  ;;  %v9494_v10 = vrot.slane %v13030_v43, 7  ;;  %v9495_v43 = vrot.slane %v13093_v1, 7  ;;  %p10942_p0 = scmp.ne.s32.totalorder %s9729_s12, %s10941_s13  ;;  %p10947_p2 = scmp.lt.s32.totalorder %s10941_s13, %s10941_s13 }
 0x4bd   :  { %10697 = vmatpush1.bf16.xpose.msra.mxu0 %v10696_v18  ;;  %9332 = vmatprep.mubr.f32.mxu0 %v9250_v42  ;;  %v10715_v18 = vpack.c.bf16 %v10204_v48, %v9963_v28  ;;  %v9493_v42 = vrot.slane %v13064_v29, 7 }
 0x4be   :  { %10699 = vmatprep.subr.bf16.mxu0 %v10698_v44  ;;  %v10718_v44 = vpack.c.bf16 %v10203_v54, %v9962_v36  ;;  %p10948_p3 = por %p10947_p2, %p10946_p1 }
 0x4c0   :  { %p10949_p4 = pnand %p10948_p3, %p10942_p0 }
 0x4c1   :  { %4598 = vmatmul.mubr.f32.vlgmr.msra.gmra.mrb[12].mxu1 %v4446_v52 }
 0x4c2   :  { %10450 = vmatpush1.bf16.xpose.msra.mxu1 %v10449_v57  ;;  %9957 = vmatprep.mubr.msk.f32.mxu1 %vm487_vm8, %v4449_v17 }
 0x4c3   :  { %10452 = vmatprep.subr.bf16.mxu1 %v10451_v46 }
 0x4c4   :  { %9333 = vmatmul.mubr.f32.vlgmr.msra.gmra.mrb[12].mxu0 %v9249_v8 }
 0x4c5   :  { %10701 = vmatpush1.bf16.xpose.msra.mxu0 %v10700_v34  ;;  %9402 = vmatprep.mubr.f32.mxu0 %v9252_v55 }
 0x4c6   :  { %10704 = vmatprep.subr.msk.bf16.mxu0 %vm12342_vm9, %v10702_v25 }
 0x4c9   :  { %4668 = vmatmul.mubr.f32.vlgmr.msra.gmra.mrb[12].mxu1 %v4448_v5 }
 0x4ca   :  { %10454 = vmatpush1.bf16.xpose.msra.mxu1 %v10453_v16  ;;  %4770 = vmatprep.mubr.f32.mxu1 %v4688_v2 }
 0x4cb   :  { %10456 = vmatprep.subr.bf16.mxu1 %v10455_v9 }
 0x4cc   :  { %9403 = vmatmul.mubr.f32.vlgmr.msra.gmra.mrb[12].mxu0 %v9251_v12 }
 0x4cd   :  { %10706 = vmatpush1.bf16.xpose.msra.mxu0 %v10705_v53  ;;  %10192 = vmatprep.mubr.msk.f32.mxu0 %vm487_vm8, %v9254_v47 }
 0x4ce   :  { %10708 = vmatprep.subr.bf16.mxu0 %v10707_v31 }
 0x4d1   :  { %4771 = vmatmul.mubr.f32.vlgmr.msra.gmra.mrb[12].mxu1 %v4687_v0 }
 0x4d2   :  { %10458 = vmatpush1.bf16.xpose.msra.mxu1 %v10457_v49  ;;  %4840 = vmatprep.mubr.f32.mxu1 %v4690_v39 }
 0x4d3   :  { %10461 = vmatprep.subr.msk.bf16.mxu1 %vm12342_vm9, %v10459_v19 }
 0x4d4   :  { %9473 = vmatmul.mubr.f32.vlgmr.msra.gmra.mrb[12].mxu0 %v9253_v4 }
 0x4d5   :  { %10710 = vmatpush1.bf16.xpose.msra.mxu0 %v10709_v33  ;;  %9574 = vmatprep.mubr.f32.mxu0 %v9492_v50 }
 0x4d6   :  { %10712 = vmatprep.subr.bf16.mxu0 %v10711_v62 }
 0x4d9   :  { %4841 = vmatmul.mubr.f32.vlgmr.msra.gmra.mrb[12].mxu1 %v4689_v41 }
 0x4da   :  { %10463 = vmatpush1.bf16.xpose.msra.mxu1 %v10462_v24  ;;  %9972 = vmatprep.mubr.msk.f32.mxu1 %vm487_vm8, %v4692_v56 }
 0x4dc   :  { %9575 = vmatmul.mubr.f32.vlgmr.msra.gmra.mrb[12].mxu0 %v9491_v15 }
 0x4dd   :  { %10714 = vmatpush1.bf16.xpose.msra.mxu0 %v10713_v32  ;;  %9644 = vmatprep.mubr.f32.mxu0 %v9494_v10 }
 0x4de   :  { %10717 = vmatprep.subr.msk.bf16.mxu0 %vm12342_vm9, %v10715_v18 }
 0x4e1   :  { %4911 = vmatmul.mubr.f32.vlgmr.msra.gmra.mrb[12].mxu1 %v4691_v40 }
 0x4e4   :  { %9645 = vmatmul.mubr.f32.vlgmr.msra.gmra.mrb[12].mxu0 %v9493_v42 }
 0x4e5   :  { %10719 = vmatpush1.bf16.xpose.msra.mxu0 %v10718_v44  ;;  %10207 = vmatprep.mubr.msk.f32.mxu0 %vm487_vm8, %v9496_v3 }
 0x4ec   :  { %9715 = vmatmul.mubr.f32.vlgmr.msra.gmra.mrb[12].mxu0 %v9495_v43 }
 0x5b4   :  { %v4912_v38 = vpop.f32.mrb[12].mxu1 }
 0x5b5   :  { %v10720_v45 = vadd.f32 %v4912_v38, %v33_v51  ;;  %v4914_v59 = vpop.f32.mrb[13].mxu1 }
 0x5b7   :  { %4918 = vst.msk [vmem:[#allocation3] sm:$0x1] %vm4917_vm10, %v10720_v45 }
 0x5bf   :  { %v9716_v29 = vpop.f32.mrb[12].mxu0 }
 0x5c0   :  { %v10721_v58 = vadd.f32 %v9716_v29, %v33_v51  ;;  %v9718_v11 = vpop.f32.mrb[13].mxu0 }
 0x5c2   :  { %9722 = vst.msk [vmem:[#allocation3 + $0x1] sm:$0x1] %vm4917_vm10, %v10721_v58 }
 0x5c3   :  { %10952 = shalt.err (!%p10949_p4)
}
 0x5c4   :  { %s10953_s15 = scalar_lea.hbm %s13580_s7, 32 }
 0x5c5   :  { %p10954_p5 = scmp.ne.s32.totalorder %s13580_s7, %s10953_s15  ;;  %p10957_p6 = scmp.lt.u32.totalorder %s10953_s15, %s13580_s7 }
 0x5c7   :  { %p10959_p7 = pnand %p10957_p6, %p10954_p5 }
 0x5c9   :  { %10962 = shalt.err (!%p10959_p7)
}
 0x5ca   :  { %s10984_s4 = smov 16   ;;  %s10985_s20 = smov 1  }
 0x5cb   :  { %9734 = dma.vmem_to_hbm [thread:$0]  %s9729_s12, 32, %s13580_s7, [#allocation4], %s10984_s4, %s10984_s4, %s10985_s20  }
 0x5cc   :  { %10963 = dma.done.wait [#allocation4], 32  }
 0x5cd   :  { %10964 = vsyncadd [#allocation4], 4294967264 }
 0x5ce   :  { %9738 = vsyncpa [#allocation4], 1 }

</bundles_post_ra>
